<compile_context>
chip_gen: v5e
topology: v5e:2x2
jax: 0.10.0
libtpu: 0.0.40
codegen_flags: <defaults>
</compile_context>

<pallas_src>
import functools
import math

import jax
import jax.numpy as jnp
from jax.experimental import pallas as pl
from jax.experimental.pallas import tpu as pltpu


def _round_up(x, m):
    return ((x + m - 1) // m) * m


# ----------------------------------------------------------------------------
# Target-chip queries (number of TensorCores the grid can shard over, VMEM)
# ----------------------------------------------------------------------------
def _tpu_target_info():
    kind = ""
    try:
        kind = jax.devices()[0].device_kind.lower()
    except Exception:
        pass
    compact = kind.replace(" ", "")
    single = any(t in compact for t in ("lite", "v5e", "v6e", "v2", "v3"))
    dual = (not single) and any(t in compact for t in ("v4", "v5", "v7", "tpu7"))
    n_cores = 2 if dual else 1

    vmem_cap = None
    try:
        info = pltpu.get_tpu_info()
        for name in ("vmem_capacity_bytes", "vmem_bytes", "vmem_size_bytes"):
            v = getattr(info, name, None)
            if v:
                vmem_cap = int(v)
                break
    except Exception:
        vmem_cap = None
    if vmem_cap is None:
        is_v7 = ("v7" in compact) or ("tpu7" in compact)
        vmem_cap = (64 if is_v7 else 128) * 1024 * 1024
    vmem_limit = int(min(max(vmem_cap // 2, 16 * 1024 * 1024), 96 * 1024 * 1024))
    return n_cores, vmem_limit


def _default_compute_dtype():
    # bf16 MXU operands (f32 accumulation) everywhere except v5e, where these
    # tiny matmuls never fill the MXU and the VPU has no bf16 path.
    try:
        kind = jax.devices()[0].device_kind.lower().replace(" ", "")
    except Exception:
        return jnp.bfloat16
    if "v5e" in kind or "v5lite" in kind:
        return jnp.float32
    return jnp.bfloat16


def _choose_batch_tiling(batch, n_set, packed, n_cores, vmem_limit):
    """Pick the batch row-block TB and the padded batch size.

    Single-TC chips (v5e/v6e): one big grid step (per-step overhead is pure
    loss).  Dual-TC chips (v4/v5p/v7x): >= 2 grid steps so the "parallel"
    batch axis can be sharded across both TensorCores.  TB is capped so the
    per-step activation footprint stays well inside the scoped VMEM limit.
    """
    hid, n_ind, n_head = packed['hidden_dim'], packed['n_ind'], packed['n_head']
    per_row_bytes = 4 * (n_set * packed['in_dim'] + 6 * n_set * hid
                         + 6 * n_ind * hid + 3 * n_head * n_set * n_ind
                         + packed['out_pad'])
    cap = max(vmem_limit // 3, 1 << 20) // max(per_row_bytes, 1)
    max_tb = max(8, min(256, (cap // 8) * 8))
    if n_cores >= 2:
        tb = max(8, min(max_tb, _round_up(pl.cdiv(batch, 2), 8)))
        b_pad = max(_round_up(batch, tb), 2 * tb)
    elif batch <= max_tb:
        tb, b_pad = batch, batch
    else:
        tb = max_tb
        b_pad = _round_up(batch, tb)
    return tb, b_pad


# ----------------------------------------------------------------------------
# Fused kernel: the entire SetTransformer forward for TB batch elements
# ----------------------------------------------------------------------------
def _set_transformer_kernel(*refs, tb, n_head, n_isab, n_mlp,
                            compute_dtype, fuse_heads):
    out_ref = refs[-1]
    it = iter(refs[:-1])
    x_ref = next(it)
    cd = compute_dtype

    def linear(h2, w_ref, b_ref):
        # MXU matmul with compute-dtype operands, f32 accumulation, f32 bias.
        return jnp.dot(h2.astype(cd), w_ref[...],
                       preferred_element_type=jnp.float32) + b_ref[...]

    def softmax(s, exact):
        s = s - jnp.max(s, axis=-1, keepdims=True)
        p = jnp.exp(s)
        den = jnp.sum(p, axis=-1, keepdims=True)
        if exact:
            return p / den                     # exact path (final pooling MAB)
        return p * pl.reciprocal(den, approx=True)   # EUP slot, ~free

    def attention(q3, k3, v3, exact):
        # q3: (TB, Nq, Dv) f32; k3/v3: (TB, Nk, Dv) f32 (keys pre-scaled by
        # 1/sqrt(Dv) via the packed weights; residual uses the unscaled Q_).
        nq, dv = q3.shape[1], q3.shape[2]
        nk = k3.shape[1]
        dh = dv // n_head
        if fuse_heads:
            # All heads in one batched einsum pair: no per-head lane slices /
            # concat, operands cast to the MXU dtype exactly once.
            q4 = q3.reshape(tb, nq, n_head, dh)
            k4 = k3.reshape(tb, nk, n_head, dh)
            v4 = v3.reshape(tb, nk, n_head, dh)
            qc, kc, vc = q4.astype(cd), k4.astype(cd), v4.astype(cd)
            s = jnp.einsum('bqhd,bkhd->bhqk', qc, kc,
                           preferred_element_type=jnp.float32)
            p = softmax(s, exact)
            attn = jnp.einsum('bhqk,bkhd->bqhd', p.astype(cd), vc,
                              preferred_element_type=jnp.float32)
            return (q4 + attn).reshape(tb, nq, dv)
        # Per-head fallback (previously validated), with the casts hoisted.
        qc, kc, vc = q3.astype(cd), k3.astype(cd), v3.astype(cd)
        heads = []
        for h in range(n_head):                  # static head loop
            sl = slice(h * dh, (h + 1) * dh)
            s = jnp.einsum('bqd,bkd->bqk', qc[:, :, sl], kc[:, :, sl],
                           preferred_element_type=jnp.float32)
            p = softmax(s, exact)
            attn = jnp.einsum('bqk,bkd->bqd', p.astype(cd), vc[:, :, sl],
                              preferred_element_type=jnp.float32)
            heads.append(q3[:, :, sl] + attn)    # residual uses unscaled Q_
        return jnp.concatenate(heads, axis=-1)

    def kv_proj(xk, wkv_ref, bkv_ref):
        # Fused K/V projection: one (TB*Nk, Dk) x (Dk, 2*Dv) MXU pass.
        nk, dk = xk.shape[1], xk.shape[2]
        dv = wkv_ref.shape[1] // 2
        kv = linear(xk.reshape(tb * nk, dk), wkv_ref, bkv_ref)
        return kv[:, :dv].reshape(tb, nk, dv), kv[:, dv:].reshape(tb, nk, dv)

    def mab_out(o3, wo_ref, bo_ref):
        nq, dv = o3.shape[1], o3.shape[2]
        o2 = o3.reshape(tb * nq, dv)
        o2 = o2 + jnp.maximum(linear(o2, wo_ref, bo_ref), 0.0)  # O + relu(fc_o(O))
        # TODO(synk): ln=True (LayerNorm) branch of MAB not implemented
        #             (module default ln=False is what is reproduced).
        return o2.reshape(tb, nq, dv)

    def mab_shared_q(q_ref, xk, wkv_ref, bkv_ref, wo_ref, bo_ref, exact=False):
        # Batch-shared queries (inducing points / PMA seed): Q projection was
        # precomputed in f32 at pack time; broadcast only in VMEM, never HBM.
        k3, v3 = kv_proj(xk, wkv_ref, bkv_ref)
        q2 = q_ref[...]                                        # (Nq, Dv) f32
        q3 = jnp.broadcast_to(q2[None, :, :], (tb,) + q2.shape)
        return mab_out(attention(q3, k3, v3, exact), wo_ref, bo_ref)

    def mab_batch_q(xq, xk, wq_ref, bq_ref, wkv_ref, bkv_ref, wo_ref, bo_ref,
                    exact=False):
        k3, v3 = kv_proj(xk, wkv_ref, bkv_ref)
        nq, dq = xq.shape[1], xq.shape[2]
        dv = wq_ref.shape[1]
        q3 = linear(xq.reshape(tb * nq, dq), wq_ref, bq_ref).reshape(tb, nq, dv)
        return mab_out(attention(q3, k3, v3, exact), wo_ref, bo_ref)

    h3 = x_ref[...]                                   # (TB, N, in_dim) f32
    for _ in range(n_isab):                           # fused ISAB stack
        q_i_ref = next(it)                            # I already Q-projected
        m0 = [next(it) for _ in range(4)]             # wkv, bkv, wo, bo
        m1 = [next(it) for _ in range(6)]             # wq, bq, wkv, bkv, wo, bo
        hmid = mab_shared_q(q_i_ref, h3, *m0)         # MAB(I, X) -> (TB, n_ind, hid)
        h3 = mab_batch_q(h3, hmid, *m1)               # MAB(X, H) -> (TB, N, hid)

    q_s_ref = next(it)                                # PMA seed already Q-projected
    mp = [next(it) for _ in range(4)]
    pooled = mab_shared_q(q_s_ref, h3, *mp, exact=True)   # exact softmax here
    h2 = pooled.reshape(tb, pooled.shape[-1])         # .squeeze(1)

    for i in range(n_mlp):                            # fused MLP head
        w_ref = next(it)
        b_ref = next(it)
        h2 = linear(h2, w_ref, b_ref)
        if i < n_mlp - 1:
            h2 = jnp.maximum(h2, 0.0)
    out_ref[...] = h2.astype(out_ref.dtype)           # lane-dense (TB, out_pad)


# ----------------------------------------------------------------------------
# Cost estimate for the whole fused forward (advisory, for the XLA scheduler)
# ----------------------------------------------------------------------------
def _cost_estimate(packed, batch, n_set):
    hid, n_ind, n_head = packed['hidden_dim'], packed['n_ind'], packed['n_head']
    dh = hid // n_head
    dk = packed['in_dim']
    flops = 0
    trans = 0
    for _ in range(packed['n_isab']):
        # MAB(I, X): fused K/V proj from X, attention I<-X, fc_o on n_ind rows.
        flops += 2 * n_set * dk * (2 * hid) + 4 * n_head * n_ind * n_set * dh \
                 + 2 * n_ind * hid * hid
        trans += n_head * n_ind * n_set
        # MAB(X, H): Q proj from X, fused K/V proj from H, attention X<-H, fc_o.
        flops += 2 * n_set * dk * hid + 2 * n_ind * hid * (2 * hid) \
                 + 4 * n_head * n_set * n_ind * dh + 2 * n_set * hid * hid
        trans += n_head * n_set * n_ind
        dk = hid
    # PMA(S, H)
    flops += 2 * n_set * hid * (2 * hid) + 4 * n_head * n_set * dh + 2 * hid * hid
    trans += n_head * n_set
    dims = packed['mlp_dims']
    for i in range(len(dims) - 1):
        flops += 2 * dims[i] * dims[i + 1]
    flops *= batch
    trans *= batch
    bytes_accessed = (batch * n_set * packed['in_dim'] * 4
                      + batch * packed['out_pad'] * 4
                      + sum(int(a.size) * a.dtype.itemsize for a in packed['flat']))
    return pl.CostEstimate(flops=int(flops), transcendentals=int(trans),
                           bytes_accessed=int(bytes_accessed))


# ----------------------------------------------------------------------------
# Wrapper: single pallas_call for the whole model
# ----------------------------------------------------------------------------
def _pallas_forward(packed, x, tb, vmem_limit, *, fuse_heads, single_buffer):
    b_pad, n_set, in_dim = x.shape
    grid = (b_pad // tb,)
    flat = packed['flat']

    in_specs = [pl.BlockSpec((tb, n_set, in_dim), lambda b: (b, 0, 0))]
    for a in flat:
        # Grid-invariant block: resident in VMEM across all batch tiles, never
        # broadcast through HBM.
        idx = lambda b, _nd=a.ndim: (0,) * _nd
        if single_buffer:
            # The block never changes -> single-buffer it (halves weight VMEM).
            in_specs.append(pl.BlockSpec(a.shape, idx,
                                         pipeline_mode=pl.Buffered(1)))
        else:
            in_specs.append(pl.BlockSpec(a.shape, idx))

    kernel = functools.partial(
        _set_transformer_kernel, tb=tb, n_head=packed['n_head'],
        n_isab=packed['n_isab'], n_mlp=packed['n_mlp'],
        compute_dtype=packed['compute_dtype'], fuse_heads=fuse_heads)

    return pl.pallas_call(
        kernel,
        out_shape=jax.ShapeDtypeStruct((b_pad, packed['out_pad']), jnp.float32),
        grid=grid,
        in_specs=in_specs,
        out_specs=pl.BlockSpec((tb, packed['out_pad']), lambda b: (b, 0)),
        compiler_params=pltpu.CompilerParams(
            dimension_semantics=("parallel",),
            vmem_limit_bytes=vmem_limit),
        cost_estimate=_cost_estimate(packed, b_pad, n_set),
    )(x, *flat)


def set_transformer_forward(packed, batch_set_x):
    B, N, _ = batch_set_x.shape
    n_cores, vmem_limit = _tpu_target_info()
    tb, b_pad = _choose_batch_tiling(B, N, packed, n_cores, vmem_limit)
    x = batch_set_x
    if b_pad != B:
        x = jnp.pad(x, ((0, b_pad - B), (0, 0), (0, 0)))
    try:
        # Preferred: all-head fused attention einsums + single-buffered
        # resident weight blocks.
        out = _pallas_forward(packed, x, tb, vmem_limit,
                              fuse_heads=True, single_buffer=True)
        out = jax.block_until_ready(out)
    except Exception:
        # Fallback for Pallas/Mosaic builds that reject multi-batch-dim
        # dot_general or pl.Buffered(1): per-head attention loop + default
        # double buffering (identical math, previously validated constructs).
        out = _pallas_forward(packed, x, tb, vmem_limit,
                              fuse_heads=False, single_buffer=False)
    return out[:B, :packed['out_dim']]


# ----------------------------------------------------------------------------
# Deterministic parameter init (shapes follow the PyTorch module) + packing
# ----------------------------------------------------------------------------
def init_linear(key, din, dout):
    kw, kb = jax.random.split(key)
    bound = 1.0 / math.sqrt(din)
    w = jax.random.uniform(kw, (din, dout), jnp.float32, -bound, bound)
    b = jax.random.uniform(kb, (1, dout), jnp.float32, -bound, bound)
    return w, b


def init_mab(key, dq, dk, dv):
    ks = jax.random.split(key, 4)
    wq, bq = init_linear(ks[0], dq, dv)
    wk, bk = init_linear(ks[1], dk, dv)
    wv, bv = init_linear(ks[2], dk, dv)
    wo, bo = init_linear(ks[3], dv, dv)
    return dict(wq=wq, bq=bq, wk=wk, bk=bk, wv=wv, bv=bv, wo=wo, bo=bo)


def init_isab(key, din, dout, n_ind):
    k_i, k0, k1 = jax.random.split(key, 3)
    bound = math.sqrt(6.0 / (n_ind * dout + dout))       # xavier-uniform style
    ind = jax.random.uniform(k_i, (1, n_ind, dout), jnp.float32, -bound, bound)
    return dict(I=ind,
                mab0=init_mab(k0, dout, din, dout),       # MAB(I, X)
                mab1=init_mab(k1, din, dout, dout))       # MAB(X, H)


def init_pma(key, dim, n_seed):
    k_s, k_m = jax.random.split(key)
    bound = math.sqrt(6.0 / (n_seed * dim + dim))
    seed = jax.random.uniform(k_s, (1, n_seed, dim), jnp.float32, -bound, bound)
    return dict(S=seed, mab=init_mab(k_m, dim, dim, dim))


def init_set_transformer(key, in_dim, out_dim, hidden_dim,
                         n_attention, n_mlp_layer, n_ind, n_head):
    assert hidden_dim % n_head == 0
    keys = jax.random.split(key, n_attention + 2)
    isabs = [init_isab(keys[0], in_dim, hidden_dim, n_ind)]
    for i in range(1, n_attention):
        isabs.append(init_isab(keys[i], hidden_dim, hidden_dim, n_ind))
    pma = init_pma(keys[n_attention], hidden_dim, 1)
    mlp_dims = [hidden_dim] * n_mlp_layer + [out_dim]
    mlp_keys = jax.random.split(keys[n_attention + 1], len(mlp_dims) - 1)
    mlp = [init_linear(mlp_keys[i], mlp_dims[i], mlp_dims[i + 1])
           for i in range(len(mlp_dims) - 1)]
    return dict(isabs=isabs, pma=pma, mlp=mlp, n_head=n_head)


def _pack_mab_kv_o(p, compute_dtype):
    dv = p['wq'].shape[1]
    scale = 1.0 / math.sqrt(float(dv))    # Set Transformer scales by sqrt(dim_V)
    wkv = jnp.concatenate([p['wk'] * scale, p['wv']], axis=1)   # fused K/V proj
    bkv = jnp.concatenate([p['bk'] * scale, p['bv']], axis=1)
    return [wkv.astype(compute_dtype), bkv,
            p['wo'].astype(compute_dtype), p['bo']]


def pack_set_transformer(params, compute_dtype=None):
    """Flatten + preprocess parameters for the fused kernel.

    Folds the 1/sqrt(dim_V) score scale into the packed K weights, fuses the
    K/V projections, precomputes the Q projections of the batch-shared
    queries (inducing points / PMA seed) in f32, and pads the final MLP layer
    to a 128-lane output.
    """
    if compute_dtype is None:
        compute_dtype = _default_compute_dtype()
    flat = []
    for isab in params['isabs']:
        m0, m1 = isab['mab0'], isab['mab1']
        q_i = isab['I'][0] @ m0['wq'] + m0['bq']          # (n_ind, hidden) f32
        flat.append(q_i)
        flat += _pack_mab_kv_o(m0, compute_dtype)
        flat += [m1['wq'].astype(compute_dtype), m1['bq']]
        flat += _pack_mab_kv_o(m1, compute_dtype)
    pm = params['pma']['mab']
    q_s = params['pma']['S'][0] @ pm['wq'] + pm['bq']     # (1, hidden) f32
    flat.append(q_s)
    flat += _pack_mab_kv_o(pm, compute_dtype)

    mlp = params['mlp']
    out_dim = mlp[-1][0].shape[1]
    out_pad = _round_up(out_dim, 128)                     # lane-dense output
    for i, (w, b) in enumerate(mlp):
        if i == len(mlp) - 1 and out_pad != out_dim:
            w = jnp.pad(w, ((0, 0), (0, out_pad - out_dim)))
            b = jnp.pad(b, ((0, 0), (0, out_pad - out_dim)))
        flat += [w.astype(compute_dtype), b]

    hidden_dim = params['isabs'][0]['mab0']['wq'].shape[1]
    return dict(flat=flat,
                n_isab=len(params['isabs']),
                n_mlp=len(mlp),
                n_head=params['n_head'],
                out_dim=out_dim,
                out_pad=out_pad,
                hidden_dim=hidden_dim,
                in_dim=params['isabs'][0]['mab1']['wq'].shape[0],
                n_ind=params['isabs'][0]['I'].shape[1],
                mlp_dims=[w.shape[0] for w, _ in mlp] + [out_dim],
                compute_dtype=compute_dtype)


# ----------------------------------------------------------------------------
# Plain-JAX f32 reference (mirrors the PyTorch forward) for a sanity check
# ----------------------------------------------------------------------------
def _mab_reference(xq, xk, p, n_head):
    q = xq @ p['wq'] + p['bq']
    k = xk @ p['wk'] + p['bk']
    v = xk @ p['wv'] + p['bv']
    dv = q.shape[-1]
    dh = dv // n_head
    outs = []
    for h in range(n_head):
        sl = slice(h * dh, (h + 1) * dh)
        qh, kh, vh = q[..., sl], k[..., sl], v[..., sl]
        s = jnp.einsum('bqd,bkd->bqk', qh, kh) / math.sqrt(dv)
        a = jax.nn.softmax(s, axis=-1)
        outs.append(qh + jnp.einsum('bqk,bkd->bqd', a, vh))
    o = jnp.concatenate(outs, axis=-1)
    return o + jax.nn.relu(o @ p['wo'] + p['bo'])


def set_transformer_reference(params, x):
    n_head = params['n_head']
    h = x
    for isab in params['isabs']:
        B = h.shape[0]
        ind = jnp.broadcast_to(isab['I'], (B,) + isab['I'].shape[1:])
        H = _mab_reference(ind, h, isab['mab0'], n_head)
        h = _mab_reference(h, H, isab['mab1'], n_head)
    B = h.shape[0]
    seed = jnp.broadcast_to(params['pma']['S'], (B,) + params['pma']['S'].shape[1:])
    out = _mab_reference(seed, h, params['pma']['mab'], n_head)[:, 0, :]
    n_mlp = len(params['mlp'])
    for i, (w, b) in enumerate(params['mlp']):
        out = out @ w + b
        if i < n_mlp - 1:
            out = jax.nn.relu(out)
    return out


if __name__ == "__main__":
    key = jax.random.PRNGKey(0)
    k_param, k_x = jax.random.split(key)

    # Small shapes consistent with the module's forward.
    B, N, in_dim = 2, 8, 8
    out_dim, hidden_dim = 6, 32
    n_attention, n_mlp_layer = 2, 2
    n_ind, n_head = 16, 4

    params = init_set_transformer(k_param, in_dim, out_dim, hidden_dim,
                                  n_attention, n_mlp_layer, n_ind, n_head)
    packed = pack_set_transformer(params)
    batch_set_x = jax.random.normal(k_x, (B, N, in_dim), jnp.float32)

    y = set_transformer_forward(packed, batch_set_x)
    y = jax.block_until_ready(y)
    assert y.shape == (B, out_dim), y.shape
    assert y.dtype == jnp.float32

    # Sanity check vs plain-JAX f32 reference (tolerance covers bf16 MXU operands).
    y_ref = set_transformer_reference(params, batch_set_x)
    err = float(jnp.max(jnp.abs(y - y_ref)))
    assert err < 1e-1, f"max abs err vs reference: {err}"

    print("KERNEL_OK")
</pallas_src>

<mosaic_0001>
module attributes {stable_mosaic.version = 11 : i64} {
  func.func @_set_transformer_kernel(%arg0: i32, %arg1: memref<2x8x8xf32, #tpu.memory_space<vmem>>, %arg2: memref<16x32xf32, #tpu.memory_space<vmem>>, %arg3: memref<8x64xbf16, #tpu.memory_space<vmem>>, %arg4: memref<1x64xf32, #tpu.memory_space<vmem>>, %arg5: memref<32x32xbf16, #tpu.memory_space<vmem>>, %arg6: memref<1x32xf32, #tpu.memory_space<vmem>>, %arg7: memref<8x32xbf16, #tpu.memory_space<vmem>>, %arg8: memref<1x32xf32, #tpu.memory_space<vmem>>, %arg9: memref<32x64xbf16, #tpu.memory_space<vmem>>, %arg10: memref<1x64xf32, #tpu.memory_space<vmem>>, %arg11: memref<32x32xbf16, #tpu.memory_space<vmem>>, %arg12: memref<1x32xf32, #tpu.memory_space<vmem>>, %arg13: memref<16x32xf32, #tpu.memory_space<vmem>>, %arg14: memref<32x64xbf16, #tpu.memory_space<vmem>>, %arg15: memref<1x64xf32, #tpu.memory_space<vmem>>, %arg16: memref<32x32xbf16, #tpu.memory_space<vmem>>, %arg17: memref<1x32xf32, #tpu.memory_space<vmem>>, %arg18: memref<32x32xbf16, #tpu.memory_space<vmem>>, %arg19: memref<1x32xf32, #tpu.memory_space<vmem>>, %arg20: memref<32x64xbf16, #tpu.memory_space<vmem>>, %arg21: memref<1x64xf32, #tpu.memory_space<vmem>>, %arg22: memref<32x32xbf16, #tpu.memory_space<vmem>>, %arg23: memref<1x32xf32, #tpu.memory_space<vmem>>, %arg24: memref<1x32xf32, #tpu.memory_space<vmem>>, %arg25: memref<32x64xbf16, #tpu.memory_space<vmem>>, %arg26: memref<1x64xf32, #tpu.memory_space<vmem>>, %arg27: memref<32x32xbf16, #tpu.memory_space<vmem>>, %arg28: memref<1x32xf32, #tpu.memory_space<vmem>>, %arg29: memref<32x32xbf16, #tpu.memory_space<vmem>>, %arg30: memref<1x32xf32, #tpu.memory_space<vmem>>, %arg31: memref<32x128xbf16, #tpu.memory_space<vmem>>, %arg32: memref<1x128xf32, #tpu.memory_space<vmem>>, %arg33: memref<2x128xf32, #tpu.memory_space<vmem>>) attributes {dimension_semantics = [#tpu.dimension_semantics<parallel>], iteration_bounds = array<i64: 1>, scalar_prefetch = 0 : i64, scratch_operands = 0 : i64, tpu.core_type = #tpu.core_type<tc>, window_params = [{transform_indices = @transform_0, window_bounds = array<i64: 2, 8, 8>}, {pipeline_mode = #tpu.pipeline_mode<synchronous>, transform_indices = @transform_1, window_bounds = array<i64: 16, 32>}, {pipeline_mode = #tpu.pipeline_mode<synchronous>, transform_indices = @transform_2, window_bounds = array<i64: 8, 64>}, {pipeline_mode = #tpu.pipeline_mode<synchronous>, transform_indices = @transform_3, window_bounds = array<i64: 1, 64>}, {pipeline_mode = #tpu.pipeline_mode<synchronous>, transform_indices = @transform_4, window_bounds = array<i64: 32, 32>}, {pipeline_mode = #tpu.pipeline_mode<synchronous>, transform_indices = @transform_5, window_bounds = array<i64: 1, 32>}, {pipeline_mode = #tpu.pipeline_mode<synchronous>, transform_indices = @transform_6, window_bounds = array<i64: 8, 32>}, {pipeline_mode = #tpu.pipeline_mode<synchronous>, transform_indices = @transform_7, window_bounds = array<i64: 1, 32>}, {pipeline_mode = #tpu.pipeline_mode<synchronous>, transform_indices = @transform_8, window_bounds = array<i64: 32, 64>}, {pipeline_mode = #tpu.pipeline_mode<synchronous>, transform_indices = @transform_9, window_bounds = array<i64: 1, 64>}, {pipeline_mode = #tpu.pipeline_mode<synchronous>, transform_indices = @transform_10, window_bounds = array<i64: 32, 32>}, {pipeline_mode = #tpu.pipeline_mode<synchronous>, transform_indices = @transform_11, window_bounds = array<i64: 1, 32>}, {pipeline_mode = #tpu.pipeline_mode<synchronous>, transform_indices = @transform_12, window_bounds = array<i64: 16, 32>}, {pipeline_mode = #tpu.pipeline_mode<synchronous>, transform_indices = @transform_13, window_bounds = array<i64: 32, 64>}, {pipeline_mode = #tpu.pipeline_mode<synchronous>, transform_indices = @transform_14, window_bounds = array<i64: 1, 64>}, {pipeline_mode = #tpu.pipeline_mode<synchronous>, transform_indices = @transform_15, window_bounds = array<i64: 32, 32>}, {pipeline_mode = #tpu.pipeline_mode<synchronous>, transform_indices = @transform_16, window_bounds = array<i64: 1, 32>}, {pipeline_mode = #tpu.pipeline_mode<synchronous>, transform_indices = @transform_17, window_bounds = array<i64: 32, 32>}, {pipeline_mode = #tpu.pipeline_mode<synchronous>, transform_indices = @transform_18, window_bounds = array<i64: 1, 32>}, {pipeline_mode = #tpu.pipeline_mode<synchronous>, transform_indices = @transform_19, window_bounds = array<i64: 32, 64>}, {pipeline_mode = #tpu.pipeline_mode<synchronous>, transform_indices = @transform_20, window_bounds = array<i64: 1, 64>}, {pipeline_mode = #tpu.pipeline_mode<synchronous>, transform_indices = @transform_21, window_bounds = array<i64: 32, 32>}, {pipeline_mode = #tpu.pipeline_mode<synchronous>, transform_indices = @transform_22, window_bounds = array<i64: 1, 32>}, {pipeline_mode = #tpu.pipeline_mode<synchronous>, transform_indices = @transform_23, window_bounds = array<i64: 1, 32>}, {pipeline_mode = #tpu.pipeline_mode<synchronous>, transform_indices = @transform_24, window_bounds = array<i64: 32, 64>}, {pipeline_mode = #tpu.pipeline_mode<synchronous>, transform_indices = @transform_25, window_bounds = array<i64: 1, 64>}, {pipeline_mode = #tpu.pipeline_mode<synchronous>, transform_indices = @transform_26, window_bounds = array<i64: 32, 32>}, {pipeline_mode = #tpu.pipeline_mode<synchronous>, transform_indices = @transform_27, window_bounds = array<i64: 1, 32>}, {pipeline_mode = #tpu.pipeline_mode<synchronous>, transform_indices = @transform_28, window_bounds = array<i64: 32, 32>}, {pipeline_mode = #tpu.pipeline_mode<synchronous>, transform_indices = @transform_29, window_bounds = array<i64: 1, 32>}, {pipeline_mode = #tpu.pipeline_mode<synchronous>, transform_indices = @transform_30, window_bounds = array<i64: 32, 128>}, {pipeline_mode = #tpu.pipeline_mode<synchronous>, transform_indices = @transform_31, window_bounds = array<i64: 1, 128>}, {transform_indices = @transform_32, window_bounds = array<i64: 2, 128>}]} {
    %c0 = arith.constant 0 : index
    %c0_0 = arith.constant 0 : index
    %c0_1 = arith.constant 0 : index
    %0 = vector.load %arg1[%c0, %c0_0, %c0_1] : memref<2x8x8xf32, #tpu.memory_space<vmem>>, vector<2x8x8xf32>
    %1 = vector.shape_cast %0 : vector<2x8x8xf32> to vector<16x8xf32>
    %2 = arith.truncf %1 : vector<16x8xf32> to vector<16x8xbf16>
    %c0_2 = arith.constant 0 : index
    %c0_3 = arith.constant 0 : index
    %3 = vector.load %arg3[%c0_2, %c0_3] : memref<8x64xbf16, #tpu.memory_space<vmem>>, vector<8x64xbf16>
    %cst = arith.constant dense<0.000000e+00> : vector<16x64xf32>
    %4 = tpu.matmul %2, %3, %cst {dimension_numbers = #tpu.dot_dimension_numbers<[1], [0], [0], [1], [0, 0, 1, 1], [], []>} : vector<16x8xbf16>, vector<8x64xbf16>, vector<16x64xf32> -> vector<16x64xf32>
    %c0_4 = arith.constant 0 : index
    %c0_5 = arith.constant 0 : index
    %5 = vector.load %arg4[%c0_4, %c0_5] : memref<1x64xf32, #tpu.memory_space<vmem>>, vector<1x64xf32>
    %6 = vector.broadcast %5 : vector<1x64xf32> to vector<16x64xf32>
    %7 = arith.addf %4, %6 : vector<16x64xf32>
    %8 = vector.extract_strided_slice %7 {offsets = [0, 0], sizes = [16, 32], strides = [1, 1]} : vector<16x64xf32> to vector<16x32xf32>
    %9 = vector.shape_cast %8 : vector<16x32xf32> to vector<2x8x32xf32>
    %10 = vector.extract_strided_slice %7 {offsets = [0, 32], sizes = [16, 32], strides = [1, 1]} : vector<16x64xf32> to vector<16x32xf32>
    %11 = vector.shape_cast %10 : vector<16x32xf32> to vector<2x8x32xf32>
    %c0_6 = arith.constant 0 : index
    %c0_7 = arith.constant 0 : index
    %12 = vector.load %arg2[%c0_6, %c0_7] : memref<16x32xf32, #tpu.memory_space<vmem>>, vector<16x32xf32>
    %13 = vector.shape_cast %12 : vector<16x32xf32> to vector<1x16x32xf32>
    %14 = vector.shape_cast %13 : vector<1x16x32xf32> to vector<1x16x32xf32>
    %15 = vector.broadcast %14 : vector<1x16x32xf32> to vector<2x16x32xf32>
    %16 = arith.truncf %15 : vector<2x16x32xf32> to vector<2x16x32xbf16>
    %17 = arith.truncf %9 : vector<2x8x32xf32> to vector<2x8x32xbf16>
    %18 = arith.truncf %11 : vector<2x8x32xf32> to vector<2x8x32xbf16>
    %19 = vector.extract_strided_slice %16 {offsets = [0, 0, 0], sizes = [2, 16, 8], strides = [1, 1, 1]} : vector<2x16x32xbf16> to vector<2x16x8xbf16>
    %20 = vector.extract_strided_slice %17 {offsets = [0, 0, 0], sizes = [2, 8, 8], strides = [1, 1, 1]} : vector<2x8x32xbf16> to vector<2x8x8xbf16>
    "tpu.trace_start"() <{level = 10 : i32, message = "bqd,bkd->bqk"}> : () -> ()
    %cst_8 = arith.constant dense<0.000000e+00> : vector<2x16x8xf32>
    %21 = tpu.matmul %19, %20, %cst_8 {dimension_numbers = #tpu.dot_dimension_numbers<[2], [2], [1], [1], [0, 0, 0, 1, 1, 1], [0], [0]>} : vector<2x16x8xbf16>, vector<2x8x8xbf16>, vector<2x16x8xf32> -> vector<2x16x8xf32>
    "tpu.trace_stop"() : () -> ()
    %cst_9 = arith.constant dense<0xFF800000> : vector<2x16xf32>
    %22 = vector.multi_reduction <maximumf>, %21, %cst_9 [2] : vector<2x16x8xf32> to vector<2x16xf32>
    %23 = vector.shape_cast %22 : vector<2x16xf32> to vector<2x16x1xf32>
    %24 = vector.broadcast %23 : vector<2x16x1xf32> to vector<2x16x8xf32>
    %25 = arith.subf %21, %24 : vector<2x16x8xf32>
    %26 = math.exp %25 : vector<2x16x8xf32>
    %cst_10 = arith.constant dense<0.000000e+00> : vector<2x16xf32>
    %27 = vector.multi_reduction <add>, %26, %cst_10 [2] : vector<2x16x8xf32> to vector<2x16xf32>
    %28 = vector.shape_cast %27 : vector<2x16xf32> to vector<2x16x1xf32>
    %29 = tpu.reciprocal %28 {approx = true} : vector<2x16x1xf32> -> vector<2x16x1xf32>
    %30 = vector.broadcast %29 : vector<2x16x1xf32> to vector<2x16x8xf32>
    %31 = arith.mulf %26, %30 : vector<2x16x8xf32>
    %32 = arith.truncf %31 : vector<2x16x8xf32> to vector<2x16x8xbf16>
    %33 = vector.extract_strided_slice %18 {offsets = [0, 0, 0], sizes = [2, 8, 8], strides = [1, 1, 1]} : vector<2x8x32xbf16> to vector<2x8x8xbf16>
    "tpu.trace_start"() <{level = 10 : i32, message = "bqk,bkd->bqd"}> : () -> ()
    %cst_11 = arith.constant dense<0.000000e+00> : vector<2x16x8xf32>
    %34 = tpu.matmul %32, %33, %cst_11 {dimension_numbers = #tpu.dot_dimension_numbers<[2], [1], [1], [2], [0, 0, 0, 1, 1, 2], [0], [0]>} : vector<2x16x8xbf16>, vector<2x8x8xbf16>, vector<2x16x8xf32> -> vector<2x16x8xf32>
    "tpu.trace_stop"() : () -> ()
    %35 = vector.extract_strided_slice %15 {offsets = [0, 0, 0], sizes = [2, 16, 8], strides = [1, 1, 1]} : vector<2x16x32xf32> to vector<2x16x8xf32>
    %36 = arith.addf %35, %34 : vector<2x16x8xf32>
    %37 = vector.extract_strided_slice %16 {offsets = [0, 0, 8], sizes = [2, 16, 8], strides = [1, 1, 1]} : vector<2x16x32xbf16> to vector<2x16x8xbf16>
    %38 = vector.extract_strided_slice %17 {offsets = [0, 0, 8], sizes = [2, 8, 8], strides = [1, 1, 1]} : vector<2x8x32xbf16> to vector<2x8x8xbf16>
    "tpu.trace_start"() <{level = 10 : i32, message = "bqd,bkd->bqk"}> : () -> ()
    %cst_12 = arith.constant dense<0.000000e+00> : vector<2x16x8xf32>
    %39 = tpu.matmul %37, %38, %cst_12 {dimension_numbers = #tpu.dot_dimension_numbers<[2], [2], [1], [1], [0, 0, 0, 1, 1, 1], [0], [0]>} : vector<2x16x8xbf16>, vector<2x8x8xbf16>, vector<2x16x8xf32> -> vector<2x16x8xf32>
    "tpu.trace_stop"() : () -> ()
    %cst_13 = arith.constant dense<0xFF800000> : vector<2x16xf32>
    %40 = vector.multi_reduction <maximumf>, %39, %cst_13 [2] : vector<2x16x8xf32> to vector<2x16xf32>
    %41 = vector.shape_cast %40 : vector<2x16xf32> to vector<2x16x1xf32>
    %42 = vector.broadcast %41 : vector<2x16x1xf32> to vector<2x16x8xf32>
    %43 = arith.subf %39, %42 : vector<2x16x8xf32>
    %44 = math.exp %43 : vector<2x16x8xf32>
    %cst_14 = arith.constant dense<0.000000e+00> : vector<2x16xf32>
    %45 = vector.multi_reduction <add>, %44, %cst_14 [2] : vector<2x16x8xf32> to vector<2x16xf32>
    %46 = vector.shape_cast %45 : vector<2x16xf32> to vector<2x16x1xf32>
    %47 = tpu.reciprocal %46 {approx = true} : vector<2x16x1xf32> -> vector<2x16x1xf32>
    %48 = vector.broadcast %47 : vector<2x16x1xf32> to vector<2x16x8xf32>
    %49 = arith.mulf %44, %48 : vector<2x16x8xf32>
    %50 = arith.truncf %49 : vector<2x16x8xf32> to vector<2x16x8xbf16>
    %51 = vector.extract_strided_slice %18 {offsets = [0, 0, 8], sizes = [2, 8, 8], strides = [1, 1, 1]} : vector<2x8x32xbf16> to vector<2x8x8xbf16>
    "tpu.trace_start"() <{level = 10 : i32, message = "bqk,bkd->bqd"}> : () -> ()
    %cst_15 = arith.constant dense<0.000000e+00> : vector<2x16x8xf32>
    %52 = tpu.matmul %50, %51, %cst_15 {dimension_numbers = #tpu.dot_dimension_numbers<[2], [1], [1], [2], [0, 0, 0, 1, 1, 2], [0], [0]>} : vector<2x16x8xbf16>, vector<2x8x8xbf16>, vector<2x16x8xf32> -> vector<2x16x8xf32>
    "tpu.trace_stop"() : () -> ()
    %53 = vector.extract_strided_slice %15 {offsets = [0, 0, 8], sizes = [2, 16, 8], strides = [1, 1, 1]} : vector<2x16x32xf32> to vector<2x16x8xf32>
    %54 = arith.addf %53, %52 : vector<2x16x8xf32>
    %55 = vector.extract_strided_slice %16 {offsets = [0, 0, 16], sizes = [2, 16, 8], strides = [1, 1, 1]} : vector<2x16x32xbf16> to vector<2x16x8xbf16>
    %56 = vector.extract_strided_slice %17 {offsets = [0, 0, 16], sizes = [2, 8, 8], strides = [1, 1, 1]} : vector<2x8x32xbf16> to vector<2x8x8xbf16>
    "tpu.trace_start"() <{level = 10 : i32, message = "bqd,bkd->bqk"}> : () -> ()
    %cst_16 = arith.constant dense<0.000000e+00> : vector<2x16x8xf32>
    %57 = tpu.matmul %55, %56, %cst_16 {dimension_numbers = #tpu.dot_dimension_numbers<[2], [2], [1], [1], [0, 0, 0, 1, 1, 1], [0], [0]>} : vector<2x16x8xbf16>, vector<2x8x8xbf16>, vector<2x16x8xf32> -> vector<2x16x8xf32>
    "tpu.trace_stop"() : () -> ()
    %cst_17 = arith.constant dense<0xFF800000> : vector<2x16xf32>
    %58 = vector.multi_reduction <maximumf>, %57, %cst_17 [2] : vector<2x16x8xf32> to vector<2x16xf32>
    %59 = vector.shape_cast %58 : vector<2x16xf32> to vector<2x16x1xf32>
    %60 = vector.broadcast %59 : vector<2x16x1xf32> to vector<2x16x8xf32>
    %61 = arith.subf %57, %60 : vector<2x16x8xf32>
    %62 = math.exp %61 : vector<2x16x8xf32>
    %cst_18 = arith.constant dense<0.000000e+00> : vector<2x16xf32>
    %63 = vector.multi_reduction <add>, %62, %cst_18 [2] : vector<2x16x8xf32> to vector<2x16xf32>
    %64 = vector.shape_cast %63 : vector<2x16xf32> to vector<2x16x1xf32>
    %65 = tpu.reciprocal %64 {approx = true} : vector<2x16x1xf32> -> vector<2x16x1xf32>
    %66 = vector.broadcast %65 : vector<2x16x1xf32> to vector<2x16x8xf32>
    %67 = arith.mulf %62, %66 : vector<2x16x8xf32>
    %68 = arith.truncf %67 : vector<2x16x8xf32> to vector<2x16x8xbf16>
    %69 = vector.extract_strided_slice %18 {offsets = [0, 0, 16], sizes = [2, 8, 8], strides = [1, 1, 1]} : vector<2x8x32xbf16> to vector<2x8x8xbf16>
    "tpu.trace_start"() <{level = 10 : i32, message = "bqk,bkd->bqd"}> : () -> ()
    %cst_19 = arith.constant dense<0.000000e+00> : vector<2x16x8xf32>
    %70 = tpu.matmul %68, %69, %cst_19 {dimension_numbers = #tpu.dot_dimension_numbers<[2], [1], [1], [2], [0, 0, 0, 1, 1, 2], [0], [0]>} : vector<2x16x8xbf16>, vector<2x8x8xbf16>, vector<2x16x8xf32> -> vector<2x16x8xf32>
    "tpu.trace_stop"() : () -> ()
    %71 = vector.extract_strided_slice %15 {offsets = [0, 0, 16], sizes = [2, 16, 8], strides = [1, 1, 1]} : vector<2x16x32xf32> to vector<2x16x8xf32>
    %72 = arith.addf %71, %70 : vector<2x16x8xf32>
    %73 = vector.extract_strided_slice %16 {offsets = [0, 0, 24], sizes = [2, 16, 8], strides = [1, 1, 1]} : vector<2x16x32xbf16> to vector<2x16x8xbf16>
    %74 = vector.extract_strided_slice %17 {offsets = [0, 0, 24], sizes = [2, 8, 8], strides = [1, 1, 1]} : vector<2x8x32xbf16> to vector<2x8x8xbf16>
    "tpu.trace_start"() <{level = 10 : i32, message = "bqd,bkd->bqk"}> : () -> ()
    %cst_20 = arith.constant dense<0.000000e+00> : vector<2x16x8xf32>
    %75 = tpu.matmul %73, %74, %cst_20 {dimension_numbers = #tpu.dot_dimension_numbers<[2], [2], [1], [1], [0, 0, 0, 1, 1, 1], [0], [0]>} : vector<2x16x8xbf16>, vector<2x8x8xbf16>, vector<2x16x8xf32> -> vector<2x16x8xf32>
    "tpu.trace_stop"() : () -> ()
    %cst_21 = arith.constant dense<0xFF800000> : vector<2x16xf32>
    %76 = vector.multi_reduction <maximumf>, %75, %cst_21 [2] : vector<2x16x8xf32> to vector<2x16xf32>
    %77 = vector.shape_cast %76 : vector<2x16xf32> to vector<2x16x1xf32>
    %78 = vector.broadcast %77 : vector<2x16x1xf32> to vector<2x16x8xf32>
    %79 = arith.subf %75, %78 : vector<2x16x8xf32>
    %80 = math.exp %79 : vector<2x16x8xf32>
    %cst_22 = arith.constant dense<0.000000e+00> : vector<2x16xf32>
    %81 = vector.multi_reduction <add>, %80, %cst_22 [2] : vector<2x16x8xf32> to vector<2x16xf32>
    %82 = vector.shape_cast %81 : vector<2x16xf32> to vector<2x16x1xf32>
    %83 = tpu.reciprocal %82 {approx = true} : vector<2x16x1xf32> -> vector<2x16x1xf32>
    %84 = vector.broadcast %83 : vector<2x16x1xf32> to vector<2x16x8xf32>
    %85 = arith.mulf %80, %84 : vector<2x16x8xf32>
    %86 = arith.truncf %85 : vector<2x16x8xf32> to vector<2x16x8xbf16>
    %87 = vector.extract_strided_slice %18 {offsets = [0, 0, 24], sizes = [2, 8, 8], strides = [1, 1, 1]} : vector<2x8x32xbf16> to vector<2x8x8xbf16>
    "tpu.trace_start"() <{level = 10 : i32, message = "bqk,bkd->bqd"}> : () -> ()
    %cst_23 = arith.constant dense<0.000000e+00> : vector<2x16x8xf32>
    %88 = tpu.matmul %86, %87, %cst_23 {dimension_numbers = #tpu.dot_dimension_numbers<[2], [1], [1], [2], [0, 0, 0, 1, 1, 2], [0], [0]>} : vector<2x16x8xbf16>, vector<2x8x8xbf16>, vector<2x16x8xf32> -> vector<2x16x8xf32>
    "tpu.trace_stop"() : () -> ()
    %89 = vector.extract_strided_slice %15 {offsets = [0, 0, 24], sizes = [2, 16, 8], strides = [1, 1, 1]} : vector<2x16x32xf32> to vector<2x16x8xf32>
    %90 = arith.addf %89, %88 : vector<2x16x8xf32>
    %91 = tpu.concatenate %36, %54, %72, %90 in 2 : vector<2x16x8xf32>, vector<2x16x8xf32>, vector<2x16x8xf32>, vector<2x16x8xf32> -> vector<2x16x32xf32>
    %92 = vector.shape_cast %91 : vector<2x16x32xf32> to vector<32x32xf32>
    %93 = arith.truncf %92 : vector<32x32xf32> to vector<32x32xbf16>
    %c0_24 = arith.constant 0 : index
    %c0_25 = arith.constant 0 : index
    %94 = vector.load %arg5[%c0_24, %c0_25] : memref<32x32xbf16, #tpu.memory_space<vmem>>, vector<32x32xbf16>
    %cst_26 = arith.constant dense<0.000000e+00> : vector<32x32xf32>
    %95 = tpu.matmul %93, %94, %cst_26 {dimension_numbers = #tpu.dot_dimension_numbers<[1], [0], [0], [1], [0, 0, 1, 1], [], []>} : vector<32x32xbf16>, vector<32x32xbf16>, vector<32x32xf32> -> vector<32x32xf32>
    %c0_27 = arith.constant 0 : index
    %c0_28 = arith.constant 0 : index
    %96 = vector.load %arg6[%c0_27, %c0_28] : memref<1x32xf32, #tpu.memory_space<vmem>>, vector<1x32xf32>
    %97 = vector.broadcast %96 : vector<1x32xf32> to vector<32x32xf32>
    %98 = arith.addf %95, %97 : vector<32x32xf32>
    %cst_29 = arith.constant 0.000000e+00 : f32
    %99 = vector.broadcast %cst_29 : f32 to vector<32x32xf32>
    %100 = arith.maximumf %98, %99 : vector<32x32xf32>
    %101 = arith.addf %92, %100 : vector<32x32xf32>
    %102 = vector.shape_cast %101 : vector<32x32xf32> to vector<2x16x32xf32>
    %103 = vector.shape_cast %102 : vector<2x16x32xf32> to vector<32x32xf32>
    %104 = arith.truncf %103 : vector<32x32xf32> to vector<32x32xbf16>
    %c0_30 = arith.constant 0 : index
    %c0_31 = arith.constant 0 : index
    %105 = vector.load %arg9[%c0_30, %c0_31] : memref<32x64xbf16, #tpu.memory_space<vmem>>, vector<32x64xbf16>
    %cst_32 = arith.constant dense<0.000000e+00> : vector<32x64xf32>
    %106 = tpu.matmul %104, %105, %cst_32 {dimension_numbers = #tpu.dot_dimension_numbers<[1], [0], [0], [1], [0, 0, 1, 1], [], []>} : vector<32x32xbf16>, vector<32x64xbf16>, vector<32x64xf32> -> vector<32x64xf32>
    %c0_33 = arith.constant 0 : index
    %c0_34 = arith.constant 0 : index
    %107 = vector.load %arg10[%c0_33, %c0_34] : memref<1x64xf32, #tpu.memory_space<vmem>>, vector<1x64xf32>
    %108 = vector.broadcast %107 : vector<1x64xf32> to vector<32x64xf32>
    %109 = arith.addf %106, %108 : vector<32x64xf32>
    %110 = vector.extract_strided_slice %109 {offsets = [0, 0], sizes = [32, 32], strides = [1, 1]} : vector<32x64xf32> to vector<32x32xf32>
    %111 = vector.shape_cast %110 : vector<32x32xf32> to vector<2x16x32xf32>
    %112 = vector.extract_strided_slice %109 {offsets = [0, 32], sizes = [32, 32], strides = [1, 1]} : vector<32x64xf32> to vector<32x32xf32>
    %113 = vector.shape_cast %112 : vector<32x32xf32> to vector<2x16x32xf32>
    %114 = vector.shape_cast %0 : vector<2x8x8xf32> to vector<16x8xf32>
    %115 = arith.truncf %114 : vector<16x8xf32> to vector<16x8xbf16>
    %c0_35 = arith.constant 0 : index
    %c0_36 = arith.constant 0 : index
    %116 = vector.load %arg7[%c0_35, %c0_36] : memref<8x32xbf16, #tpu.memory_space<vmem>>, vector<8x32xbf16>
    %cst_37 = arith.constant dense<0.000000e+00> : vector<16x32xf32>
    %117 = tpu.matmul %115, %116, %cst_37 {dimension_numbers = #tpu.dot_dimension_numbers<[1], [0], [0], [1], [0, 0, 1, 1], [], []>} : vector<16x8xbf16>, vector<8x32xbf16>, vector<16x32xf32> -> vector<16x32xf32>
    %c0_38 = arith.constant 0 : index
    %c0_39 = arith.constant 0 : index
    %118 = vector.load %arg8[%c0_38, %c0_39] : memref<1x32xf32, #tpu.memory_space<vmem>>, vector<1x32xf32>
    %119 = vector.broadcast %118 : vector<1x32xf32> to vector<16x32xf32>
    %120 = arith.addf %117, %119 : vector<16x32xf32>
    %121 = vector.shape_cast %120 : vector<16x32xf32> to vector<2x8x32xf32>
    %122 = arith.truncf %121 : vector<2x8x32xf32> to vector<2x8x32xbf16>
    %123 = arith.truncf %111 : vector<2x16x32xf32> to vector<2x16x32xbf16>
    %124 = arith.truncf %113 : vector<2x16x32xf32> to vector<2x16x32xbf16>
    %125 = vector.extract_strided_slice %122 {offsets = [0, 0, 0], sizes = [2, 8, 8], strides = [1, 1, 1]} : vector<2x8x32xbf16> to vector<2x8x8xbf16>
    %126 = vector.extract_strided_slice %123 {offsets = [0, 0, 0], sizes = [2, 16, 8], strides = [1, 1, 1]} : vector<2x16x32xbf16> to vector<2x16x8xbf16>
    "tpu.trace_start"() <{level = 10 : i32, message = "bqd,bkd->bqk"}> : () -> ()
    %cst_40 = arith.constant dense<0.000000e+00> : vector<2x8x16xf32>
    %127 = tpu.matmul %125, %126, %cst_40 {dimension_numbers = #tpu.dot_dimension_numbers<[2], [2], [1], [1], [0, 0, 0, 1, 1, 1], [0], [0]>} : vector<2x8x8xbf16>, vector<2x16x8xbf16>, vector<2x8x16xf32> -> vector<2x8x16xf32>
    "tpu.trace_stop"() : () -> ()
    %cst_41 = arith.constant dense<0xFF800000> : vector<2x8xf32>
    %128 = vector.multi_reduction <maximumf>, %127, %cst_41 [2] : vector<2x8x16xf32> to vector<2x8xf32>
    %129 = vector.shape_cast %128 : vector<2x8xf32> to vector<2x8x1xf32>
    %130 = vector.broadcast %129 : vector<2x8x1xf32> to vector<2x8x16xf32>
    %131 = arith.subf %127, %130 : vector<2x8x16xf32>
    %132 = math.exp %131 : vector<2x8x16xf32>
    %cst_42 = arith.constant dense<0.000000e+00> : vector<2x8xf32>
    %133 = vector.multi_reduction <add>, %132, %cst_42 [2] : vector<2x8x16xf32> to vector<2x8xf32>
    %134 = vector.shape_cast %133 : vector<2x8xf32> to vector<2x8x1xf32>
    %135 = tpu.reciprocal %134 {approx = true} : vector<2x8x1xf32> -> vector<2x8x1xf32>
    %136 = vector.broadcast %135 : vector<2x8x1xf32> to vector<2x8x16xf32>
    %137 = arith.mulf %132, %136 : vector<2x8x16xf32>
    %138 = arith.truncf %137 : vector<2x8x16xf32> to vector<2x8x16xbf16>
    %139 = vector.extract_strided_slice %124 {offsets = [0, 0, 0], sizes = [2, 16, 8], strides = [1, 1, 1]} : vector<2x16x32xbf16> to vector<2x16x8xbf16>
    "tpu.trace_start"() <{level = 10 : i32, message = "bqk,bkd->bqd"}> : () -> ()
    %cst_43 = arith.constant dense<0.000000e+00> : vector<2x8x8xf32>
    %140 = tpu.matmul %138, %139, %cst_43 {dimension_numbers = #tpu.dot_dimension_numbers<[2], [1], [1], [2], [0, 0, 0, 1, 1, 2], [0], [0]>} : vector<2x8x16xbf16>, vector<2x16x8xbf16>, vector<2x8x8xf32> -> vector<2x8x8xf32>
    "tpu.trace_stop"() : () -> ()
    %141 = vector.extract_strided_slice %121 {offsets = [0, 0, 0], sizes = [2, 8, 8], strides = [1, 1, 1]} : vector<2x8x32xf32> to vector<2x8x8xf32>
    %142 = arith.addf %141, %140 : vector<2x8x8xf32>
    %143 = vector.extract_strided_slice %122 {offsets = [0, 0, 8], sizes = [2, 8, 8], strides = [1, 1, 1]} : vector<2x8x32xbf16> to vector<2x8x8xbf16>
    %144 = vector.extract_strided_slice %123 {offsets = [0, 0, 8], sizes = [2, 16, 8], strides = [1, 1, 1]} : vector<2x16x32xbf16> to vector<2x16x8xbf16>
    "tpu.trace_start"() <{level = 10 : i32, message = "bqd,bkd->bqk"}> : () -> ()
    %cst_44 = arith.constant dense<0.000000e+00> : vector<2x8x16xf32>
    %145 = tpu.matmul %143, %144, %cst_44 {dimension_numbers = #tpu.dot_dimension_numbers<[2], [2], [1], [1], [0, 0, 0, 1, 1, 1], [0], [0]>} : vector<2x8x8xbf16>, vector<2x16x8xbf16>, vector<2x8x16xf32> -> vector<2x8x16xf32>
    "tpu.trace_stop"() : () -> ()
    %cst_45 = arith.constant dense<0xFF800000> : vector<2x8xf32>
    %146 = vector.multi_reduction <maximumf>, %145, %cst_45 [2] : vector<2x8x16xf32> to vector<2x8xf32>
    %147 = vector.shape_cast %146 : vector<2x8xf32> to vector<2x8x1xf32>
    %148 = vector.broadcast %147 : vector<2x8x1xf32> to vector<2x8x16xf32>
    %149 = arith.subf %145, %148 : vector<2x8x16xf32>
    %150 = math.exp %149 : vector<2x8x16xf32>
    %cst_46 = arith.constant dense<0.000000e+00> : vector<2x8xf32>
    %151 = vector.multi_reduction <add>, %150, %cst_46 [2] : vector<2x8x16xf32> to vector<2x8xf32>
    %152 = vector.shape_cast %151 : vector<2x8xf32> to vector<2x8x1xf32>
    %153 = tpu.reciprocal %152 {approx = true} : vector<2x8x1xf32> -> vector<2x8x1xf32>
    %154 = vector.broadcast %153 : vector<2x8x1xf32> to vector<2x8x16xf32>
    %155 = arith.mulf %150, %154 : vector<2x8x16xf32>
    %156 = arith.truncf %155 : vector<2x8x16xf32> to vector<2x8x16xbf16>
    %157 = vector.extract_strided_slice %124 {offsets = [0, 0, 8], sizes = [2, 16, 8], strides = [1, 1, 1]} : vector<2x16x32xbf16> to vector<2x16x8xbf16>
    "tpu.trace_start"() <{level = 10 : i32, message = "bqk,bkd->bqd"}> : () -> ()
    %cst_47 = arith.constant dense<0.000000e+00> : vector<2x8x8xf32>
    %158 = tpu.matmul %156, %157, %cst_47 {dimension_numbers = #tpu.dot_dimension_numbers<[2], [1], [1], [2], [0, 0, 0, 1, 1, 2], [0], [0]>} : vector<2x8x16xbf16>, vector<2x16x8xbf16>, vector<2x8x8xf32> -> vector<2x8x8xf32>
    "tpu.trace_stop"() : () -> ()
    %159 = vector.extract_strided_slice %121 {offsets = [0, 0, 8], sizes = [2, 8, 8], strides = [1, 1, 1]} : vector<2x8x32xf32> to vector<2x8x8xf32>
    %160 = arith.addf %159, %158 : vector<2x8x8xf32>
    %161 = vector.extract_strided_slice %122 {offsets = [0, 0, 16], sizes = [2, 8, 8], strides = [1, 1, 1]} : vector<2x8x32xbf16> to vector<2x8x8xbf16>
    %162 = vector.extract_strided_slice %123 {offsets = [0, 0, 16], sizes = [2, 16, 8], strides = [1, 1, 1]} : vector<2x16x32xbf16> to vector<2x16x8xbf16>
    "tpu.trace_start"() <{level = 10 : i32, message = "bqd,bkd->bqk"}> : () -> ()
    %cst_48 = arith.constant dense<0.000000e+00> : vector<2x8x16xf32>
    %163 = tpu.matmul %161, %162, %cst_48 {dimension_numbers = #tpu.dot_dimension_numbers<[2], [2], [1], [1], [0, 0, 0, 1, 1, 1], [0], [0]>} : vector<2x8x8xbf16>, vector<2x16x8xbf16>, vector<2x8x16xf32> -> vector<2x8x16xf32>
    "tpu.trace_stop"() : () -> ()
    %cst_49 = arith.constant dense<0xFF800000> : vector<2x8xf32>
    %164 = vector.multi_reduction <maximumf>, %163, %cst_49 [2] : vector<2x8x16xf32> to vector<2x8xf32>
    %165 = vector.shape_cast %164 : vector<2x8xf32> to vector<2x8x1xf32>
    %166 = vector.broadcast %165 : vector<2x8x1xf32> to vector<2x8x16xf32>
    %167 = arith.subf %163, %166 : vector<2x8x16xf32>
    %168 = math.exp %167 : vector<2x8x16xf32>
    %cst_50 = arith.constant dense<0.000000e+00> : vector<2x8xf32>
    %169 = vector.multi_reduction <add>, %168, %cst_50 [2] : vector<2x8x16xf32> to vector<2x8xf32>
    %170 = vector.shape_cast %169 : vector<2x8xf32> to vector<2x8x1xf32>
    %171 = tpu.reciprocal %170 {approx = true} : vector<2x8x1xf32> -> vector<2x8x1xf32>
    %172 = vector.broadcast %171 : vector<2x8x1xf32> to vector<2x8x16xf32>
    %173 = arith.mulf %168, %172 : vector<2x8x16xf32>
    %174 = arith.truncf %173 : vector<2x8x16xf32> to vector<2x8x16xbf16>
    %175 = vector.extract_strided_slice %124 {offsets = [0, 0, 16], sizes = [2, 16, 8], strides = [1, 1, 1]} : vector<2x16x32xbf16> to vector<2x16x8xbf16>
    "tpu.trace_start"() <{level = 10 : i32, message = "bqk,bkd->bqd"}> : () -> ()
    %cst_51 = arith.constant dense<0.000000e+00> : vector<2x8x8xf32>
    %176 = tpu.matmul %174, %175, %cst_51 {dimension_numbers = #tpu.dot_dimension_numbers<[2], [1], [1], [2], [0, 0, 0, 1, 1, 2], [0], [0]>} : vector<2x8x16xbf16>, vector<2x16x8xbf16>, vector<2x8x8xf32> -> vector<2x8x8xf32>
    "tpu.trace_stop"() : () -> ()
    %177 = vector.extract_strided_slice %121 {offsets = [0, 0, 16], sizes = [2, 8, 8], strides = [1, 1, 1]} : vector<2x8x32xf32> to vector<2x8x8xf32>
    %178 = arith.addf %177, %176 : vector<2x8x8xf32>
    %179 = vector.extract_strided_slice %122 {offsets = [0, 0, 24], sizes = [2, 8, 8], strides = [1, 1, 1]} : vector<2x8x32xbf16> to vector<2x8x8xbf16>
    %180 = vector.extract_strided_slice %123 {offsets = [0, 0, 24], sizes = [2, 16, 8], strides = [1, 1, 1]} : vector<2x16x32xbf16> to vector<2x16x8xbf16>
    "tpu.trace_start"() <{level = 10 : i32, message = "bqd,bkd->bqk"}> : () -> ()
    %cst_52 = arith.constant dense<0.000000e+00> : vector<2x8x16xf32>
    %181 = tpu.matmul %179, %180, %cst_52 {dimension_numbers = #tpu.dot_dimension_numbers<[2], [2], [1], [1], [0, 0, 0, 1, 1, 1], [0], [0]>} : vector<2x8x8xbf16>, vector<2x16x8xbf16>, vector<2x8x16xf32> -> vector<2x8x16xf32>
    "tpu.trace_stop"() : () -> ()
    %cst_53 = arith.constant dense<0xFF800000> : vector<2x8xf32>
    %182 = vector.multi_reduction <maximumf>, %181, %cst_53 [2] : vector<2x8x16xf32> to vector<2x8xf32>
    %183 = vector.shape_cast %182 : vector<2x8xf32> to vector<2x8x1xf32>
    %184 = vector.broadcast %183 : vector<2x8x1xf32> to vector<2x8x16xf32>
    %185 = arith.subf %181, %184 : vector<2x8x16xf32>
    %186 = math.exp %185 : vector<2x8x16xf32>
    %cst_54 = arith.constant dense<0.000000e+00> : vector<2x8xf32>
    %187 = vector.multi_reduction <add>, %186, %cst_54 [2] : vector<2x8x16xf32> to vector<2x8xf32>
    %188 = vector.shape_cast %187 : vector<2x8xf32> to vector<2x8x1xf32>
    %189 = tpu.reciprocal %188 {approx = true} : vector<2x8x1xf32> -> vector<2x8x1xf32>
    %190 = vector.broadcast %189 : vector<2x8x1xf32> to vector<2x8x16xf32>
    %191 = arith.mulf %186, %190 : vector<2x8x16xf32>
    %192 = arith.truncf %191 : vector<2x8x16xf32> to vector<2x8x16xbf16>
    %193 = vector.extract_strided_slice %124 {offsets = [0, 0, 24], sizes = [2, 16, 8], strides = [1, 1, 1]} : vector<2x16x32xbf16> to vector<2x16x8xbf16>
    "tpu.trace_start"() <{level = 10 : i32, message = "bqk,bkd->bqd"}> : () -> ()
    %cst_55 = arith.constant dense<0.000000e+00> : vector<2x8x8xf32>
    %194 = tpu.matmul %192, %193, %cst_55 {dimension_numbers = #tpu.dot_dimension_numbers<[2], [1], [1], [2], [0, 0, 0, 1, 1, 2], [0], [0]>} : vector<2x8x16xbf16>, vector<2x16x8xbf16>, vector<2x8x8xf32> -> vector<2x8x8xf32>
    "tpu.trace_stop"() : () -> ()
    %195 = vector.extract_strided_slice %121 {offsets = [0, 0, 24], sizes = [2, 8, 8], strides = [1, 1, 1]} : vector<2x8x32xf32> to vector<2x8x8xf32>
    %196 = arith.addf %195, %194 : vector<2x8x8xf32>
    %197 = tpu.concatenate %142, %160, %178, %196 in 2 : vector<2x8x8xf32>, vector<2x8x8xf32>, vector<2x8x8xf32>, vector<2x8x8xf32> -> vector<2x8x32xf32>
    %198 = vector.shape_cast %197 : vector<2x8x32xf32> to vector<16x32xf32>
    %199 = arith.truncf %198 : vector<16x32xf32> to vector<16x32xbf16>
    %c0_56 = arith.constant 0 : index
    %c0_57 = arith.constant 0 : index
    %200 = vector.load %arg11[%c0_56, %c0_57] : memref<32x32xbf16, #tpu.memory_space<vmem>>, vector<32x32xbf16>
    %cst_58 = arith.constant dense<0.000000e+00> : vector<16x32xf32>
    %201 = tpu.matmul %199, %200, %cst_58 {dimension_numbers = #tpu.dot_dimension_numbers<[1], [0], [0], [1], [0, 0, 1, 1], [], []>} : vector<16x32xbf16>, vector<32x32xbf16>, vector<16x32xf32> -> vector<16x32xf32>
    %c0_59 = arith.constant 0 : index
    %c0_60 = arith.constant 0 : index
    %202 = vector.load %arg12[%c0_59, %c0_60] : memref<1x32xf32, #tpu.memory_space<vmem>>, vector<1x32xf32>
    %203 = vector.broadcast %202 : vector<1x32xf32> to vector<16x32xf32>
    %204 = arith.addf %201, %203 : vector<16x32xf32>
    %cst_61 = arith.constant 0.000000e+00 : f32
    %205 = vector.broadcast %cst_61 : f32 to vector<16x32xf32>
    %206 = arith.maximumf %204, %205 : vector<16x32xf32>
    %207 = arith.addf %198, %206 : vector<16x32xf32>
    %208 = vector.shape_cast %207 : vector<16x32xf32> to vector<2x8x32xf32>
    %209 = vector.shape_cast %208 : vector<2x8x32xf32> to vector<16x32xf32>
    %210 = arith.truncf %209 : vector<16x32xf32> to vector<16x32xbf16>
    %c0_62 = arith.constant 0 : index
    %c0_63 = arith.constant 0 : index
    %211 = vector.load %arg14[%c0_62, %c0_63] : memref<32x64xbf16, #tpu.memory_space<vmem>>, vector<32x64xbf16>
    %cst_64 = arith.constant dense<0.000000e+00> : vector<16x64xf32>
    %212 = tpu.matmul %210, %211, %cst_64 {dimension_numbers = #tpu.dot_dimension_numbers<[1], [0], [0], [1], [0, 0, 1, 1], [], []>} : vector<16x32xbf16>, vector<32x64xbf16>, vector<16x64xf32> -> vector<16x64xf32>
    %c0_65 = arith.constant 0 : index
    %c0_66 = arith.constant 0 : index
    %213 = vector.load %arg15[%c0_65, %c0_66] : memref<1x64xf32, #tpu.memory_space<vmem>>, vector<1x64xf32>
    %214 = vector.broadcast %213 : vector<1x64xf32> to vector<16x64xf32>
    %215 = arith.addf %212, %214 : vector<16x64xf32>
    %216 = vector.extract_strided_slice %215 {offsets = [0, 0], sizes = [16, 32], strides = [1, 1]} : vector<16x64xf32> to vector<16x32xf32>
    %217 = vector.shape_cast %216 : vector<16x32xf32> to vector<2x8x32xf32>
    %218 = vector.extract_strided_slice %215 {offsets = [0, 32], sizes = [16, 32], strides = [1, 1]} : vector<16x64xf32> to vector<16x32xf32>
    %219 = vector.shape_cast %218 : vector<16x32xf32> to vector<2x8x32xf32>
    %c0_67 = arith.constant 0 : index
    %c0_68 = arith.constant 0 : index
    %220 = vector.load %arg13[%c0_67, %c0_68] : memref<16x32xf32, #tpu.memory_space<vmem>>, vector<16x32xf32>
    %221 = vector.shape_cast %220 : vector<16x32xf32> to vector<1x16x32xf32>
    %222 = vector.shape_cast %221 : vector<1x16x32xf32> to vector<1x16x32xf32>
    %223 = vector.broadcast %222 : vector<1x16x32xf32> to vector<2x16x32xf32>
    %224 = arith.truncf %223 : vector<2x16x32xf32> to vector<2x16x32xbf16>
    %225 = arith.truncf %217 : vector<2x8x32xf32> to vector<2x8x32xbf16>
    %226 = arith.truncf %219 : vector<2x8x32xf32> to vector<2x8x32xbf16>
    %227 = vector.extract_strided_slice %224 {offsets = [0, 0, 0], sizes = [2, 16, 8], strides = [1, 1, 1]} : vector<2x16x32xbf16> to vector<2x16x8xbf16>
    %228 = vector.extract_strided_slice %225 {offsets = [0, 0, 0], sizes = [2, 8, 8], strides = [1, 1, 1]} : vector<2x8x32xbf16> to vector<2x8x8xbf16>
    "tpu.trace_start"() <{level = 10 : i32, message = "bqd,bkd->bqk"}> : () -> ()
    %cst_69 = arith.constant dense<0.000000e+00> : vector<2x16x8xf32>
    %229 = tpu.matmul %227, %228, %cst_69 {dimension_numbers = #tpu.dot_dimension_numbers<[2], [2], [1], [1], [0, 0, 0, 1, 1, 1], [0], [0]>} : vector<2x16x8xbf16>, vector<2x8x8xbf16>, vector<2x16x8xf32> -> vector<2x16x8xf32>
    "tpu.trace_stop"() : () -> ()
    %cst_70 = arith.constant dense<0xFF800000> : vector<2x16xf32>
    %230 = vector.multi_reduction <maximumf>, %229, %cst_70 [2] : vector<2x16x8xf32> to vector<2x16xf32>
    %231 = vector.shape_cast %230 : vector<2x16xf32> to vector<2x16x1xf32>
    %232 = vector.broadcast %231 : vector<2x16x1xf32> to vector<2x16x8xf32>
    %233 = arith.subf %229, %232 : vector<2x16x8xf32>
    %234 = math.exp %233 : vector<2x16x8xf32>
    %cst_71 = arith.constant dense<0.000000e+00> : vector<2x16xf32>
    %235 = vector.multi_reduction <add>, %234, %cst_71 [2] : vector<2x16x8xf32> to vector<2x16xf32>
    %236 = vector.shape_cast %235 : vector<2x16xf32> to vector<2x16x1xf32>
    %237 = tpu.reciprocal %236 {approx = true} : vector<2x16x1xf32> -> vector<2x16x1xf32>
    %238 = vector.broadcast %237 : vector<2x16x1xf32> to vector<2x16x8xf32>
    %239 = arith.mulf %234, %238 : vector<2x16x8xf32>
    %240 = arith.truncf %239 : vector<2x16x8xf32> to vector<2x16x8xbf16>
    %241 = vector.extract_strided_slice %226 {offsets = [0, 0, 0], sizes = [2, 8, 8], strides = [1, 1, 1]} : vector<2x8x32xbf16> to vector<2x8x8xbf16>
    "tpu.trace_start"() <{level = 10 : i32, message = "bqk,bkd->bqd"}> : () -> ()
    %cst_72 = arith.constant dense<0.000000e+00> : vector<2x16x8xf32>
    %242 = tpu.matmul %240, %241, %cst_72 {dimension_numbers = #tpu.dot_dimension_numbers<[2], [1], [1], [2], [0, 0, 0, 1, 1, 2], [0], [0]>} : vector<2x16x8xbf16>, vector<2x8x8xbf16>, vector<2x16x8xf32> -> vector<2x16x8xf32>
    "tpu.trace_stop"() : () -> ()
    %243 = vector.extract_strided_slice %223 {offsets = [0, 0, 0], sizes = [2, 16, 8], strides = [1, 1, 1]} : vector<2x16x32xf32> to vector<2x16x8xf32>
    %244 = arith.addf %243, %242 : vector<2x16x8xf32>
    %245 = vector.extract_strided_slice %224 {offsets = [0, 0, 8], sizes = [2, 16, 8], strides = [1, 1, 1]} : vector<2x16x32xbf16> to vector<2x16x8xbf16>
    %246 = vector.extract_strided_slice %225 {offsets = [0, 0, 8], sizes = [2, 8, 8], strides = [1, 1, 1]} : vector<2x8x32xbf16> to vector<2x8x8xbf16>
    "tpu.trace_start"() <{level = 10 : i32, message = "bqd,bkd->bqk"}> : () -> ()
    %cst_73 = arith.constant dense<0.000000e+00> : vector<2x16x8xf32>
    %247 = tpu.matmul %245, %246, %cst_73 {dimension_numbers = #tpu.dot_dimension_numbers<[2], [2], [1], [1], [0, 0, 0, 1, 1, 1], [0], [0]>} : vector<2x16x8xbf16>, vector<2x8x8xbf16>, vector<2x16x8xf32> -> vector<2x16x8xf32>
    "tpu.trace_stop"() : () -> ()
    %cst_74 = arith.constant dense<0xFF800000> : vector<2x16xf32>
    %248 = vector.multi_reduction <maximumf>, %247, %cst_74 [2] : vector<2x16x8xf32> to vector<2x16xf32>
    %249 = vector.shape_cast %248 : vector<2x16xf32> to vector<2x16x1xf32>
    %250 = vector.broadcast %249 : vector<2x16x1xf32> to vector<2x16x8xf32>
    %251 = arith.subf %247, %250 : vector<2x16x8xf32>
    %252 = math.exp %251 : vector<2x16x8xf32>
    %cst_75 = arith.constant dense<0.000000e+00> : vector<2x16xf32>
    %253 = vector.multi_reduction <add>, %252, %cst_75 [2] : vector<2x16x8xf32> to vector<2x16xf32>
    %254 = vector.shape_cast %253 : vector<2x16xf32> to vector<2x16x1xf32>
    %255 = tpu.reciprocal %254 {approx = true} : vector<2x16x1xf32> -> vector<2x16x1xf32>
    %256 = vector.broadcast %255 : vector<2x16x1xf32> to vector<2x16x8xf32>
    %257 = arith.mulf %252, %256 : vector<2x16x8xf32>
    %258 = arith.truncf %257 : vector<2x16x8xf32> to vector<2x16x8xbf16>
    %259 = vector.extract_strided_slice %226 {offsets = [0, 0, 8], sizes = [2, 8, 8], strides = [1, 1, 1]} : vector<2x8x32xbf16> to vector<2x8x8xbf16>
    "tpu.trace_start"() <{level = 10 : i32, message = "bqk,bkd->bqd"}> : () -> ()
    %cst_76 = arith.constant dense<0.000000e+00> : vector<2x16x8xf32>
    %260 = tpu.matmul %258, %259, %cst_76 {dimension_numbers = #tpu.dot_dimension_numbers<[2], [1], [1], [2], [0, 0, 0, 1, 1, 2], [0], [0]>} : vector<2x16x8xbf16>, vector<2x8x8xbf16>, vector<2x16x8xf32> -> vector<2x16x8xf32>
    "tpu.trace_stop"() : () -> ()
    %261 = vector.extract_strided_slice %223 {offsets = [0, 0, 8], sizes = [2, 16, 8], strides = [1, 1, 1]} : vector<2x16x32xf32> to vector<2x16x8xf32>
    %262 = arith.addf %261, %260 : vector<2x16x8xf32>
    %263 = vector.extract_strided_slice %224 {offsets = [0, 0, 16], sizes = [2, 16, 8], strides = [1, 1, 1]} : vector<2x16x32xbf16> to vector<2x16x8xbf16>
    %264 = vector.extract_strided_slice %225 {offsets = [0, 0, 16], sizes = [2, 8, 8], strides = [1, 1, 1]} : vector<2x8x32xbf16> to vector<2x8x8xbf16>
    "tpu.trace_start"() <{level = 10 : i32, message = "bqd,bkd->bqk"}> : () -> ()
    %cst_77 = arith.constant dense<0.000000e+00> : vector<2x16x8xf32>
    %265 = tpu.matmul %263, %264, %cst_77 {dimension_numbers = #tpu.dot_dimension_numbers<[2], [2], [1], [1], [0, 0, 0, 1, 1, 1], [0], [0]>} : vector<2x16x8xbf16>, vector<2x8x8xbf16>, vector<2x16x8xf32> -> vector<2x16x8xf32>
    "tpu.trace_stop"() : () -> ()
    %cst_78 = arith.constant dense<0xFF800000> : vector<2x16xf32>
    %266 = vector.multi_reduction <maximumf>, %265, %cst_78 [2] : vector<2x16x8xf32> to vector<2x16xf32>
    %267 = vector.shape_cast %266 : vector<2x16xf32> to vector<2x16x1xf32>
    %268 = vector.broadcast %267 : vector<2x16x1xf32> to vector<2x16x8xf32>
    %269 = arith.subf %265, %268 : vector<2x16x8xf32>
    %270 = math.exp %269 : vector<2x16x8xf32>
    %cst_79 = arith.constant dense<0.000000e+00> : vector<2x16xf32>
    %271 = vector.multi_reduction <add>, %270, %cst_79 [2] : vector<2x16x8xf32> to vector<2x16xf32>
    %272 = vector.shape_cast %271 : vector<2x16xf32> to vector<2x16x1xf32>
    %273 = tpu.reciprocal %272 {approx = true} : vector<2x16x1xf32> -> vector<2x16x1xf32>
    %274 = vector.broadcast %273 : vector<2x16x1xf32> to vector<2x16x8xf32>
    %275 = arith.mulf %270, %274 : vector<2x16x8xf32>
    %276 = arith.truncf %275 : vector<2x16x8xf32> to vector<2x16x8xbf16>
    %277 = vector.extract_strided_slice %226 {offsets = [0, 0, 16], sizes = [2, 8, 8], strides = [1, 1, 1]} : vector<2x8x32xbf16> to vector<2x8x8xbf16>
    "tpu.trace_start"() <{level = 10 : i32, message = "bqk,bkd->bqd"}> : () -> ()
    %cst_80 = arith.constant dense<0.000000e+00> : vector<2x16x8xf32>
    %278 = tpu.matmul %276, %277, %cst_80 {dimension_numbers = #tpu.dot_dimension_numbers<[2], [1], [1], [2], [0, 0, 0, 1, 1, 2], [0], [0]>} : vector<2x16x8xbf16>, vector<2x8x8xbf16>, vector<2x16x8xf32> -> vector<2x16x8xf32>
    "tpu.trace_stop"() : () -> ()
    %279 = vector.extract_strided_slice %223 {offsets = [0, 0, 16], sizes = [2, 16, 8], strides = [1, 1, 1]} : vector<2x16x32xf32> to vector<2x16x8xf32>
    %280 = arith.addf %279, %278 : vector<2x16x8xf32>
    %281 = vector.extract_strided_slice %224 {offsets = [0, 0, 24], sizes = [2, 16, 8], strides = [1, 1, 1]} : vector<2x16x32xbf16> to vector<2x16x8xbf16>
    %282 = vector.extract_strided_slice %225 {offsets = [0, 0, 24], sizes = [2, 8, 8], strides = [1, 1, 1]} : vector<2x8x32xbf16> to vector<2x8x8xbf16>
    "tpu.trace_start"() <{level = 10 : i32, message = "bqd,bkd->bqk"}> : () -> ()
    %cst_81 = arith.constant dense<0.000000e+00> : vector<2x16x8xf32>
    %283 = tpu.matmul %281, %282, %cst_81 {dimension_numbers = #tpu.dot_dimension_numbers<[2], [2], [1], [1], [0, 0, 0, 1, 1, 1], [0], [0]>} : vector<2x16x8xbf16>, vector<2x8x8xbf16>, vector<2x16x8xf32> -> vector<2x16x8xf32>
    "tpu.trace_stop"() : () -> ()
    %cst_82 = arith.constant dense<0xFF800000> : vector<2x16xf32>
    %284 = vector.multi_reduction <maximumf>, %283, %cst_82 [2] : vector<2x16x8xf32> to vector<2x16xf32>
    %285 = vector.shape_cast %284 : vector<2x16xf32> to vector<2x16x1xf32>
    %286 = vector.broadcast %285 : vector<2x16x1xf32> to vector<2x16x8xf32>
    %287 = arith.subf %283, %286 : vector<2x16x8xf32>
    %288 = math.exp %287 : vector<2x16x8xf32>
    %cst_83 = arith.constant dense<0.000000e+00> : vector<2x16xf32>
    %289 = vector.multi_reduction <add>, %288, %cst_83 [2] : vector<2x16x8xf32> to vector<2x16xf32>
    %290 = vector.shape_cast %289 : vector<2x16xf32> to vector<2x16x1xf32>
    %291 = tpu.reciprocal %290 {approx = true} : vector<2x16x1xf32> -> vector<2x16x1xf32>
    %292 = vector.broadcast %291 : vector<2x16x1xf32> to vector<2x16x8xf32>
    %293 = arith.mulf %288, %292 : vector<2x16x8xf32>
    %294 = arith.truncf %293 : vector<2x16x8xf32> to vector<2x16x8xbf16>
    %295 = vector.extract_strided_slice %226 {offsets = [0, 0, 24], sizes = [2, 8, 8], strides = [1, 1, 1]} : vector<2x8x32xbf16> to vector<2x8x8xbf16>
    "tpu.trace_start"() <{level = 10 : i32, message = "bqk,bkd->bqd"}> : () -> ()
    %cst_84 = arith.constant dense<0.000000e+00> : vector<2x16x8xf32>
    %296 = tpu.matmul %294, %295, %cst_84 {dimension_numbers = #tpu.dot_dimension_numbers<[2], [1], [1], [2], [0, 0, 0, 1, 1, 2], [0], [0]>} : vector<2x16x8xbf16>, vector<2x8x8xbf16>, vector<2x16x8xf32> -> vector<2x16x8xf32>
    "tpu.trace_stop"() : () -> ()
    %297 = vector.extract_strided_slice %223 {offsets = [0, 0, 24], sizes = [2, 16, 8], strides = [1, 1, 1]} : vector<2x16x32xf32> to vector<2x16x8xf32>
    %298 = arith.addf %297, %296 : vector<2x16x8xf32>
    %299 = tpu.concatenate %244, %262, %280, %298 in 2 : vector<2x16x8xf32>, vector<2x16x8xf32>, vector<2x16x8xf32>, vector<2x16x8xf32> -> vector<2x16x32xf32>
    %300 = vector.shape_cast %299 : vector<2x16x32xf32> to vector<32x32xf32>
    %301 = arith.truncf %300 : vector<32x32xf32> to vector<32x32xbf16>
    %c0_85 = arith.constant 0 : index
    %c0_86 = arith.constant 0 : index
    %302 = vector.load %arg16[%c0_85, %c0_86] : memref<32x32xbf16, #tpu.memory_space<vmem>>, vector<32x32xbf16>
    %cst_87 = arith.constant dense<0.000000e+00> : vector<32x32xf32>
    %303 = tpu.matmul %301, %302, %cst_87 {dimension_numbers = #tpu.dot_dimension_numbers<[1], [0], [0], [1], [0, 0, 1, 1], [], []>} : vector<32x32xbf16>, vector<32x32xbf16>, vector<32x32xf32> -> vector<32x32xf32>
    %c0_88 = arith.constant 0 : index
    %c0_89 = arith.constant 0 : index
    %304 = vector.load %arg17[%c0_88, %c0_89] : memref<1x32xf32, #tpu.memory_space<vmem>>, vector<1x32xf32>
    %305 = vector.broadcast %304 : vector<1x32xf32> to vector<32x32xf32>
    %306 = arith.addf %303, %305 : vector<32x32xf32>
    %cst_90 = arith.constant 0.000000e+00 : f32
    %307 = vector.broadcast %cst_90 : f32 to vector<32x32xf32>
    %308 = arith.maximumf %306, %307 : vector<32x32xf32>
    %309 = arith.addf %300, %308 : vector<32x32xf32>
    %310 = vector.shape_cast %309 : vector<32x32xf32> to vector<2x16x32xf32>
    %311 = vector.shape_cast %310 : vector<2x16x32xf32> to vector<32x32xf32>
    %312 = arith.truncf %311 : vector<32x32xf32> to vector<32x32xbf16>
    %c0_91 = arith.constant 0 : index
    %c0_92 = arith.constant 0 : index
    %313 = vector.load %arg20[%c0_91, %c0_92] : memref<32x64xbf16, #tpu.memory_space<vmem>>, vector<32x64xbf16>
    %cst_93 = arith.constant dense<0.000000e+00> : vector<32x64xf32>
    %314 = tpu.matmul %312, %313, %cst_93 {dimension_numbers = #tpu.dot_dimension_numbers<[1], [0], [0], [1], [0, 0, 1, 1], [], []>} : vector<32x32xbf16>, vector<32x64xbf16>, vector<32x64xf32> -> vector<32x64xf32>
    %c0_94 = arith.constant 0 : index
    %c0_95 = arith.constant 0 : index
    %315 = vector.load %arg21[%c0_94, %c0_95] : memref<1x64xf32, #tpu.memory_space<vmem>>, vector<1x64xf32>
    %316 = vector.broadcast %315 : vector<1x64xf32> to vector<32x64xf32>
    %317 = arith.addf %314, %316 : vector<32x64xf32>
    %318 = vector.extract_strided_slice %317 {offsets = [0, 0], sizes = [32, 32], strides = [1, 1]} : vector<32x64xf32> to vector<32x32xf32>
    %319 = vector.shape_cast %318 : vector<32x32xf32> to vector<2x16x32xf32>
    %320 = vector.extract_strided_slice %317 {offsets = [0, 32], sizes = [32, 32], strides = [1, 1]} : vector<32x64xf32> to vector<32x32xf32>
    %321 = vector.shape_cast %320 : vector<32x32xf32> to vector<2x16x32xf32>
    %322 = vector.shape_cast %208 : vector<2x8x32xf32> to vector<16x32xf32>
    %323 = arith.truncf %322 : vector<16x32xf32> to vector<16x32xbf16>
    %c0_96 = arith.constant 0 : index
    %c0_97 = arith.constant 0 : index
    %324 = vector.load %arg18[%c0_96, %c0_97] : memref<32x32xbf16, #tpu.memory_space<vmem>>, vector<32x32xbf16>
    %cst_98 = arith.constant dense<0.000000e+00> : vector<16x32xf32>
    %325 = tpu.matmul %323, %324, %cst_98 {dimension_numbers = #tpu.dot_dimension_numbers<[1], [0], [0], [1], [0, 0, 1, 1], [], []>} : vector<16x32xbf16>, vector<32x32xbf16>, vector<16x32xf32> -> vector<16x32xf32>
    %c0_99 = arith.constant 0 : index
    %c0_100 = arith.constant 0 : index
    %326 = vector.load %arg19[%c0_99, %c0_100] : memref<1x32xf32, #tpu.memory_space<vmem>>, vector<1x32xf32>
    %327 = vector.broadcast %326 : vector<1x32xf32> to vector<16x32xf32>
    %328 = arith.addf %325, %327 : vector<16x32xf32>
    %329 = vector.shape_cast %328 : vector<16x32xf32> to vector<2x8x32xf32>
    %330 = arith.truncf %329 : vector<2x8x32xf32> to vector<2x8x32xbf16>
    %331 = arith.truncf %319 : vector<2x16x32xf32> to vector<2x16x32xbf16>
    %332 = arith.truncf %321 : vector<2x16x32xf32> to vector<2x16x32xbf16>
    %333 = vector.extract_strided_slice %330 {offsets = [0, 0, 0], sizes = [2, 8, 8], strides = [1, 1, 1]} : vector<2x8x32xbf16> to vector<2x8x8xbf16>
    %334 = vector.extract_strided_slice %331 {offsets = [0, 0, 0], sizes = [2, 16, 8], strides = [1, 1, 1]} : vector<2x16x32xbf16> to vector<2x16x8xbf16>
    "tpu.trace_start"() <{level = 10 : i32, message = "bqd,bkd->bqk"}> : () -> ()
    %cst_101 = arith.constant dense<0.000000e+00> : vector<2x8x16xf32>
    %335 = tpu.matmul %333, %334, %cst_101 {dimension_numbers = #tpu.dot_dimension_numbers<[2], [2], [1], [1], [0, 0, 0, 1, 1, 1], [0], [0]>} : vector<2x8x8xbf16>, vector<2x16x8xbf16>, vector<2x8x16xf32> -> vector<2x8x16xf32>
    "tpu.trace_stop"() : () -> ()
    %cst_102 = arith.constant dense<0xFF800000> : vector<2x8xf32>
    %336 = vector.multi_reduction <maximumf>, %335, %cst_102 [2] : vector<2x8x16xf32> to vector<2x8xf32>
    %337 = vector.shape_cast %336 : vector<2x8xf32> to vector<2x8x1xf32>
    %338 = vector.broadcast %337 : vector<2x8x1xf32> to vector<2x8x16xf32>
    %339 = arith.subf %335, %338 : vector<2x8x16xf32>
    %340 = math.exp %339 : vector<2x8x16xf32>
    %cst_103 = arith.constant dense<0.000000e+00> : vector<2x8xf32>
    %341 = vector.multi_reduction <add>, %340, %cst_103 [2] : vector<2x8x16xf32> to vector<2x8xf32>
    %342 = vector.shape_cast %341 : vector<2x8xf32> to vector<2x8x1xf32>
    %343 = tpu.reciprocal %342 {approx = true} : vector<2x8x1xf32> -> vector<2x8x1xf32>
    %344 = vector.broadcast %343 : vector<2x8x1xf32> to vector<2x8x16xf32>
    %345 = arith.mulf %340, %344 : vector<2x8x16xf32>
    %346 = arith.truncf %345 : vector<2x8x16xf32> to vector<2x8x16xbf16>
    %347 = vector.extract_strided_slice %332 {offsets = [0, 0, 0], sizes = [2, 16, 8], strides = [1, 1, 1]} : vector<2x16x32xbf16> to vector<2x16x8xbf16>
    "tpu.trace_start"() <{level = 10 : i32, message = "bqk,bkd->bqd"}> : () -> ()
    %cst_104 = arith.constant dense<0.000000e+00> : vector<2x8x8xf32>
    %348 = tpu.matmul %346, %347, %cst_104 {dimension_numbers = #tpu.dot_dimension_numbers<[2], [1], [1], [2], [0, 0, 0, 1, 1, 2], [0], [0]>} : vector<2x8x16xbf16>, vector<2x16x8xbf16>, vector<2x8x8xf32> -> vector<2x8x8xf32>
    "tpu.trace_stop"() : () -> ()
    %349 = vector.extract_strided_slice %329 {offsets = [0, 0, 0], sizes = [2, 8, 8], strides = [1, 1, 1]} : vector<2x8x32xf32> to vector<2x8x8xf32>
    %350 = arith.addf %349, %348 : vector<2x8x8xf32>
    %351 = vector.extract_strided_slice %330 {offsets = [0, 0, 8], sizes = [2, 8, 8], strides = [1, 1, 1]} : vector<2x8x32xbf16> to vector<2x8x8xbf16>
    %352 = vector.extract_strided_slice %331 {offsets = [0, 0, 8], sizes = [2, 16, 8], strides = [1, 1, 1]} : vector<2x16x32xbf16> to vector<2x16x8xbf16>
    "tpu.trace_start"() <{level = 10 : i32, message = "bqd,bkd->bqk"}> : () -> ()
    %cst_105 = arith.constant dense<0.000000e+00> : vector<2x8x16xf32>
    %353 = tpu.matmul %351, %352, %cst_105 {dimension_numbers = #tpu.dot_dimension_numbers<[2], [2], [1], [1], [0, 0, 0, 1, 1, 1], [0], [0]>} : vector<2x8x8xbf16>, vector<2x16x8xbf16>, vector<2x8x16xf32> -> vector<2x8x16xf32>
    "tpu.trace_stop"() : () -> ()
    %cst_106 = arith.constant dense<0xFF800000> : vector<2x8xf32>
    %354 = vector.multi_reduction <maximumf>, %353, %cst_106 [2] : vector<2x8x16xf32> to vector<2x8xf32>
    %355 = vector.shape_cast %354 : vector<2x8xf32> to vector<2x8x1xf32>
    %356 = vector.broadcast %355 : vector<2x8x1xf32> to vector<2x8x16xf32>
    %357 = arith.subf %353, %356 : vector<2x8x16xf32>
    %358 = math.exp %357 : vector<2x8x16xf32>
    %cst_107 = arith.constant dense<0.000000e+00> : vector<2x8xf32>
    %359 = vector.multi_reduction <add>, %358, %cst_107 [2] : vector<2x8x16xf32> to vector<2x8xf32>
    %360 = vector.shape_cast %359 : vector<2x8xf32> to vector<2x8x1xf32>
    %361 = tpu.reciprocal %360 {approx = true} : vector<2x8x1xf32> -> vector<2x8x1xf32>
    %362 = vector.broadcast %361 : vector<2x8x1xf32> to vector<2x8x16xf32>
    %363 = arith.mulf %358, %362 : vector<2x8x16xf32>
    %364 = arith.truncf %363 : vector<2x8x16xf32> to vector<2x8x16xbf16>
    %365 = vector.extract_strided_slice %332 {offsets = [0, 0, 8], sizes = [2, 16, 8], strides = [1, 1, 1]} : vector<2x16x32xbf16> to vector<2x16x8xbf16>
    "tpu.trace_start"() <{level = 10 : i32, message = "bqk,bkd->bqd"}> : () -> ()
    %cst_108 = arith.constant dense<0.000000e+00> : vector<2x8x8xf32>
    %366 = tpu.matmul %364, %365, %cst_108 {dimension_numbers = #tpu.dot_dimension_numbers<[2], [1], [1], [2], [0, 0, 0, 1, 1, 2], [0], [0]>} : vector<2x8x16xbf16>, vector<2x16x8xbf16>, vector<2x8x8xf32> -> vector<2x8x8xf32>
    "tpu.trace_stop"() : () -> ()
    %367 = vector.extract_strided_slice %329 {offsets = [0, 0, 8], sizes = [2, 8, 8], strides = [1, 1, 1]} : vector<2x8x32xf32> to vector<2x8x8xf32>
    %368 = arith.addf %367, %366 : vector<2x8x8xf32>
    %369 = vector.extract_strided_slice %330 {offsets = [0, 0, 16], sizes = [2, 8, 8], strides = [1, 1, 1]} : vector<2x8x32xbf16> to vector<2x8x8xbf16>
    %370 = vector.extract_strided_slice %331 {offsets = [0, 0, 16], sizes = [2, 16, 8], strides = [1, 1, 1]} : vector<2x16x32xbf16> to vector<2x16x8xbf16>
    "tpu.trace_start"() <{level = 10 : i32, message = "bqd,bkd->bqk"}> : () -> ()
    %cst_109 = arith.constant dense<0.000000e+00> : vector<2x8x16xf32>
    %371 = tpu.matmul %369, %370, %cst_109 {dimension_numbers = #tpu.dot_dimension_numbers<[2], [2], [1], [1], [0, 0, 0, 1, 1, 1], [0], [0]>} : vector<2x8x8xbf16>, vector<2x16x8xbf16>, vector<2x8x16xf32> -> vector<2x8x16xf32>
    "tpu.trace_stop"() : () -> ()
    %cst_110 = arith.constant dense<0xFF800000> : vector<2x8xf32>
    %372 = vector.multi_reduction <maximumf>, %371, %cst_110 [2] : vector<2x8x16xf32> to vector<2x8xf32>
    %373 = vector.shape_cast %372 : vector<2x8xf32> to vector<2x8x1xf32>
    %374 = vector.broadcast %373 : vector<2x8x1xf32> to vector<2x8x16xf32>
    %375 = arith.subf %371, %374 : vector<2x8x16xf32>
    %376 = math.exp %375 : vector<2x8x16xf32>
    %cst_111 = arith.constant dense<0.000000e+00> : vector<2x8xf32>
    %377 = vector.multi_reduction <add>, %376, %cst_111 [2] : vector<2x8x16xf32> to vector<2x8xf32>
    %378 = vector.shape_cast %377 : vector<2x8xf32> to vector<2x8x1xf32>
    %379 = tpu.reciprocal %378 {approx = true} : vector<2x8x1xf32> -> vector<2x8x1xf32>
    %380 = vector.broadcast %379 : vector<2x8x1xf32> to vector<2x8x16xf32>
    %381 = arith.mulf %376, %380 : vector<2x8x16xf32>
    %382 = arith.truncf %381 : vector<2x8x16xf32> to vector<2x8x16xbf16>
    %383 = vector.extract_strided_slice %332 {offsets = [0, 0, 16], sizes = [2, 16, 8], strides = [1, 1, 1]} : vector<2x16x32xbf16> to vector<2x16x8xbf16>
    "tpu.trace_start"() <{level = 10 : i32, message = "bqk,bkd->bqd"}> : () -> ()
    %cst_112 = arith.constant dense<0.000000e+00> : vector<2x8x8xf32>
    %384 = tpu.matmul %382, %383, %cst_112 {dimension_numbers = #tpu.dot_dimension_numbers<[2], [1], [1], [2], [0, 0, 0, 1, 1, 2], [0], [0]>} : vector<2x8x16xbf16>, vector<2x16x8xbf16>, vector<2x8x8xf32> -> vector<2x8x8xf32>
    "tpu.trace_stop"() : () -> ()
    %385 = vector.extract_strided_slice %329 {offsets = [0, 0, 16], sizes = [2, 8, 8], strides = [1, 1, 1]} : vector<2x8x32xf32> to vector<2x8x8xf32>
    %386 = arith.addf %385, %384 : vector<2x8x8xf32>
    %387 = vector.extract_strided_slice %330 {offsets = [0, 0, 24], sizes = [2, 8, 8], strides = [1, 1, 1]} : vector<2x8x32xbf16> to vector<2x8x8xbf16>
    %388 = vector.extract_strided_slice %331 {offsets = [0, 0, 24], sizes = [2, 16, 8], strides = [1, 1, 1]} : vector<2x16x32xbf16> to vector<2x16x8xbf16>
    "tpu.trace_start"() <{level = 10 : i32, message = "bqd,bkd->bqk"}> : () -> ()
    %cst_113 = arith.constant dense<0.000000e+00> : vector<2x8x16xf32>
    %389 = tpu.matmul %387, %388, %cst_113 {dimension_numbers = #tpu.dot_dimension_numbers<[2], [2], [1], [1], [0, 0, 0, 1, 1, 1], [0], [0]>} : vector<2x8x8xbf16>, vector<2x16x8xbf16>, vector<2x8x16xf32> -> vector<2x8x16xf32>
    "tpu.trace_stop"() : () -> ()
    %cst_114 = arith.constant dense<0xFF800000> : vector<2x8xf32>
    %390 = vector.multi_reduction <maximumf>, %389, %cst_114 [2] : vector<2x8x16xf32> to vector<2x8xf32>
    %391 = vector.shape_cast %390 : vector<2x8xf32> to vector<2x8x1xf32>
    %392 = vector.broadcast %391 : vector<2x8x1xf32> to vector<2x8x16xf32>
    %393 = arith.subf %389, %392 : vector<2x8x16xf32>
    %394 = math.exp %393 : vector<2x8x16xf32>
    %cst_115 = arith.constant dense<0.000000e+00> : vector<2x8xf32>
    %395 = vector.multi_reduction <add>, %394, %cst_115 [2] : vector<2x8x16xf32> to vector<2x8xf32>
    %396 = vector.shape_cast %395 : vector<2x8xf32> to vector<2x8x1xf32>
    %397 = tpu.reciprocal %396 {approx = true} : vector<2x8x1xf32> -> vector<2x8x1xf32>
    %398 = vector.broadcast %397 : vector<2x8x1xf32> to vector<2x8x16xf32>
    %399 = arith.mulf %394, %398 : vector<2x8x16xf32>
    %400 = arith.truncf %399 : vector<2x8x16xf32> to vector<2x8x16xbf16>
    %401 = vector.extract_strided_slice %332 {offsets = [0, 0, 24], sizes = [2, 16, 8], strides = [1, 1, 1]} : vector<2x16x32xbf16> to vector<2x16x8xbf16>
    "tpu.trace_start"() <{level = 10 : i32, message = "bqk,bkd->bqd"}> : () -> ()
    %cst_116 = arith.constant dense<0.000000e+00> : vector<2x8x8xf32>
    %402 = tpu.matmul %400, %401, %cst_116 {dimension_numbers = #tpu.dot_dimension_numbers<[2], [1], [1], [2], [0, 0, 0, 1, 1, 2], [0], [0]>} : vector<2x8x16xbf16>, vector<2x16x8xbf16>, vector<2x8x8xf32> -> vector<2x8x8xf32>
    "tpu.trace_stop"() : () -> ()
    %403 = vector.extract_strided_slice %329 {offsets = [0, 0, 24], sizes = [2, 8, 8], strides = [1, 1, 1]} : vector<2x8x32xf32> to vector<2x8x8xf32>
    %404 = arith.addf %403, %402 : vector<2x8x8xf32>
    %405 = tpu.concatenate %350, %368, %386, %404 in 2 : vector<2x8x8xf32>, vector<2x8x8xf32>, vector<2x8x8xf32>, vector<2x8x8xf32> -> vector<2x8x32xf32>
    %406 = vector.shape_cast %405 : vector<2x8x32xf32> to vector<16x32xf32>
    %407 = arith.truncf %406 : vector<16x32xf32> to vector<16x32xbf16>
    %c0_117 = arith.constant 0 : index
    %c0_118 = arith.constant 0 : index
    %408 = vector.load %arg22[%c0_117, %c0_118] : memref<32x32xbf16, #tpu.memory_space<vmem>>, vector<32x32xbf16>
    %cst_119 = arith.constant dense<0.000000e+00> : vector<16x32xf32>
    %409 = tpu.matmul %407, %408, %cst_119 {dimension_numbers = #tpu.dot_dimension_numbers<[1], [0], [0], [1], [0, 0, 1, 1], [], []>} : vector<16x32xbf16>, vector<32x32xbf16>, vector<16x32xf32> -> vector<16x32xf32>
    %c0_120 = arith.constant 0 : index
    %c0_121 = arith.constant 0 : index
    %410 = vector.load %arg23[%c0_120, %c0_121] : memref<1x32xf32, #tpu.memory_space<vmem>>, vector<1x32xf32>
    %411 = vector.broadcast %410 : vector<1x32xf32> to vector<16x32xf32>
    %412 = arith.addf %409, %411 : vector<16x32xf32>
    %cst_122 = arith.constant 0.000000e+00 : f32
    %413 = vector.broadcast %cst_122 : f32 to vector<16x32xf32>
    %414 = arith.maximumf %412, %413 : vector<16x32xf32>
    %415 = arith.addf %406, %414 : vector<16x32xf32>
    %416 = vector.shape_cast %415 : vector<16x32xf32> to vector<2x8x32xf32>
    %417 = vector.shape_cast %416 : vector<2x8x32xf32> to vector<16x32xf32>
    %418 = arith.truncf %417 : vector<16x32xf32> to vector<16x32xbf16>
    %c0_123 = arith.constant 0 : index
    %c0_124 = arith.constant 0 : index
    %419 = vector.load %arg25[%c0_123, %c0_124] : memref<32x64xbf16, #tpu.memory_space<vmem>>, vector<32x64xbf16>
    %cst_125 = arith.constant dense<0.000000e+00> : vector<16x64xf32>
    %420 = tpu.matmul %418, %419, %cst_125 {dimension_numbers = #tpu.dot_dimension_numbers<[1], [0], [0], [1], [0, 0, 1, 1], [], []>} : vector<16x32xbf16>, vector<32x64xbf16>, vector<16x64xf32> -> vector<16x64xf32>
    %c0_126 = arith.constant 0 : index
    %c0_127 = arith.constant 0 : index
    %421 = vector.load %arg26[%c0_126, %c0_127] : memref<1x64xf32, #tpu.memory_space<vmem>>, vector<1x64xf32>
    %422 = vector.broadcast %421 : vector<1x64xf32> to vector<16x64xf32>
    %423 = arith.addf %420, %422 : vector<16x64xf32>
    %424 = vector.extract_strided_slice %423 {offsets = [0, 0], sizes = [16, 32], strides = [1, 1]} : vector<16x64xf32> to vector<16x32xf32>
    %425 = vector.shape_cast %424 : vector<16x32xf32> to vector<2x8x32xf32>
    %426 = vector.extract_strided_slice %423 {offsets = [0, 32], sizes = [16, 32], strides = [1, 1]} : vector<16x64xf32> to vector<16x32xf32>
    %427 = vector.shape_cast %426 : vector<16x32xf32> to vector<2x8x32xf32>
    %c0_128 = arith.constant 0 : index
    %c0_129 = arith.constant 0 : index
    %428 = vector.load %arg24[%c0_128, %c0_129] : memref<1x32xf32, #tpu.memory_space<vmem>>, vector<1x32xf32>
    %429 = vector.shape_cast %428 : vector<1x32xf32> to vector<1x1x32xf32>
    %430 = vector.shape_cast %429 : vector<1x1x32xf32> to vector<1x1x32xf32>
    %431 = vector.broadcast %430 : vector<1x1x32xf32> to vector<2x1x32xf32>
    %432 = arith.truncf %431 : vector<2x1x32xf32> to vector<2x1x32xbf16>
    %433 = arith.truncf %425 : vector<2x8x32xf32> to vector<2x8x32xbf16>
    %434 = arith.truncf %427 : vector<2x8x32xf32> to vector<2x8x32xbf16>
    %435 = vector.extract_strided_slice %432 {offsets = [0, 0, 0], sizes = [2, 1, 8], strides = [1, 1, 1]} : vector<2x1x32xbf16> to vector<2x1x8xbf16>
    %436 = vector.extract_strided_slice %433 {offsets = [0, 0, 0], sizes = [2, 8, 8], strides = [1, 1, 1]} : vector<2x8x32xbf16> to vector<2x8x8xbf16>
    "tpu.trace_start"() <{level = 10 : i32, message = "bqd,bkd->bqk"}> : () -> ()
    %cst_130 = arith.constant dense<0.000000e+00> : vector<2x1x8xf32>
    %437 = tpu.matmul %435, %436, %cst_130 {dimension_numbers = #tpu.dot_dimension_numbers<[2], [2], [1], [1], [0, 0, 0, 1, 1, 1], [0], [0]>} : vector<2x1x8xbf16>, vector<2x8x8xbf16>, vector<2x1x8xf32> -> vector<2x1x8xf32>
    "tpu.trace_stop"() : () -> ()
    %cst_131 = arith.constant dense<0xFF800000> : vector<2x1xf32>
    %438 = vector.multi_reduction <maximumf>, %437, %cst_131 [2] : vector<2x1x8xf32> to vector<2x1xf32>
    %439 = vector.shape_cast %438 : vector<2x1xf32> to vector<2x1x1xf32>
    %440 = vector.broadcast %439 : vector<2x1x1xf32> to vector<2x1x8xf32>
    %441 = arith.subf %437, %440 : vector<2x1x8xf32>
    %442 = math.exp %441 : vector<2x1x8xf32>
    %cst_132 = arith.constant dense<0.000000e+00> : vector<2x1xf32>
    %443 = vector.multi_reduction <add>, %442, %cst_132 [2] : vector<2x1x8xf32> to vector<2x1xf32>
    %444 = vector.shape_cast %443 : vector<2x1xf32> to vector<2x1x1xf32>
    %445 = vector.broadcast %444 : vector<2x1x1xf32> to vector<2x1x8xf32>
    %446 = arith.divf %442, %445 : vector<2x1x8xf32>
    %447 = arith.truncf %446 : vector<2x1x8xf32> to vector<2x1x8xbf16>
    %448 = vector.extract_strided_slice %434 {offsets = [0, 0, 0], sizes = [2, 8, 8], strides = [1, 1, 1]} : vector<2x8x32xbf16> to vector<2x8x8xbf16>
    "tpu.trace_start"() <{level = 10 : i32, message = "bqk,bkd->bqd"}> : () -> ()
    %cst_133 = arith.constant dense<0.000000e+00> : vector<2x1x8xf32>
    %449 = tpu.matmul %447, %448, %cst_133 {dimension_numbers = #tpu.dot_dimension_numbers<[2], [1], [1], [2], [0, 0, 0, 1, 1, 2], [0], [0]>} : vector<2x1x8xbf16>, vector<2x8x8xbf16>, vector<2x1x8xf32> -> vector<2x1x8xf32>
    "tpu.trace_stop"() : () -> ()
    %450 = vector.extract_strided_slice %431 {offsets = [0, 0, 0], sizes = [2, 1, 8], strides = [1, 1, 1]} : vector<2x1x32xf32> to vector<2x1x8xf32>
    %451 = arith.addf %450, %449 : vector<2x1x8xf32>
    %452 = vector.extract_strided_slice %432 {offsets = [0, 0, 8], sizes = [2, 1, 8], strides = [1, 1, 1]} : vector<2x1x32xbf16> to vector<2x1x8xbf16>
    %453 = vector.extract_strided_slice %433 {offsets = [0, 0, 8], sizes = [2, 8, 8], strides = [1, 1, 1]} : vector<2x8x32xbf16> to vector<2x8x8xbf16>
    "tpu.trace_start"() <{level = 10 : i32, message = "bqd,bkd->bqk"}> : () -> ()
    %cst_134 = arith.constant dense<0.000000e+00> : vector<2x1x8xf32>
    %454 = tpu.matmul %452, %453, %cst_134 {dimension_numbers = #tpu.dot_dimension_numbers<[2], [2], [1], [1], [0, 0, 0, 1, 1, 1], [0], [0]>} : vector<2x1x8xbf16>, vector<2x8x8xbf16>, vector<2x1x8xf32> -> vector<2x1x8xf32>
    "tpu.trace_stop"() : () -> ()
    %cst_135 = arith.constant dense<0xFF800000> : vector<2x1xf32>
    %455 = vector.multi_reduction <maximumf>, %454, %cst_135 [2] : vector<2x1x8xf32> to vector<2x1xf32>
    %456 = vector.shape_cast %455 : vector<2x1xf32> to vector<2x1x1xf32>
    %457 = vector.broadcast %456 : vector<2x1x1xf32> to vector<2x1x8xf32>
    %458 = arith.subf %454, %457 : vector<2x1x8xf32>
    %459 = math.exp %458 : vector<2x1x8xf32>
    %cst_136 = arith.constant dense<0.000000e+00> : vector<2x1xf32>
    %460 = vector.multi_reduction <add>, %459, %cst_136 [2] : vector<2x1x8xf32> to vector<2x1xf32>
    %461 = vector.shape_cast %460 : vector<2x1xf32> to vector<2x1x1xf32>
    %462 = vector.broadcast %461 : vector<2x1x1xf32> to vector<2x1x8xf32>
    %463 = arith.divf %459, %462 : vector<2x1x8xf32>
    %464 = arith.truncf %463 : vector<2x1x8xf32> to vector<2x1x8xbf16>
    %465 = vector.extract_strided_slice %434 {offsets = [0, 0, 8], sizes = [2, 8, 8], strides = [1, 1, 1]} : vector<2x8x32xbf16> to vector<2x8x8xbf16>
    "tpu.trace_start"() <{level = 10 : i32, message = "bqk,bkd->bqd"}> : () -> ()
    %cst_137 = arith.constant dense<0.000000e+00> : vector<2x1x8xf32>
    %466 = tpu.matmul %464, %465, %cst_137 {dimension_numbers = #tpu.dot_dimension_numbers<[2], [1], [1], [2], [0, 0, 0, 1, 1, 2], [0], [0]>} : vector<2x1x8xbf16>, vector<2x8x8xbf16>, vector<2x1x8xf32> -> vector<2x1x8xf32>
    "tpu.trace_stop"() : () -> ()
    %467 = vector.extract_strided_slice %431 {offsets = [0, 0, 8], sizes = [2, 1, 8], strides = [1, 1, 1]} : vector<2x1x32xf32> to vector<2x1x8xf32>
    %468 = arith.addf %467, %466 : vector<2x1x8xf32>
    %469 = vector.extract_strided_slice %432 {offsets = [0, 0, 16], sizes = [2, 1, 8], strides = [1, 1, 1]} : vector<2x1x32xbf16> to vector<2x1x8xbf16>
    %470 = vector.extract_strided_slice %433 {offsets = [0, 0, 16], sizes = [2, 8, 8], strides = [1, 1, 1]} : vector<2x8x32xbf16> to vector<2x8x8xbf16>
    "tpu.trace_start"() <{level = 10 : i32, message = "bqd,bkd->bqk"}> : () -> ()
    %cst_138 = arith.constant dense<0.000000e+00> : vector<2x1x8xf32>
    %471 = tpu.matmul %469, %470, %cst_138 {dimension_numbers = #tpu.dot_dimension_numbers<[2], [2], [1], [1], [0, 0, 0, 1, 1, 1], [0], [0]>} : vector<2x1x8xbf16>, vector<2x8x8xbf16>, vector<2x1x8xf32> -> vector<2x1x8xf32>
    "tpu.trace_stop"() : () -> ()
    %cst_139 = arith.constant dense<0xFF800000> : vector<2x1xf32>
    %472 = vector.multi_reduction <maximumf>, %471, %cst_139 [2] : vector<2x1x8xf32> to vector<2x1xf32>
    %473 = vector.shape_cast %472 : vector<2x1xf32> to vector<2x1x1xf32>
    %474 = vector.broadcast %473 : vector<2x1x1xf32> to vector<2x1x8xf32>
    %475 = arith.subf %471, %474 : vector<2x1x8xf32>
    %476 = math.exp %475 : vector<2x1x8xf32>
    %cst_140 = arith.constant dense<0.000000e+00> : vector<2x1xf32>
    %477 = vector.multi_reduction <add>, %476, %cst_140 [2] : vector<2x1x8xf32> to vector<2x1xf32>
    %478 = vector.shape_cast %477 : vector<2x1xf32> to vector<2x1x1xf32>
    %479 = vector.broadcast %478 : vector<2x1x1xf32> to vector<2x1x8xf32>
    %480 = arith.divf %476, %479 : vector<2x1x8xf32>
    %481 = arith.truncf %480 : vector<2x1x8xf32> to vector<2x1x8xbf16>
    %482 = vector.extract_strided_slice %434 {offsets = [0, 0, 16], sizes = [2, 8, 8], strides = [1, 1, 1]} : vector<2x8x32xbf16> to vector<2x8x8xbf16>
    "tpu.trace_start"() <{level = 10 : i32, message = "bqk,bkd->bqd"}> : () -> ()
    %cst_141 = arith.constant dense<0.000000e+00> : vector<2x1x8xf32>
    %483 = tpu.matmul %481, %482, %cst_141 {dimension_numbers = #tpu.dot_dimension_numbers<[2], [1], [1], [2], [0, 0, 0, 1, 1, 2], [0], [0]>} : vector<2x1x8xbf16>, vector<2x8x8xbf16>, vector<2x1x8xf32> -> vector<2x1x8xf32>
    "tpu.trace_stop"() : () -> ()
    %484 = vector.extract_strided_slice %431 {offsets = [0, 0, 16], sizes = [2, 1, 8], strides = [1, 1, 1]} : vector<2x1x32xf32> to vector<2x1x8xf32>
    %485 = arith.addf %484, %483 : vector<2x1x8xf32>
    %486 = vector.extract_strided_slice %432 {offsets = [0, 0, 24], sizes = [2, 1, 8], strides = [1, 1, 1]} : vector<2x1x32xbf16> to vector<2x1x8xbf16>
    %487 = vector.extract_strided_slice %433 {offsets = [0, 0, 24], sizes = [2, 8, 8], strides = [1, 1, 1]} : vector<2x8x32xbf16> to vector<2x8x8xbf16>
    "tpu.trace_start"() <{level = 10 : i32, message = "bqd,bkd->bqk"}> : () -> ()
    %cst_142 = arith.constant dense<0.000000e+00> : vector<2x1x8xf32>
    %488 = tpu.matmul %486, %487, %cst_142 {dimension_numbers = #tpu.dot_dimension_numbers<[2], [2], [1], [1], [0, 0, 0, 1, 1, 1], [0], [0]>} : vector<2x1x8xbf16>, vector<2x8x8xbf16>, vector<2x1x8xf32> -> vector<2x1x8xf32>
    "tpu.trace_stop"() : () -> ()
    %cst_143 = arith.constant dense<0xFF800000> : vector<2x1xf32>
    %489 = vector.multi_reduction <maximumf>, %488, %cst_143 [2] : vector<2x1x8xf32> to vector<2x1xf32>
    %490 = vector.shape_cast %489 : vector<2x1xf32> to vector<2x1x1xf32>
    %491 = vector.broadcast %490 : vector<2x1x1xf32> to vector<2x1x8xf32>
    %492 = arith.subf %488, %491 : vector<2x1x8xf32>
    %493 = math.exp %492 : vector<2x1x8xf32>
    %cst_144 = arith.constant dense<0.000000e+00> : vector<2x1xf32>
    %494 = vector.multi_reduction <add>, %493, %cst_144 [2] : vector<2x1x8xf32> to vector<2x1xf32>
    %495 = vector.shape_cast %494 : vector<2x1xf32> to vector<2x1x1xf32>
    %496 = vector.broadcast %495 : vector<2x1x1xf32> to vector<2x1x8xf32>
    %497 = arith.divf %493, %496 : vector<2x1x8xf32>
    %498 = arith.truncf %497 : vector<2x1x8xf32> to vector<2x1x8xbf16>
    %499 = vector.extract_strided_slice %434 {offsets = [0, 0, 24], sizes = [2, 8, 8], strides = [1, 1, 1]} : vector<2x8x32xbf16> to vector<2x8x8xbf16>
    "tpu.trace_start"() <{level = 10 : i32, message = "bqk,bkd->bqd"}> : () -> ()
    %cst_145 = arith.constant dense<0.000000e+00> : vector<2x1x8xf32>
    %500 = tpu.matmul %498, %499, %cst_145 {dimension_numbers = #tpu.dot_dimension_numbers<[2], [1], [1], [2], [0, 0, 0, 1, 1, 2], [0], [0]>} : vector<2x1x8xbf16>, vector<2x8x8xbf16>, vector<2x1x8xf32> -> vector<2x1x8xf32>
    "tpu.trace_stop"() : () -> ()
    %501 = vector.extract_strided_slice %431 {offsets = [0, 0, 24], sizes = [2, 1, 8], strides = [1, 1, 1]} : vector<2x1x32xf32> to vector<2x1x8xf32>
    %502 = arith.addf %501, %500 : vector<2x1x8xf32>
    %503 = tpu.concatenate %451, %468, %485, %502 in 2 : vector<2x1x8xf32>, vector<2x1x8xf32>, vector<2x1x8xf32>, vector<2x1x8xf32> -> vector<2x1x32xf32>
    %504 = vector.shape_cast %503 : vector<2x1x32xf32> to vector<2x32xf32>
    %505 = arith.truncf %504 : vector<2x32xf32> to vector<2x32xbf16>
    %c0_146 = arith.constant 0 : index
    %c0_147 = arith.constant 0 : index
    %506 = vector.load %arg27[%c0_146, %c0_147] : memref<32x32xbf16, #tpu.memory_space<vmem>>, vector<32x32xbf16>
    %cst_148 = arith.constant dense<0.000000e+00> : vector<2x32xf32>
    %507 = tpu.matmul %505, %506, %cst_148 {dimension_numbers = #tpu.dot_dimension_numbers<[1], [0], [0], [1], [0, 0, 1, 1], [], []>} : vector<2x32xbf16>, vector<32x32xbf16>, vector<2x32xf32> -> vector<2x32xf32>
    %c0_149 = arith.constant 0 : index
    %c0_150 = arith.constant 0 : index
    %508 = vector.load %arg28[%c0_149, %c0_150] : memref<1x32xf32, #tpu.memory_space<vmem>>, vector<1x32xf32>
    %509 = vector.broadcast %508 : vector<1x32xf32> to vector<2x32xf32>
    %510 = arith.addf %507, %509 : vector<2x32xf32>
    %cst_151 = arith.constant 0.000000e+00 : f32
    %511 = vector.broadcast %cst_151 : f32 to vector<2x32xf32>
    %512 = arith.maximumf %510, %511 : vector<2x32xf32>
    %513 = arith.addf %504, %512 : vector<2x32xf32>
    %514 = vector.shape_cast %513 : vector<2x32xf32> to vector<2x1x32xf32>
    %515 = vector.shape_cast %514 : vector<2x1x32xf32> to vector<2x32xf32>
    %516 = arith.truncf %515 : vector<2x32xf32> to vector<2x32xbf16>
    %c0_152 = arith.constant 0 : index
    %c0_153 = arith.constant 0 : index
    %517 = vector.load %arg29[%c0_152, %c0_153] : memref<32x32xbf16, #tpu.memory_space<vmem>>, vector<32x32xbf16>
    %cst_154 = arith.constant dense<0.000000e+00> : vector<2x32xf32>
    %518 = tpu.matmul %516, %517, %cst_154 {dimension_numbers = #tpu.dot_dimension_numbers<[1], [0], [0], [1], [0, 0, 1, 1], [], []>} : vector<2x32xbf16>, vector<32x32xbf16>, vector<2x32xf32> -> vector<2x32xf32>
    %c0_155 = arith.constant 0 : index
    %c0_156 = arith.constant 0 : index
    %519 = vector.load %arg30[%c0_155, %c0_156] : memref<1x32xf32, #tpu.memory_space<vmem>>, vector<1x32xf32>
    %520 = vector.broadcast %519 : vector<1x32xf32> to vector<2x32xf32>
    %521 = arith.addf %518, %520 : vector<2x32xf32>
    %cst_157 = arith.constant 0.000000e+00 : f32
    %522 = vector.broadcast %cst_157 : f32 to vector<2x32xf32>
    %523 = arith.maximumf %521, %522 : vector<2x32xf32>
    %524 = arith.truncf %523 : vector<2x32xf32> to vector<2x32xbf16>
    %c0_158 = arith.constant 0 : index
    %c0_159 = arith.constant 0 : index
    %525 = vector.load %arg31[%c0_158, %c0_159] : memref<32x128xbf16, #tpu.memory_space<vmem>>, vector<32x128xbf16>
    %cst_160 = arith.constant dense<0.000000e+00> : vector<2x128xf32>
    %526 = tpu.matmul %524, %525, %cst_160 {dimension_numbers = #tpu.dot_dimension_numbers<[1], [0], [0], [1], [0, 0, 1, 1], [], []>} : vector<2x32xbf16>, vector<32x128xbf16>, vector<2x128xf32> -> vector<2x128xf32>
    %c0_161 = arith.constant 0 : index
    %c0_162 = arith.constant 0 : index
    %527 = vector.load %arg32[%c0_161, %c0_162] : memref<1x128xf32, #tpu.memory_space<vmem>>, vector<1x128xf32>
    %528 = vector.broadcast %527 : vector<1x128xf32> to vector<2x128xf32>
    %529 = arith.addf %526, %528 : vector<2x128xf32>
    %c0_163 = arith.constant 0 : index
    %c0_164 = arith.constant 0 : index
    %530 = vector.load %arg33[%c0_163, %c0_164] : memref<2x128xf32, #tpu.memory_space<vmem>>, vector<2x128xf32>
    tpu.vector_store %arg33[%c0_163, %c0_164], %529 {strides = array<i32>} : memref<2x128xf32, #tpu.memory_space<vmem>>, vector<2x128xf32>,
    return
  }
  func.func @transform_0(%arg0: i32) -> (i32, i32, i32) {
    %c0_i32 = arith.constant 0 : i32
    %c0_i32_0 = arith.constant 0 : i32
    %c0_i32_1 = arith.constant 0 : i32
    return %arg0, %c0_i32, %c0_i32_0 : i32, i32, i32
  }
  func.func @transform_1(%arg0: i32) -> (i32, i32) {
    %c0_i32 = arith.constant 0 : i32
    %c0_i32_0 = arith.constant 0 : i32
    %c0_i32_1 = arith.constant 0 : i32
    return %c0_i32, %c0_i32_0 : i32, i32
  }
  func.func @transform_2(%arg0: i32) -> (i32, i32) {
    %c0_i32 = arith.constant 0 : i32
    %c0_i32_0 = arith.constant 0 : i32
    %c0_i32_1 = arith.constant 0 : i32
    return %c0_i32, %c0_i32_0 : i32, i32
  }
  func.func @transform_3(%arg0: i32) -> (i32, i32) {
    %c0_i32 = arith.constant 0 : i32
    %c0_i32_0 = arith.constant 0 : i32
    %c0_i32_1 = arith.constant 0 : i32
    return %c0_i32, %c0_i32_0 : i32, i32
  }
  func.func @transform_4(%arg0: i32) -> (i32, i32) {
    %c0_i32 = arith.constant 0 : i32
    %c0_i32_0 = arith.constant 0 : i32
    %c0_i32_1 = arith.constant 0 : i32
    return %c0_i32, %c0_i32_0 : i32, i32
  }
  func.func @transform_5(%arg0: i32) -> (i32, i32) {
    %c0_i32 = arith.constant 0 : i32
    %c0_i32_0 = arith.constant 0 : i32
    %c0_i32_1 = arith.constant 0 : i32
    return %c0_i32, %c0_i32_0 : i32, i32
  }
  func.func @transform_6(%arg0: i32) -> (i32, i32) {
    %c0_i32 = arith.constant 0 : i32
    %c0_i32_0 = arith.constant 0 : i32
    %c0_i32_1 = arith.constant 0 : i32
    return %c0_i32, %c0_i32_0 : i32, i32
  }
  func.func @transform_7(%arg0: i32) -> (i32, i32) {
    %c0_i32 = arith.constant 0 : i32
    %c0_i32_0 = arith.constant 0 : i32
    %c0_i32_1 = arith.constant 0 : i32
    return %c0_i32, %c0_i32_0 : i32, i32
  }
  func.func @transform_8(%arg0: i32) -> (i32, i32) {
    %c0_i32 = arith.constant 0 : i32
    %c0_i32_0 = arith.constant 0 : i32
    %c0_i32_1 = arith.constant 0 : i32
    return %c0_i32, %c0_i32_0 : i32, i32
  }
  func.func @transform_9(%arg0: i32) -> (i32, i32) {
    %c0_i32 = arith.constant 0 : i32
    %c0_i32_0 = arith.constant 0 : i32
    %c0_i32_1 = arith.constant 0 : i32
    return %c0_i32, %c0_i32_0 : i32, i32
  }
  func.func @transform_10(%arg0: i32) -> (i32, i32) {
    %c0_i32 = arith.constant 0 : i32
    %c0_i32_0 = arith.constant 0 : i32
    %c0_i32_1 = arith.constant 0 : i32
    return %c0_i32, %c0_i32_0 : i32, i32
  }
  func.func @transform_11(%arg0: i32) -> (i32, i32) {
    %c0_i32 = arith.constant 0 : i32
    %c0_i32_0 = arith.constant 0 : i32
    %c0_i32_1 = arith.constant 0 : i32
    return %c0_i32, %c0_i32_0 : i32, i32
  }
  func.func @transform_12(%arg0: i32) -> (i32, i32) {
    %c0_i32 = arith.constant 0 : i32
    %c0_i32_0 = arith.constant 0 : i32
    %c0_i32_1 = arith.constant 0 : i32
    return %c0_i32, %c0_i32_0 : i32, i32
  }
  func.func @transform_13(%arg0: i32) -> (i32, i32) {
    %c0_i32 = arith.constant 0 : i32
    %c0_i32_0 = arith.constant 0 : i32
    %c0_i32_1 = arith.constant 0 : i32
    return %c0_i32, %c0_i32_0 : i32, i32
  }
  func.func @transform_14(%arg0: i32) -> (i32, i32) {
    %c0_i32 = arith.constant 0 : i32
    %c0_i32_0 = arith.constant 0 : i32
    %c0_i32_1 = arith.constant 0 : i32
    return %c0_i32, %c0_i32_0 : i32, i32
  }
  func.func @transform_15(%arg0: i32) -> (i32, i32) {
    %c0_i32 = arith.constant 0 : i32
    %c0_i32_0 = arith.constant 0 : i32
    %c0_i32_1 = arith.constant 0 : i32
    return %c0_i32, %c0_i32_0 : i32, i32
  }
  func.func @transform_16(%arg0: i32) -> (i32, i32) {
    %c0_i32 = arith.constant 0 : i32
    %c0_i32_0 = arith.constant 0 : i32
    %c0_i32_1 = arith.constant 0 : i32
    return %c0_i32, %c0_i32_0 : i32, i32
  }
  func.func @transform_17(%arg0: i32) -> (i32, i32) {
    %c0_i32 = arith.constant 0 : i32
    %c0_i32_0 = arith.constant 0 : i32
    %c0_i32_1 = arith.constant 0 : i32
    return %c0_i32, %c0_i32_0 : i32, i32
  }
  func.func @transform_18(%arg0: i32) -> (i32, i32) {
    %c0_i32 = arith.constant 0 : i32
    %c0_i32_0 = arith.constant 0 : i32
    %c0_i32_1 = arith.constant 0 : i32
    return %c0_i32, %c0_i32_0 : i32, i32
  }
  func.func @transform_19(%arg0: i32) -> (i32, i32) {
    %c0_i32 = arith.constant 0 : i32
    %c0_i32_0 = arith.constant 0 : i32
    %c0_i32_1 = arith.constant 0 : i32
    return %c0_i32, %c0_i32_0 : i32, i32
  }
  func.func @transform_20(%arg0: i32) -> (i32, i32) {
    %c0_i32 = arith.constant 0 : i32
    %c0_i32_0 = arith.constant 0 : i32
    %c0_i32_1 = arith.constant 0 : i32
    return %c0_i32, %c0_i32_0 : i32, i32
  }
  func.func @transform_21(%arg0: i32) -> (i32, i32) {
    %c0_i32 = arith.constant 0 : i32
    %c0_i32_0 = arith.constant 0 : i32
    %c0_i32_1 = arith.constant 0 : i32
    return %c0_i32, %c0_i32_0 : i32, i32
  }
  func.func @transform_22(%arg0: i32) -> (i32, i32) {
    %c0_i32 = arith.constant 0 : i32
    %c0_i32_0 = arith.constant 0 : i32
    %c0_i32_1 = arith.constant 0 : i32
    return %c0_i32, %c0_i32_0 : i32, i32
  }
  func.func @transform_23(%arg0: i32) -> (i32, i32) {
    %c0_i32 = arith.constant 0 : i32
    %c0_i32_0 = arith.constant 0 : i32
    %c0_i32_1 = arith.constant 0 : i32
    return %c0_i32, %c0_i32_0 : i32, i32
  }
  func.func @transform_24(%arg0: i32) -> (i32, i32) {
    %c0_i32 = arith.constant 0 : i32
    %c0_i32_0 = arith.constant 0 : i32
    %c0_i32_1 = arith.constant 0 : i32
    return %c0_i32, %c0_i32_0 : i32, i32
  }
  func.func @transform_25(%arg0: i32) -> (i32, i32) {
    %c0_i32 = arith.constant 0 : i32
    %c0_i32_0 = arith.constant 0 : i32
    %c0_i32_1 = arith.constant 0 : i32
    return %c0_i32, %c0_i32_0 : i32, i32
  }
  func.func @transform_26(%arg0: i32) -> (i32, i32) {
    %c0_i32 = arith.constant 0 : i32
    %c0_i32_0 = arith.constant 0 : i32
    %c0_i32_1 = arith.constant 0 : i32
    return %c0_i32, %c0_i32_0 : i32, i32
  }
  func.func @transform_27(%arg0: i32) -> (i32, i32) {
    %c0_i32 = arith.constant 0 : i32
    %c0_i32_0 = arith.constant 0 : i32
    %c0_i32_1 = arith.constant 0 : i32
    return %c0_i32, %c0_i32_0 : i32, i32
  }
  func.func @transform_28(%arg0: i32) -> (i32, i32) {
    %c0_i32 = arith.constant 0 : i32
    %c0_i32_0 = arith.constant 0 : i32
    %c0_i32_1 = arith.constant 0 : i32
    return %c0_i32, %c0_i32_0 : i32, i32
  }
  func.func @transform_29(%arg0: i32) -> (i32, i32) {
    %c0_i32 = arith.constant 0 : i32
    %c0_i32_0 = arith.constant 0 : i32
    %c0_i32_1 = arith.constant 0 : i32
    return %c0_i32, %c0_i32_0 : i32, i32
  }
  func.func @transform_30(%arg0: i32) -> (i32, i32) {
    %c0_i32 = arith.constant 0 : i32
    %c0_i32_0 = arith.constant 0 : i32
    %c0_i32_1 = arith.constant 0 : i32
    return %c0_i32, %c0_i32_0 : i32, i32
  }
  func.func @transform_31(%arg0: i32) -> (i32, i32) {
    %c0_i32 = arith.constant 0 : i32
    %c0_i32_0 = arith.constant 0 : i32
    %c0_i32_1 = arith.constant 0 : i32
    return %c0_i32, %c0_i32_0 : i32, i32
  }
  func.func @transform_32(%arg0: i32) -> (i32, i32) {
    %c0_i32 = arith.constant 0 : i32
    %c0_i32_0 = arith.constant 0 : i32
    return %arg0, %c0_i32 : i32, i32
  }
}

</mosaic_0001>

<bundles_post_ra>
// kernel: tpu_custom_call.1
= control target key start
LH: loop header
LB: loop body
LE: loop exit
PB: predicated region body
PF: predicated region fallthrough
CT: control target
= control target key end

     0   :  { %s5132_s6 = smov 1   ;;  %s5133_s10 = smov 2   ;;  %s6501_s0 = inlined_call_operand.smem [shape: u32[33], index: -1, kind: input, shape index: {}] }
   0x1   :  { %s5209_s5 = sld [smem:[%s6501_s0]]   ;;  %s5134_s14 = smov 3  }
   0x2   :  { %s5214_s9 = sld [smem:[%s6501_s0 + %s5132_s6]]   ;;  %s5135_s18 = smov 4  }
   0x3   :  { %s5219_s13 = sld [smem:[%s6501_s0 + %s5133_s10]]   ;;  %s5136_s22 = smov 5  }
   0x4   :  { %s5224_s17 = sld [smem:[%s6501_s0 + %s5134_s14]]   ;;  %s5137_s26 = smov 6  }
   0x5   :  { %s5229_s21 = sld [smem:[%s6501_s0 + %s5135_s18]]   ;;  %s5138_s30 = smov 7  }
   0x6   :  { %s5234_s25 = sld [smem:[%s6501_s0 + %s5136_s22]]   ;;  %s5139_s4 = smov 8  }
   0x7   :  { %s5239_s29 = sld [smem:[%s6501_s0 + %s5137_s26]]   ;;  %s5140_s10 = smov 9  }
   0x8   :  { %s5244_s3 = sld [smem:[%s6501_s0 + %s5138_s30]]   ;;  %s5141_s15 = smov 10  }
   0x9   :  { %s5249_s8 = sld [smem:[%s6501_s0 + %s5139_s4]]   ;;  %s5142_s20 = smov 11  }
   0xa   :  { %s5254_s14 = sld [smem:[%s6501_s0 + %s5140_s10]]   ;;  %s5143_s26 = smov 12  }
   0xb   :  { %s5259_s19 = sld [smem:[%s6501_s0 + %s5141_s15]]   ;;  %s5144_s1 = smov 13  }
   0xc   :  { %s5264_s24 = sld [smem:[%s6501_s0 + %s5142_s20]]   ;;  %s5145_s7 = smov 14  }
   0xd   :  { %6511 = sst [smem:[#allocation52_spill]] %s5239_s29  ;;  %s5146_s15 = smov 15  }
   0xe   :  { %s5269_s30 = sld [smem:[%s6501_s0 + %s5143_s26]]   ;;  %s5147_s22 = smov 16  }
   0xf   :  { %6512 = sst [smem:[#allocation53_spill]] %s5249_s8  ;;  %s5148_s28 = smov 17  }
  0x10   :  { %s5274_s6 = sld [smem:[%s6501_s0 + %s5144_s1]]  }
  0x11   :  { %6513 = sst [smem:[#allocation54_spill]] %s5259_s19 }
  0x12   :  { %s5279_s12 = sld [smem:[%s6501_s0 + %s5145_s7]]   ;;  %s5149_s7 = smov 18  }
  0x13   :  { %s5284_s20 = sld [smem:[%s6501_s0 + %s5146_s15]]   ;;  %s5150_s15 = smov 19  }
  0x14   :  { %6514 = sst [smem:[#allocation55_spill]] %s5269_s30 }
  0x15   :  { %s5289_s27 = sld [smem:[%s6501_s0 + %s5147_s22]]   ;;  %s5151_s22 = smov 20  }
  0x16   :  { %s5294_s4 = sld [smem:[%s6501_s0 + %s5148_s28]]   ;;  %s5152_s28 = smov 21  }
  0x17   :  { %s5304_s30 = sld [smem:[%s6501_s0 + %s5150_s15]]   ;;  %s5154_s15 = smov 23  }
  0x18   :  { %6515 = sst [smem:[#allocation56_spill]] %s5279_s12 }
  0x19   :  { %s5299_s12 = sld [smem:[%s6501_s0 + %s5149_s7]]   ;;  %s5153_s7 = smov 22  }
  0x1a   :  { %s5324_s19 = sld [smem:[%s6501_s0 + %s5154_s15]]   ;;  %s5158_s15 = smov 27  }
  0x1b   :  { %6516 = sst [smem:[#allocation57_spill]] %s5289_s27 }
  0x1c   :  { %6517 = sst [smem:[#allocation58_spill]] %s5294_s4 }
  0x1d   :  { %s5309_s27 = sld [smem:[%s6501_s0 + %s5151_s22]]   ;;  %s5155_s22 = smov 24  }
  0x1e   :  { %s5314_s4 = sld [smem:[%s6501_s0 + %s5152_s28]]   ;;  %s5156_s28 = smov 25  }
  0x1f   :  { %6518 = sst [smem:[#allocation59_spill]] %s5299_s12 }
  0x20   :  { %s5319_s12 = sld [smem:[%s6501_s0 + %s5153_s7]]   ;;  %s5157_s7 = smov 26  }
  0x21   :  { %6522 = sst [smem:[#allocation63_spill]] %s5324_s19 }
  0x22   :  { %s5344_s19 = sld [smem:[%s6501_s0 + %s5158_s15]]   ;;  %s5162_s15 = smov 31  }
  0x23   :  { %6519 = sst [smem:[#allocation60_spill]] %s5309_s27 }
  0x24   :  { %6520 = sst [smem:[#allocation61_spill]] %s5314_s4 }
  0x25   :  { %s5329_s27 = sld [smem:[%s6501_s0 + %s5155_s22]]   ;;  %s5159_s22 = smov 28  }
  0x26   :  { %6521 = sst [smem:[#allocation62_spill]] %s5319_s12 }
  0x27   :  { %s5334_s4 = sld [smem:[%s6501_s0 + %s5156_s28]]   ;;  %s5160_s28 = smov 29  }
  0x28   :  { %s5339_s12 = sld [smem:[%s6501_s0 + %s5157_s7]]   ;;  %s5161_s7 = smov 30  }
  0x29   :  { %6525 = sst [smem:[#allocation66_spill]] %s5344_s19 }
  0x2a   :  { %s5349_s8 = sld [smem:[%s6501_s0 + %s5159_s22]]   ;;  %s5163_s22 = smov 32  }
  0x2b   :  { %s5364_s19 = sld [smem:[%s6501_s0 + %s5162_s15]]  }
  0x2c   :  { %s5369_s29 = sld [smem:[%s6501_s0 + %s5163_s22]]  }
  0x2d   :  { %6523 = sst [smem:[#allocation64_spill]] %s5334_s4 }
  0x2e   :  { %6524 = sst [smem:[#allocation65_spill]] %s5339_s12 }
  0x2f   :  { %s5354_s4 = sld [smem:[%s6501_s0 + %s5160_s28]]  }
  0x30   :  { %s5359_s12 = sld [smem:[%s6501_s0 + %s5161_s7]]  }
  0x31   :  { %70 = vsyncpa [#allocation3], 0 }
  0x32   :  { %71 = vsyncpa [#allocation6], 0 }
  0x33   :  { %72 = vsyncpa [#allocation9], 0 }
  0x34   :  { %73 = vsyncpa [#allocation12], 0 }
  0x35   :  { %74 = vsyncpa [#allocation15], 0 }
  0x36   :  { %75 = vsyncpa [#allocation18], 0 }
  0x37   :  { %76 = vsyncpa [#allocation21], 0 }
  0x38   :  { %77 = vsyncpa [#allocation24], 0 }
  0x39   :  { %78 = vsyncpa [#allocation27], 0 }
  0x3a   :  { %79 = vsyncpa [#allocation30], 0 }
  0x3b   :  { %80 = vsyncpa [#allocation33], 0 }
  0x3c   :  { %81 = vsyncpa [#allocation36], 0 }
  0x3d   :  { %82 = vsyncpa [#allocation4], 0  ;;  %s100_s28 = sshll.u32 %s5214_s9, 4  ;;  %s5164_s0 = smov [#allocation5]   ;;  %s101_s28 = int_to_ptr.hbm [resolvable:$true] %s100_s28 }
  0x3e   :  { %s102_s1 = sshll.u32 %s5164_s0, 4  ;;  %s125_s2 = sshll.u32 %s5224_s17, 4  ;;  %s103_s1 = int_to_ptr.vmem [resolvable:$true] %s102_s1  ;;  %s126_s2 = int_to_ptr.hbm [resolvable:$true] %s125_s2 }
  0x3f   :  { %s4530_s7 = sshra.s32 %s101_s28, 4  ;;  %s4534_s11 = scalar_lea.hbm %s5214_s9, 16  ;;  %s4531_s7 = int_to_ptr.hbm [resolvable:$true] %s4530_s7 }
  0x40   :  { %s4532_s10 = scalar_lea.hbm %s4531_s7, 16  ;;  %p4535_p1 = scmp.lt.s32.totalorder %s4531_s7, %s5214_s9 }
  0x41   :  { %p4533_p0 = scmp.ne.s32.totalorder %s4531_s7, %s4532_s10  ;;  %p4536_p2 = scmp.lt.s32.totalorder %s4534_s11, %s4532_s10 }
  0x43   :  { %p4537_p3 = por %p4536_p2, %p4535_p1 }
  0x45   :  { %p4538_p4 = pnand %p4537_p3, %p4533_p0 }
  0x47   :  { %4541 = shalt.err (!%p4538_p4)
}
  0x48   :  { %s5165_s15 = smov 128   ;;  %s5166_s16 = smov 8  }
  0x49   :  { %108 = dma.hbm_to_vmem [thread:$0]  %s101_s28, 256, %s103_s1, [#allocation6], %s5165_s15, %s5165_s15, %s5166_s16  }
  0x4a   :  { %s5167_s18 = smov [#allocation8]   ;;  %s149_s23 = sshll.u32 %s5234_s25, 4  ;;  %s150_s23 = int_to_ptr.hbm [resolvable:$true] %s149_s23 }
  0x4b   :  { %s127_s22 = sshll.u32 %s5167_s18, 4  ;;  %s4554_s9 = sshra.s32 %s126_s2, 4  ;;  %s128_s22 = int_to_ptr.vmem [resolvable:$true] %s127_s22  ;;  %s4555_s9 = int_to_ptr.hbm [resolvable:$true] %s4554_s9 }
  0x4c   :  { %s4556_s26 = scalar_lea.hbm %s4555_s9, 1  ;;  %s4558_s0 = scalar_lea.hbm %s5224_s17, 1 }
  0x4d   :  { %p4557_p5 = scmp.ne.s32.totalorder %s4555_s9, %s4556_s26  ;;  %p4559_p6 = scmp.lt.s32.totalorder %s4555_s9, %s5224_s17 }
  0x4e   :  { %p4560_p7 = scmp.lt.s32.totalorder %s4558_s0, %s4556_s26 }
  0x50   :  { %p4561_p8 = por %p4560_p7, %p4559_p6 }
  0x52   :  { %p4562_p9 = pnand %p4561_p8, %p4557_p5 }
  0x54   :  { %4565 = shalt.err (!%p4562_p9)
}
  0x55   :  { %130 = dma.hbm_to_vmem [thread:$0]  %s126_s2, 16, %s128_s22, [#allocation9]  }
  0x56   :  { %s171_s28 = sshll.u32 %s5244_s3, 4  ;;  %s5168_s1 = smov [#allocation11]   ;;  %s172_s28 = int_to_ptr.hbm [resolvable:$true] %s171_s28 }
  0x57   :  { %s151_s7 = sshll.u32 %s5168_s1, 4  ;;  %s4578_s10 = sshra.s32 %s150_s23, 4  ;;  %s152_s7 = int_to_ptr.vmem [resolvable:$true] %s151_s7  ;;  %s4579_s10 = int_to_ptr.hbm [resolvable:$true] %s4578_s10 }
  0x58   :  { %s4580_s11 = scalar_lea.hbm %s4579_s10, 1  ;;  %s4582_s18 = scalar_lea.hbm %s5234_s25, 1 }
  0x59   :  { %p4581_p10 = scmp.ne.s32.totalorder %s4579_s10, %s4580_s11  ;;  %p4583_p11 = scmp.lt.s32.totalorder %s4579_s10, %s5234_s25 }
  0x5a   :  { %p4584_p12 = scmp.lt.s32.totalorder %s4582_s18, %s4580_s11 }
  0x5c   :  { %p4585_p13 = por %p4584_p12, %p4583_p11 }
  0x5e   :  { %p4586_p0 = pnand %p4585_p13, %p4581_p10 }
  0x60   :  { %4589 = shalt.err (!%p4586_p0)
}
  0x61   :  { %154 = dma.hbm_to_vmem [thread:$0]  %s150_s23, 16, %s152_s7, [#allocation12]  }
  0x62   :  { %s5169_s17 = smov [#allocation14]   ;;  %s195_s22 = sshll.u32 %s5254_s14, 4  ;;  %s196_s22 = int_to_ptr.hbm [resolvable:$true] %s195_s22 }
  0x63   :  { %s173_s2 = sshll.u32 %s5169_s17, 4  ;;  %s4602_s9 = sshra.s32 %s172_s28, 4  ;;  %s174_s2 = int_to_ptr.vmem [resolvable:$true] %s173_s2  ;;  %s4603_s9 = int_to_ptr.hbm [resolvable:$true] %s4602_s9 }
  0x64   :  { %s4604_s26 = scalar_lea.hbm %s4603_s9, 1  ;;  %s4606_s0 = scalar_lea.hbm %s5244_s3, 1 }
  0x65   :  { %p4605_p1 = scmp.ne.s32.totalorder %s4603_s9, %s4604_s26  ;;  %p4607_p2 = scmp.lt.s32.totalorder %s4603_s9, %s5244_s3 }
  0x66   :  { %p4608_p3 = scmp.lt.s32.totalorder %s4606_s0, %s4604_s26 }
  0x68   :  { %p4609_p4 = por %p4608_p3, %p4607_p2 }
  0x6a   :  { %p4610_p5 = pnand %p4609_p4, %p4605_p1 }
  0x6c   :  { %4613 = shalt.err (!%p4610_p5)
}
  0x6d   :  { %176 = dma.hbm_to_vmem [thread:$0]  %s172_s28, 16, %s174_s2, [#allocation15]  }
  0x6e   :  { %s219_s25 = sshll.u32 %s5264_s24, 4  ;;  %s5170_s23 = smov [#allocation17]   ;;  %s220_s25 = int_to_ptr.hbm [resolvable:$true] %s219_s25 }
  0x6f   :  { %s197_s1 = sshll.u32 %s5170_s23, 4  ;;  %s4626_s7 = sshra.s32 %s196_s22, 4  ;;  %s198_s1 = int_to_ptr.vmem [resolvable:$true] %s197_s1  ;;  %s4627_s7 = int_to_ptr.hbm [resolvable:$true] %s4626_s7 }
  0x70   :  { %s4628_s10 = scalar_lea.hbm %s4627_s7, 1  ;;  %s4630_s11 = scalar_lea.hbm %s5254_s14, 1 }
  0x71   :  { %p4629_p6 = scmp.ne.s32.totalorder %s4627_s7, %s4628_s10  ;;  %p4631_p7 = scmp.lt.s32.totalorder %s4627_s7, %s5254_s14 }
  0x72   :  { %p4632_p8 = scmp.lt.s32.totalorder %s4630_s11, %s4628_s10 }
  0x74   :  { %p4633_p9 = por %p4632_p8, %p4631_p7 }
  0x76   :  { %p4634_p10 = pnand %p4633_p9, %p4629_p6 }
  0x78   :  { %4637 = shalt.err (!%p4634_p10)
}
  0x79   :  { %200 = dma.hbm_to_vmem [thread:$0]  %s196_s22, 16, %s198_s1, [#allocation18]  }
  0x7a   :  { %s5171_s3 = smov [#allocation20]   ;;  %s4650_s18 = sshra.s32 %s220_s25, 4  ;;  %s4651_s18 = int_to_ptr.hbm [resolvable:$true] %s4650_s18 }
  0x7b   :  { %s221_s28 = sshll.u32 %s5171_s3, 4  ;;  %s4652_s17 = scalar_lea.hbm %s4651_s18, 1  ;;  %s222_s28 = int_to_ptr.vmem [resolvable:$true] %s221_s28 }
  0x7c   :  { %p4653_p11 = scmp.ne.s32.totalorder %s4651_s18, %s4652_s17  ;;  %s4654_s2 = scalar_lea.hbm %s5264_s24, 1 }
  0x7d   :  { %p4655_p12 = scmp.lt.s32.totalorder %s4651_s18, %s5264_s24  ;;  %p4656_p13 = scmp.lt.s32.totalorder %s4654_s2, %s4652_s17 }
  0x7f   :  { %p4657_p0 = por %p4656_p13, %p4655_p12 }
  0x81   :  { %p4658_p1 = pnand %p4657_p0, %p4653_p11 }
  0x83   :  { %4661 = shalt.err (!%p4658_p1)
}
  0x84   :  { %224 = dma.hbm_to_vmem [thread:$0]  %s220_s25, 16, %s222_s28, [#allocation21]  }
  0x85   :  { %s242_s14 = sshll.u32 %s5274_s6, 4  ;;  %s5172_s22 = smov [#allocation23]   ;;  %s243_s14 = int_to_ptr.hbm [resolvable:$true] %s242_s14 }
  0x86   :  { %s244_s9 = sshll.u32 %s5172_s22, 4  ;;  %s266_s26 = sshll.u32 %s5284_s20, 4  ;;  %s245_s9 = int_to_ptr.vmem [resolvable:$true] %s244_s9  ;;  %s267_s26 = int_to_ptr.hbm [resolvable:$true] %s266_s26 }
  0x87   :  { %s4674_s0 = sshra.s32 %s243_s14, 4  ;;  %s4678_s24 = scalar_lea.hbm %s5274_s6, 16  ;;  %s4675_s0 = int_to_ptr.hbm [resolvable:$true] %s4674_s0 }
  0x88   :  { %s4676_s23 = scalar_lea.hbm %s4675_s0, 16  ;;  %p4679_p3 = scmp.lt.s32.totalorder %s4675_s0, %s5274_s6 }
  0x89   :  { %p4677_p2 = scmp.ne.s32.totalorder %s4675_s0, %s4676_s23  ;;  %p4680_p4 = scmp.lt.s32.totalorder %s4678_s24, %s4676_s23 }
  0x8b   :  { %p4681_p5 = por %p4680_p4, %p4679_p3 }
  0x8d   :  { %p4682_p6 = pnand %p4681_p5, %p4677_p2 }
  0x8f   :  { %4685 = shalt.err (!%p4682_p6)
}
  0x90   :  { %s5173_s25 = smov 64   ;;  %s5174_s1 = smov 4  }
  0x91   :  { %250 = dma.hbm_to_vmem [thread:$0]  %s243_s14, 256, %s245_s9, [#allocation24], %s5173_s25, %s5173_s25, %s5174_s1  }
  0x92   :  { %s5175_s7 = smov [#allocation26]   ;;  %s294_s11 = sshll.u32 %s5304_s30, 4  ;;  %s5400_s11 = int_to_ptr.hbm [resolvable:$true] %s294_s11 }
  0x93   :  { %s268_s10 = sshll.u32 %s5175_s7, 4  ;;  %s4698_s6 = sshra.s32 %s267_s26, 4  ;;  %s269_s10 = int_to_ptr.vmem [resolvable:$true] %s268_s10  ;;  %s4699_s6 = int_to_ptr.hbm [resolvable:$true] %s4698_s6 }
  0x94   :  { %s4700_s3 = scalar_lea.hbm %s4699_s6, 16  ;;  %s4702_s28 = scalar_lea.hbm %s5284_s20, 16 }
  0x95   :  { %p4701_p7 = scmp.ne.s32.totalorder %s4699_s6, %s4700_s3  ;;  %p4703_p8 = scmp.lt.s32.totalorder %s4699_s6, %s5284_s20 }
  0x96   :  { %p4704_p9 = scmp.lt.s32.totalorder %s4702_s28, %s4700_s3 }
  0x98   :  { %p4705_p10 = por %p4704_p9, %p4703_p8 }
  0x9a   :  { %p4706_p11 = pnand %p4705_p10, %p4701_p7 }
  0x9c   :  { %4709 = shalt.err (!%p4706_p11)
}
  0x9d   :  { %274 = dma.hbm_to_vmem [thread:$0]  %s267_s26, 256, %s269_s10, [#allocation27], %s5173_s25, %s5173_s25, %s5174_s1  }
  0x9e   :  { %s326_s18 = sshll.u32 %s5329_s27, 4  ;;  %s5176_s17 = smov [#allocation29]   ;;  %s5408_s18 = int_to_ptr.hbm [resolvable:$true] %s326_s18 }
  0x9f   :  { %s296_s2 = sshll.u32 %s5176_s17, 4  ;;  %s4722_s14 = sshra.s32 %s5400_s11, 4  ;;  %s297_s2 = int_to_ptr.vmem [resolvable:$true] %s296_s2  ;;  %s4723_s14 = int_to_ptr.hbm [resolvable:$true] %s4722_s14 }
  0xa0   :  { %s4724_s20 = scalar_lea.hbm %s4723_s14, 16  ;;  %s4726_s22 = scalar_lea.hbm %s5304_s30, 16 }
  0xa1   :  { %p4725_p12 = scmp.ne.s32.totalorder %s4723_s14, %s4724_s20  ;;  %p4727_p13 = scmp.lt.s32.totalorder %s4723_s14, %s5304_s30 }
  0xa2   :  { %p4728_p0 = scmp.lt.s32.totalorder %s4726_s22, %s4724_s20 }
  0xa4   :  { %p4729_p1 = por %p4728_p0, %p4727_p13 }
  0xa6   :  { %p4730_p2 = pnand %p4729_p1, %p4725_p12 }
  0xa8   :  { %4733 = shalt.err (!%p4730_p2)
}
  0xa9   :  { %302 = dma.hbm_to_vmem [thread:$0]  %s5400_s11, 256, %s297_s2, [#allocation30], %s5173_s25, %s5173_s25, %s5174_s1  }
  0xaa   :  { %s5177_s9 = smov [#allocation32]   ;;  %s356_s0 = sshll.u32 %s5349_s8, 4  ;;  %s5418_s0 = int_to_ptr.hbm [resolvable:$true] %s356_s0 }
  0xab   :  { %s328_s26 = sshll.u32 %s5177_s9, 4  ;;  %s4746_s30 = sshra.s32 %s5408_s18, 4  ;;  %s329_s26 = int_to_ptr.vmem [resolvable:$true] %s328_s26  ;;  %s4747_s30 = int_to_ptr.hbm [resolvable:$true] %s4746_s30 }
  0xac   :  { %s4748_s23 = scalar_lea.hbm %s4747_s30, 16  ;;  %s4750_s24 = scalar_lea.hbm %s5329_s27, 16 }
  0xad   :  { %p4749_p3 = scmp.ne.s32.totalorder %s4747_s30, %s4748_s23  ;;  %p4751_p4 = scmp.lt.s32.totalorder %s4747_s30, %s5329_s27 }
  0xae   :  { %p4752_p5 = scmp.lt.s32.totalorder %s4750_s24, %s4748_s23 }
  0xb0   :  { %p4753_p6 = por %p4752_p5, %p4751_p4 }
  0xb2   :  { %p4754_p7 = pnand %p4753_p6, %p4749_p3 }
  0xb4   :  { %4757 = shalt.err (!%p4754_p7)
}
  0xb5   :  { %334 = dma.hbm_to_vmem [thread:$0]  %s5408_s18, 256, %s329_s26, [#allocation33], %s5173_s25, %s5173_s25, %s5174_s1  }
  0xb6   :  { %s87_s7 = sshll.u32 %s5209_s5, 4  ;;  %s5178_s10 = smov [#allocation35]   ;;  %s5428_s7 = int_to_ptr.hbm [resolvable:$true] %s87_s7 }
  0xb7   :  { %s358_s11 = sshll.u32 %s5178_s10, 4  ;;  %s4770_s27 = sshra.s32 %s5418_s0, 4  ;;  %s359_s11 = int_to_ptr.vmem [resolvable:$true] %s358_s11  ;;  %s4771_s27 = int_to_ptr.hbm [resolvable:$true] %s4770_s27 }
  0xb8   :  { %s4772_s6 = scalar_lea.hbm %s4771_s27, 16  ;;  %s4774_s3 = scalar_lea.hbm %s5349_s8, 16 }
  0xb9   :  { %p4773_p8 = scmp.ne.s32.totalorder %s4771_s27, %s4772_s6  ;;  %p4775_p9 = scmp.lt.s32.totalorder %s4771_s27, %s5349_s8 }
  0xba   :  { %p4776_p10 = scmp.lt.s32.totalorder %s4774_s3, %s4772_s6 }
  0xbc   :  { %p4777_p11 = por %p4776_p10, %p4775_p9 }
  0xbe   :  { %p4778_p12 = pnand %p4777_p11, %p4773_p8 }
  0xc0   :  { %4781 = shalt.err (!%p4778_p12)
}
  0xc1   :  { %364 = dma.hbm_to_vmem [thread:$0]  %s5418_s0, 256, %s359_s11, [#allocation36], %s5173_s25, %s5173_s25, %s5174_s1  }
  0xc2   :  { %s5179_s28 = smov [#allocation2]   ;;  %s114_s17 = sshll.u32 %s5219_s13, 4  ;;  %s115_s17 = int_to_ptr.hbm [resolvable:$true] %s114_s17 }
  0xc3   :  { %s89_s18 = sshll.u32 %s5179_s28, 4  ;;  %s4794_s2 = sshra.s32 %s5428_s7, 4  ;;  %s90_s18 = int_to_ptr.vmem [resolvable:$true] %s89_s18  ;;  %s4795_s2 = int_to_ptr.hbm [resolvable:$true] %s4794_s2 }
  0xc4   :  { %s4796_s8 = scalar_lea.hbm %s4795_s2, 16  ;;  %s4798_s14 = scalar_lea.hbm %s5209_s5, 16 }
  0xc5   :  { %p4797_p13 = scmp.ne.s32.totalorder %s4795_s2, %s4796_s8  ;;  %p4799_p0 = scmp.lt.s32.totalorder %s4795_s2, %s5209_s5 }
  0xc6   :  { %p4800_p1 = scmp.lt.s32.totalorder %s4798_s14, %s4796_s8 }
  0xc8   :  { %p4801_p2 = por %p4800_p1, %p4799_p0 }
  0xca   :  { %p4802_p3 = pnand %p4801_p2, %p4797_p13 }
  0xcc   :  { %4805 = shalt.err (!%p4802_p3)
}
  0xcd   :  { %95 = dma.hbm_to_vmem [thread:$0]  %s5428_s7, 256, %s90_s18, [#allocation3], %s5165_s15, %s5165_s15, %s5166_s16  }
  0xce   :  { %s135_s20 = sshll.u32 %s5229_s21, 4  ;;  %s5180_s22 = smov [#allocation7]   ;;  %s5446_s20 = int_to_ptr.hbm [resolvable:$true] %s135_s20 }
  0xcf   :  { %s116_s9 = sshll.u32 %s5180_s22, 4  ;;  %s4818_s26 = sshra.s32 %s115_s17, 4  ;;  %s117_s9 = int_to_ptr.vmem [resolvable:$true] %s116_s9  ;;  %s4819_s26 = int_to_ptr.hbm [resolvable:$true] %s4818_s26 }
  0xd0   :  { %s4820_s5 = scalar_lea.hbm %s4819_s26, 4  ;;  %s4822_s0 = scalar_lea.hbm %s5219_s13, 4 }
  0xd1   :  { %p4821_p4 = scmp.ne.s32.totalorder %s4819_s26, %s4820_s5  ;;  %p4823_p5 = scmp.lt.s32.totalorder %s4819_s26, %s5219_s13 }
  0xd2   :  { %p4824_p6 = scmp.lt.s32.totalorder %s4822_s0, %s4820_s5 }
  0xd4   :  { %p4825_p7 = por %p4824_p6, %p4823_p5 }
  0xd6   :  { %p4826_p8 = pnand %p4825_p7, %p4821_p4 }
  0xd8   :  { %4829 = shalt.err (!%p4826_p8)
}
  0xd9   :  { %119 = dma.hbm_to_vmem [thread:$0]  %s115_s17, 64, %s117_s9, [#allocation6]  }
  0xda   :  { %s6526_s30 = sld [smem:[#allocation52_spill]]  ;;  %s5181_s23 = smov [#allocation10]  }
  0xdb   :  { %s137_s24 = sshll.u32 %s5181_s23, 4  ;;  %s4842_s10 = sshra.s32 %s5446_s20, 4  ;;  %s138_s24 = int_to_ptr.vmem [resolvable:$true] %s137_s24  ;;  %s4843_s10 = int_to_ptr.hbm [resolvable:$true] %s4842_s10 }
  0xdc   :  { %s4844_s11 = scalar_lea.hbm %s4843_s10, 16  ;;  %s4846_s27 = scalar_lea.hbm %s5229_s21, 16 }
  0xdd   :  { %p4845_p9 = scmp.ne.s32.totalorder %s4843_s10, %s4844_s11  ;;  %p4847_p10 = scmp.lt.s32.totalorder %s4843_s10, %s5229_s21 }
  0xde   :  { %p4848_p11 = scmp.lt.s32.totalorder %s4846_s27, %s4844_s11 }
  0xe0   :  { %s160_s7 = sshll.u32 %s6526_s30, 4  ;;  %p4849_p12 = por %p4848_p11, %p4847_p10  ;;  %s161_s7 = int_to_ptr.hbm [resolvable:$true] %s160_s7 }
  0xe2   :  { %p4850_p13 = pnand %p4849_p12, %p4845_p9 }
  0xe4   :  { %4853 = shalt.err (!%p4850_p13)
}
  0xe5   :  { %s6527_s13 = sld [smem:[#allocation53_spill]]  ;;  %s5182_s3 = smov [#allocation13]  }
  0xe6   :  { %143 = dma.hbm_to_vmem [thread:$0]  %s5446_s20, 256, %s138_s24, [#allocation9], %s5173_s25, %s5173_s25, %s5174_s1  }
  0xe7   :  { %s162_s28 = sshll.u32 %s5182_s3, 4  ;;  %s4866_s18 = sshra.s32 %s161_s7, 4  ;;  %s163_s28 = int_to_ptr.vmem [resolvable:$true] %s162_s28  ;;  %s4867_s18 = int_to_ptr.hbm [resolvable:$true] %s4866_s18 }
  0xe8   :  { %s4868_s21 = scalar_lea.hbm %s4867_s18, 4  ;;  %s4870_s17 = scalar_lea.hbm %s6526_s30, 4 }
  0xe9   :  { %p4869_p0 = scmp.ne.s32.totalorder %s4867_s18, %s4868_s21  ;;  %p4871_p1 = scmp.lt.s32.totalorder %s4867_s18, %s6526_s30 }
  0xea   :  { %p4872_p2 = scmp.lt.s32.totalorder %s4870_s17, %s4868_s21 }
  0xeb   :  { %s181_s6 = sshll.u32 %s6527_s13, 4  ;;  %s5459_s6 = int_to_ptr.hbm [resolvable:$true] %s181_s6 }
  0xec   :  { %p4873_p3 = por %p4872_p2, %p4871_p1 }
  0xee   :  { %p4874_p4 = pnand %p4873_p3, %p4869_p0 }
  0xf0   :  { %4877 = shalt.err (!%p4874_p4)
}
  0xf1   :  { %165 = dma.hbm_to_vmem [thread:$0]  %s161_s7, 64, %s163_s28, [#allocation12]  }
  0xf2   :  { %s6528_s2 = sld [smem:[#allocation54_spill]]  ;;  %s5183_s8 = smov [#allocation16]  }
  0xf3   :  { %s183_s14 = sshll.u32 %s5183_s8, 4  ;;  %s4890_s22 = sshra.s32 %s5459_s6, 4  ;;  %s184_s14 = int_to_ptr.vmem [resolvable:$true] %s183_s14  ;;  %s4891_s22 = int_to_ptr.hbm [resolvable:$true] %s4890_s22 }
  0xf4   :  { %s4892_s9 = scalar_lea.hbm %s4891_s22, 16  ;;  %s4894_s26 = scalar_lea.hbm %s6527_s13, 16 }
  0xf5   :  { %p4893_p5 = scmp.ne.s32.totalorder %s4891_s22, %s4892_s9  ;;  %p4895_p6 = scmp.lt.s32.totalorder %s4891_s22, %s6527_s13 }
  0xf6   :  { %p4896_p7 = scmp.lt.s32.totalorder %s4894_s26, %s4892_s9 }
  0xf8   :  { %s205_s20 = sshll.u32 %s6528_s2, 4  ;;  %p4897_p8 = por %p4896_p7, %p4895_p6  ;;  %s5464_s20 = int_to_ptr.hbm [resolvable:$true] %s205_s20 }
  0xfa   :  { %p4898_p9 = pnand %p4897_p8, %p4893_p5 }
  0xfc   :  { %4901 = shalt.err (!%p4898_p9)
}
  0xfd   :  { %s6529_s5 = sld [smem:[#allocation55_spill]]  ;;  %s5184_s30 = smov [#allocation19]  }
  0xfe   :  { %189 = dma.hbm_to_vmem [thread:$0]  %s5459_s6, 256, %s184_s14, [#allocation15], %s5173_s25, %s5173_s25, %s5174_s1  }
  0xff   :  { %s207_s23 = sshll.u32 %s5184_s30, 4  ;;  %s4914_s24 = sshra.s32 %s5464_s20, 4  ;;  %s208_s23 = int_to_ptr.vmem [resolvable:$true] %s207_s23  ;;  %s4915_s24 = int_to_ptr.hbm [resolvable:$true] %s4914_s24 }
 0x100   :  { %s4916_s7 = scalar_lea.hbm %s4915_s24, 16  ;;  %s4918_s10 = scalar_lea.hbm %s6528_s2, 16 }
 0x101   :  { %p4917_p10 = scmp.ne.s32.totalorder %s4915_s24, %s4916_s7  ;;  %p4919_p11 = scmp.lt.s32.totalorder %s4915_s24, %s6528_s2 }
 0x102   :  { %p4920_p12 = scmp.lt.s32.totalorder %s4918_s10, %s4916_s7 }
 0x103   :  { %s229_s0 = sshll.u32 %s6529_s5, 4  ;;  %s5474_s0 = int_to_ptr.hbm [resolvable:$true] %s229_s0 }
 0x104   :  { %p4921_p13 = por %p4920_p12, %p4919_p11 }
 0x106   :  { %p4922_p0 = pnand %p4921_p13, %p4917_p10 }
 0x108   :  { %4925 = shalt.err (!%p4922_p0)
}
 0x109   :  { %s6530_s11 = sld [smem:[#allocation56_spill]]  ;;  %s5185_s27 = smov [#allocation22]  }
 0x10a   :  { %213 = dma.hbm_to_vmem [thread:$0]  %s5464_s20, 256, %s208_s23, [#allocation18], %s5173_s25, %s5173_s25, %s5174_s1  }
 0x10b   :  { %s231_s13 = sshll.u32 %s5185_s27, 4  ;;  %s4938_s3 = sshra.s32 %s5474_s0, 4  ;;  %s232_s13 = int_to_ptr.vmem [resolvable:$true] %s231_s13  ;;  %s4939_s3 = int_to_ptr.hbm [resolvable:$true] %s4938_s3 }
 0x10c   :  { %s4940_s28 = scalar_lea.hbm %s4939_s3, 16  ;;  %s4942_s18 = scalar_lea.hbm %s6529_s5, 16 }
 0x10d   :  { %p4941_p1 = scmp.ne.s32.totalorder %s4939_s3, %s4940_s28  ;;  %p4943_p2 = scmp.lt.s32.totalorder %s4939_s3, %s6529_s5 }
 0x10e   :  { %p4944_p3 = scmp.lt.s32.totalorder %s4942_s18, %s4940_s28 }
 0x10f   :  { %s256_s6 = sshll.u32 %s6530_s11, 4  ;;  %s257_s6 = int_to_ptr.hbm [resolvable:$true] %s256_s6 }
 0x110   :  { %p4945_p4 = por %p4944_p3, %p4943_p2 }
 0x112   :  { %p4946_p5 = pnand %p4945_p4, %p4941_p1 }
 0x114   :  { %4949 = shalt.err (!%p4946_p5)
}
 0x115   :  { %s6531_s21 = sld [smem:[#allocation57_spill]]  ;;  %s5186_s2 = smov [#allocation25]  }
 0x116   :  { %237 = dma.hbm_to_vmem [thread:$0]  %s5474_s0, 256, %s232_s13, [#allocation21], %s5165_s15, %s5165_s15, %s5166_s16  }
 0x117   :  { %s258_s8 = sshll.u32 %s5186_s2, 4  ;;  %s4962_s14 = sshra.s32 %s257_s6, 4  ;;  %s259_s8 = int_to_ptr.vmem [resolvable:$true] %s258_s8  ;;  %s4963_s14 = int_to_ptr.hbm [resolvable:$true] %s4962_s14 }
 0x118   :  { %s4964_s20 = scalar_lea.hbm %s4963_s14, 1  ;;  %s4966_s22 = scalar_lea.hbm %s6530_s11, 1 }
 0x119   :  { %p4965_p6 = scmp.ne.s32.totalorder %s4963_s14, %s4964_s20  ;;  %p4967_p7 = scmp.lt.s32.totalorder %s4963_s14, %s6530_s11 }
 0x11a   :  { %p4968_p8 = scmp.lt.s32.totalorder %s4966_s22, %s4964_s20 }
 0x11b   :  { %s280_s17 = sshll.u32 %s6531_s21, 4  ;;  %s281_s17 = int_to_ptr.hbm [resolvable:$true] %s280_s17 }
 0x11c   :  { %p4969_p9 = por %p4968_p8, %p4967_p7 }
 0x11e   :  { %p4970_p10 = pnand %p4969_p9, %p4965_p6 }
 0x120   :  { %4973 = shalt.err (!%p4970_p10)
}
 0x121   :  { %261 = dma.hbm_to_vmem [thread:$0]  %s257_s6, 16, %s259_s8, [#allocation24]  }
 0x122   :  { %s6532_s9 = sld [smem:[#allocation61_spill]]  ;;  %s5187_s15 = smov [#allocation28]  }
 0x123   :  { %s282_s26 = sshll.u32 %s5187_s15, 4  ;;  %s4986_s0 = sshra.s32 %s281_s17, 4  ;;  %s283_s26 = int_to_ptr.vmem [resolvable:$true] %s282_s26  ;;  %s4987_s0 = int_to_ptr.hbm [resolvable:$true] %s4986_s0 }
 0x124   :  { %s4988_s30 = scalar_lea.hbm %s4987_s0, 1  ;;  %s4990_s23 = scalar_lea.hbm %s6531_s21, 1 }
 0x125   :  { %p4989_p11 = scmp.ne.s32.totalorder %s4987_s0, %s4988_s30  ;;  %p4991_p12 = scmp.lt.s32.totalorder %s4987_s0, %s6531_s21 }
 0x126   :  { %p4992_p13 = scmp.lt.s32.totalorder %s4990_s23, %s4988_s30 }
 0x128   :  { %s309_s5 = sshll.u32 %s6532_s9, 4  ;;  %p4993_p0 = por %p4992_p13, %p4991_p12  ;;  %s5495_s5 = int_to_ptr.hbm [resolvable:$true] %s309_s5 }
 0x12a   :  { %p4994_p1 = pnand %p4993_p0, %p4989_p11 }
 0x12c   :  { %4997 = shalt.err (!%p4994_p1)
}
 0x12d   :  { %285 = dma.hbm_to_vmem [thread:$0]  %s281_s17, 16, %s283_s26, [#allocation27]  }
 0x12e   :  { %s6533_s24 = sld [smem:[#allocation65_spill]]  ;;  %s5188_s10 = smov [#allocation31]  }
 0x12f   :  { %s311_s11 = sshll.u32 %s5188_s10, 4  ;;  %s5010_s27 = sshra.s32 %s5495_s5, 4  ;;  %s312_s11 = int_to_ptr.vmem [resolvable:$true] %s311_s11  ;;  %s5011_s27 = int_to_ptr.hbm [resolvable:$true] %s5010_s27 }
 0x130   :  { %s5012_s13 = scalar_lea.hbm %s5011_s27, 16  ;;  %s5014_s6 = scalar_lea.hbm %s6532_s9, 16 }
 0x131   :  { %p5013_p2 = scmp.ne.s32.totalorder %s5011_s27, %s5012_s13  ;;  %p5015_p3 = scmp.lt.s32.totalorder %s5011_s27, %s6532_s9 }
 0x132   :  { %p5016_p4 = scmp.lt.s32.totalorder %s5014_s6, %s5012_s13 }
 0x134   :  { %s341_s7 = sshll.u32 %s6533_s24, 4  ;;  %p5017_p5 = por %p5016_p4, %p5015_p3  ;;  %s5500_s7 = int_to_ptr.hbm [resolvable:$true] %s341_s7 }
 0x136   :  { %p5018_p6 = pnand %p5017_p5, %p5013_p2 }
 0x138   :  { %5021 = shalt.err (!%p5018_p6)
}
 0x139   :  { %317 = dma.hbm_to_vmem [thread:$0]  %s5495_s5, 256, %s312_s11, [#allocation30], %s5173_s25, %s5173_s25, %s5174_s1  }
 0x13a   :  { %s5189_s3 = smov [#allocation34]   ;;  %s371_s18 = sshll.u32 %s5359_s12, 4  ;;  %s372_s18 = int_to_ptr.hbm [resolvable:$true] %s371_s18 }
 0x13b   :  { %s343_s28 = sshll.u32 %s5189_s3, 4  ;;  %s5034_s21 = sshra.s32 %s5500_s7, 4  ;;  %s344_s28 = int_to_ptr.vmem [resolvable:$true] %s343_s28  ;;  %s5035_s21 = int_to_ptr.hbm [resolvable:$true] %s5034_s21 }
 0x13c   :  { %s5036_s17 = scalar_lea.hbm %s5035_s21, 16  ;;  %s5038_s2 = scalar_lea.hbm %s6533_s24, 16 }
 0x13d   :  { %p5037_p7 = scmp.ne.s32.totalorder %s5035_s21, %s5036_s17  ;;  %p5039_p8 = scmp.lt.s32.totalorder %s5035_s21, %s6533_s24 }
 0x13e   :  { %p5040_p9 = scmp.lt.s32.totalorder %s5038_s2, %s5036_s17 }
 0x140   :  { %p5041_p10 = por %p5040_p9, %p5039_p8 }
 0x142   :  { %p5042_p11 = pnand %p5041_p10, %p5037_p7 }
 0x144   :  { %5045 = shalt.err (!%p5042_p11)
}
 0x145   :  { %349 = dma.hbm_to_vmem [thread:$0]  %s5500_s7, 256, %s344_s28, [#allocation33], %s5173_s25, %s5173_s25, %s5174_s1  }
 0x146   :  { %s5190_s8 = smov [#allocation37]   ;;  %s5058_s20 = sshra.s32 %s372_s18, 4  ;;  %s5059_s20 = int_to_ptr.hbm [resolvable:$true] %s5058_s20 }
 0x147   :  { %s373_s14 = sshll.u32 %s5190_s8, 4  ;;  %s5060_s22 = scalar_lea.hbm %s5059_s20, 16  ;;  %s374_s14 = int_to_ptr.vmem [resolvable:$true] %s373_s14 }
 0x148   :  { %p5061_p12 = scmp.ne.s32.totalorder %s5059_s20, %s5060_s22  ;;  %s5062_s9 = scalar_lea.hbm %s5359_s12, 16 }
 0x149   :  { %p5063_p13 = scmp.lt.s32.totalorder %s5059_s20, %s5359_s12  ;;  %p5064_p0 = scmp.lt.s32.totalorder %s5062_s9, %s5060_s22 }
 0x14b   :  { %p5065_p1 = por %p5064_p0, %p5063_p13 }
 0x14d   :  { %p5066_p2 = pnand %p5065_p1, %p5061_p12 }
 0x14f   :  { %5069 = shalt.err (!%p5066_p2)
}
 0x150   :  { %379 = dma.hbm_to_vmem [thread:$0]  %s372_s18, 256, %s374_s14, [#allocation36], %s5173_s25, %s5173_s25, %s5174_s1  }
 0x151   :  { %5106 = dma.done.wait [#allocation3], 256  }
 0x152   :  { %5107 = vsyncadd [#allocation3], 4294967040 }
 0x153   :  { %5108 = dma.done.wait [#allocation6], 320  }
 0x154   :  { %5109 = vsyncadd [#allocation6], 4294966976 }
 0x155   :  { %5110 = dma.done.wait [#allocation9], 272  }
 0x156   :  { %5111 = vsyncadd [#allocation9], 4294967024 }
 0x157   :  { %5112 = dma.done.wait [#allocation12], 80  }
 0x158   :  { %5113 = vsyncadd [#allocation12], 4294967216 }
 0x159   :  { %5114 = dma.done.wait [#allocation15], 272  }
 0x15a   :  { %5115 = vsyncadd [#allocation15], 4294967024 }
 0x15b   :  { %5116 = dma.done.wait [#allocation18], 272  }
 0x15c   :  { %5117 = vsyncadd [#allocation18], 4294967024 }
 0x15d   :  { %5118 = dma.done.wait [#allocation21], 272  }
 0x15e   :  { %5119 = vsyncadd [#allocation21], 4294967024 }
 0x15f   :  { %5120 = dma.done.wait [#allocation24], 272  }
 0x160   :  { %5121 = vsyncadd [#allocation24], 4294967024 }
 0x161   :  { %5122 = dma.done.wait [#allocation27], 272  }
 0x162   :  { %5123 = vsyncadd [#allocation27], 4294967024 }
 0x163   :  { %5124 = dma.done.wait [#allocation30], 512  }
 0x164   :  { %5125 = vsyncadd [#allocation30], 4294966784 }
 0x165   :  { %5126 = dma.done.wait [#allocation33], 512  }
 0x166   :  { %5127 = vsyncadd [#allocation33], 4294966784 }
 0x167   :  { %5128 = dma.done.wait [#allocation36], 512  }
 0x168   :  { %5129 = vsyncadd [#allocation36], 4294966784  ;;  %vm487_vm0 = vcmask 1043456   ;;  %v478_v0 = vld [vmem:[#allocation7] sm:$0xf]  ;;  %v476_v2 = vld [vmem:[#allocation2 + $0x8] sm:$0xff] }
 0x169   :  { %v475_v1 = vld [vmem:[#allocation2] sm:$0xff]  ;;  %v489_v3 = vsel %vm487_vm0, %v478_v0, 0  ;;  %vm483_vm1 = vcmask 64512   ;;  %v5527_v6 = vld [vmem:[#allocation5] sm:$0xff]  ;;  %v5529_v7 = vld [vmem:[#allocation5 + $0x8] sm:$0xff]  ;;  %s5191_s12 = smov 96  }
 0x16a   :  { %v5523_v4 = vpack.c.bf16 %v476_v2, %v475_v1  ;;  %498 = vmatpush.bf16.msra.mxu0 %v489_v3  ;;  %v4292_v5 = vld [vmem:[#allocation8] ss:$0 sm:$0xff]  ;;  %v507_v10 = vpack.c.bf16 %v5527_v6, %v5527_v6  ;;  %v508_v11 = vpack.c.bf16 %v5529_v7, %v5529_v7  ;;  %s5192_s25 = smov 120   ;;  %s5193_s1 = smov 112   ;;  %vm1164_vm2 = vcmask 130048  }
 0x16b   :  { %s5194_s15 = smov 104   ;;  %s5195_s26 = smov 88   ;;  %vm1169_vm3 = vcmask 195584   ;;  %vm1196_vm4 = vcmask 261120   ;;  %vm3269_vm5 = vcmask 57344  }
 0x16c   :  { %v513_v15 = vunpack.c.l.b16 %v507_v10  ;;  %v514_v16 = vunpack.c.l.b16 %v508_v11  ;;  %s5196_s5 = smov 80   ;;  %s5197_s0 = smov 72  }
 0x16d   :  { %4005 = vmatmul.msk.bf16.vlgmr.msra.gmra.mxu0 %vm483_vm1, %v5523_v4  ;;  %s5198_s30 = smov 16   ;;  %s5199_s23 = smov 24  }
 0x16e   :  { %v515_v20 = vpack.c.b16 %v514_v16, %v513_v15  ;;  %s6534_s24 = sld [smem:[#allocation58_spill]]  ;;  %s5200_s6 = smov [#allocation38]  }
 0x16f   :  { %s6535_s7 = sld [smem:[#allocation59_spill]]  ;;  %s3950_s3 = sshll.u32 %s5200_s6, 4  ;;  %s3951_s3 = int_to_ptr.vmem [resolvable:$true] %s3950_s3 }
 0x170   :  { %s6536_s10 = sld [smem:[#allocation60_spill]]  ;;  %s3952_s28 = sshll.u32 %s5369_s29, 4  ;;  %s3953_s28 = int_to_ptr.hbm [resolvable:$true] %s3952_s28 }
 0x171   :  { %s6537_s11 = sld [smem:[#allocation62_spill]]  ;;  %s5094_s18 = sshra.s32 %s3953_s28, 4  ;;  %s5095_s18 = int_to_ptr.hbm [resolvable:$true] %s5094_s18 }
 0x172   :  { %s6538_s27 = sld [smem:[#allocation63_spill]]  ;;  %s5098_s21 = scalar_lea.hbm %s5369_s29, 2 }
 0x173   :  { %s6539_s13 = sld [smem:[#allocation64_spill]]  ;;  %p5099_p4 = scmp.lt.s32.totalorder %s5095_s18, %s5369_s29 }
 0x1ea   :  { %v500_v8 = vpop.f32.mrf.mxu0 }
 0x1eb   :  { %v501_v9 = vadd.f32 %v4292_v5, %v500_v8 }
 0x1ed   :  { %v509_v12 = vpack.c.bf16 %v501_v9, %v501_v9 }
 0x1ef   :  { %v607_v13 = vunpack.c.l.b16 %v509_v12  ;;  %v520_v14 = vsel %vm483_vm1, %v509_v12, 0 }
 0x1f0   :  { %529 = vmatpush.bf16.xpose.msra.mxu1 %v520_v14 }
 0x1f1   :  { %v5536_v17 = vpack.c.b16 %v607_v13, %v607_v13 }
 0x1f2   :  { %v502_v18 = vpop.f32.mrf.mxu0 }
 0x1f3   :  { %v503_v19 = vadd.f32 %v4292_v5, %v502_v18  ;;  %609 = vrot.lane.b32.xlu2 %v5536_v17, %s5191_s12 }
 0x1f5   :  { %v510_v21 = vpack.c.bf16 %v503_v19, %v503_v19 }
 0x1f7   :  { %4006 = vmatmul.msk.bf16.vlgmr.msra.gmra.mxu1 %vm483_vm1, %v515_v20  ;;  %v537_v22 = vsel %vm483_vm1, %v510_v21, 0  ;;  %v637_v23 = vunpack.c.l.b16 %v510_v21 }
 0x1f8   :  { %546 = vmatpush.bf16.xpose.msra.mxu2 %v537_v22 }
 0x1f9   :  { %v5546_v24 = vpack.c.b16 %v637_v23, %v637_v23 }
 0x1fb   :  { %667 = vrot.lane.b32.xlu2 %v5536_v17, %s5192_s25 }
 0x1ff   :  { %4007 = vmatmul.msk.bf16.vlgmr.msra.gmra.mxu2 %vm483_vm1, %v515_v20 }
 0x203   :  { %830 = vrot.lane.b32.xlu2 %v515_v20, %s5193_s1 }
 0x20b   :  { %689 = vrot.lane.b32.xlu2 %v5546_v24, %s5192_s25 }
 0x213   :  { %997 = vrot.lane.b32.xlu2 %v5536_v17, %s5194_s15 }
 0x21b   :  { %854 = vrot.lane.b32.xlu2 %v5546_v24, %s5193_s1 }
 0x24d   :  { %v610_v25 = vpop.permute.xlu2 %609 }
 0x24e   :  { %v615_v26 = vsel %vm487_vm0, %v610_v25, 0 }
 0x24f   :  { %624 = vmatpush.bf16.msra.mxu3 %v615_v26 }
 0x255   :  { %v668_v27 = vpop.permute.xlu2 %667 }
 0x256   :  { %v673_v28 = vsel %vm483_vm1, %v668_v27, 0 }
 0x257   :  { %682 = vmatpush.bf16.xpose.msrb.mxu3 %v673_v28 }
 0x25d   :  { %v5556_v29 = vpop.permute.xlu2 %830 }
 0x265   :  { %v690_v30 = vpop.permute.xlu2 %689 }
 0x266   :  { %v692_v31 = vsel %vm483_vm1, %v690_v30, 0 }
 0x267   :  { %701 = vmatpush.bf16.xpose.msrb.mxu1 %v692_v31 }
 0x26d   :  { %v5559_v32 = vpop.permute.xlu2 %997 }
 0x26e   :  { %v1003_v16 = vsel %vm483_vm1, %v5559_v32, 0 }
 0x274   :  { %v531_v33 = vpop.f32.mrf.mxu1 }
 0x275   :  { %v855_v34 = vpop.permute.xlu2 %854  ;;  %v553_v35 = vsel %vm483_vm1, %v531_v33, -inf }
 0x276   :  { %v857_v36 = vsel %vm483_vm1, %v855_v34, 0  ;;  %554 = vmax.xlane.f32.xlu0 %v553_v35 }
 0x277   :  { %866 = vmatpush.bf16.xpose.msra.mxu1 %v857_v36 }
 0x27c   :  { %v533_v37 = vpop.f32.mrf.mxu1 }
 0x27d   :  { %v556_v38 = vsel %vm483_vm1, %v533_v37, -inf }
 0x27e   :  { %557 = vmax.xlane.f32.xlu0 %v556_v38 }
 0x282   :  { %v5566_v39 = vpop.f32.mrf.mxu2 }
 0x283   :  { %v559_v57 = vsel %vm483_vm1, %v5566_v39, -inf }
 0x28a   :  { %v550_v40 = vpop.f32.mrf.mxu2 }
 0x28b   :  { %v562_v41 = vsel %vm483_vm1, %v550_v40, -inf }
 0x292   :  { %665 = vrot.lane.b32.xlu0 %v515_v20, %s5192_s25 }
 0x29a   :  { %995 = vrot.lane.b32.xlu0 %v515_v20, %s5194_s15 }
 0x2c4   :  { %563 = vmax.xlane.f32.xlu0 %v562_v41 }
 0x2e9   :  { %v555_v42 = vpop.xlane.xlu0 %554 }
 0x2ea   :  { %v565_v43 = vsub.f32 %v531_v33, %v555_v42 }
 0x2ec   :  { %v569_v44 = vmul.f32 1.442695, %v565_v43 }
 0x2ee   :  { %4306 = vpow2.f32 %v569_v44 }
 0x2f1   :  { %v558_v45 = vpop.xlane.xlu0 %557 }
 0x2f2   :  { %v566_v46 = vsub.f32 %v533_v37, %v558_v45 }
 0x2f4   :  { %v4307_v47 = vpop.eup %4306  ;;  %v571_v48 = vmul.f32 1.442695, %v566_v46 }
 0x2f5   :  { %v577_v49 = vsel %vm483_vm1, %v4307_v47, 0.0 }
 0x2f6   :  { %4308 = vpow2.f32 %v571_v48  ;;  %578 = vadd.xlane.f32.xlu1 %v577_v49 }
 0x2fc   :  { %v4309_v50 = vpop.eup %4308 }
 0x2fd   :  { %v580_v51 = vsel %vm483_vm1, %v4309_v50, 0.0 }
 0x2fe   :  { %581 = vadd.xlane.f32.xlu1 %v580_v51 }
 0x304   :  { %v666_v52 = vpop.permute.xlu0 %665 }
 0x305   :  { %4011 = vmatmul.msk.bf16.vlgmr.msrb.gmra.mxu1 %vm483_vm1, %v666_v52 }
 0x30c   :  { %v996_v53 = vpop.permute.xlu0 %995 }
 0x315   :  { %4015 = vmatmul.msk.bf16.vlgmr.msra.gmra.mxu1 %vm483_vm1, %v5556_v29 }
 0x317   :  { %832 = vrot.lane.b32.xlu1 %v5536_v17, %s5193_s1 }
 0x31f   :  { %1019 = vrot.lane.b32.xlu1 %v5546_v24, %s5194_s15 }
 0x337   :  { %v564_v54 = vpop.xlane.xlu0 %563 }
 0x338   :  { %v568_v55 = vsub.f32 %v550_v40, %v564_v54 }
 0x33a   :  { %v575_v56 = vmul.f32 1.442695, %v568_v55 }
 0x33c   :  { %4310 = vpow2.f32 %v575_v56 }
 0x342   :  { %v5580_v58 = vpop.eup %4310 }
 0x343   :  { %v586_v59 = vsel %vm483_vm1, %v5580_v58, 0.0 }
 0x349   :  { %560 = vmax.xlane.f32.xlu1 %v559_v57 }
 0x351   :  { %587 = vadd.xlane.f32.xlu1 %v586_v59 }
 0x369   :  { %v579_v60 = vpop.xlane.xlu1 %578 }
 0x36a   :  { %4312 = vrcp.f32 %v579_v60 }
 0x370   :  { %v4313_v62 = vpop.eup %4312 }
 0x371   :  { %v582_v61 = vpop.xlane.xlu1 %581  ;;  %v593_v63 = vmul.f32 %v4313_v62, %v4307_v47 }
 0x372   :  { %4314 = vrcp.f32 %v582_v61 }
 0x373   :  { %v597_v2 = vpack.c.bf16 %v593_v63, %v593_v63 }
 0x375   :  { %v603_v5 = vunpack.c.l.b16 %v597_v2 }
 0x378   :  { %v4315_v0 = vpop.eup %4314 }
 0x379   :  { %v594_v1 = vmul.f32 %v4315_v0, %v4309_v50 }
 0x37b   :  { %v598_v3 = vpack.c.bf16 %v594_v1, %v594_v1 }
 0x37d   :  { %v604_v8 = vunpack.c.l.b16 %v598_v3 }
 0x37f   :  { %v605_v9 = vpack.c.b16 %v604_v8, %v603_v5 }
 0x381   :  { %4008 = vmatmul.msk.bf16.vlgmr.msra.gmra.mxu3 %vm483_vm1, %v605_v9 }
 0x382   :  { %v703_v10 = vpop.f32.mrf.mxu1 }
 0x383   :  { %v714_v11 = vsel %vm483_vm1, %v703_v10, -inf }
 0x384   :  { %715 = vmax.xlane.f32.xlu0 %v714_v11 }
 0x389   :  { %v833_v12 = vpop.permute.xlu1 %832 }
 0x38a   :  { %v838_v13 = vsel %vm483_vm1, %v833_v12, 0  ;;  %v705_v14 = vpop.f32.mrf.mxu1 }
 0x38b   :  { %847 = vmatpush.bf16.xpose.msra.mxu3 %v838_v13  ;;  %v717_v15 = vsel %vm483_vm1, %v705_v14, -inf }
 0x38c   :  { %718 = vmax.xlane.f32.xlu2 %v717_v15 }
 0x391   :  { %v1020_v18 = vpop.permute.xlu1 %1019  ;;  %4010 = vmatmul.msk.bf16.vlgmr.msrb.gmra.mxu3 %vm483_vm1, %v666_v52 }
 0x392   :  { %v1022_v19 = vsel %vm483_vm1, %v1020_v18, 0  ;;  %v868_v20 = vpop.f32.mrf.mxu1 }
 0x393   :  { %1012 = vmatpush.bf16.xpose.msrb.mxu3 %v1003_v16  ;;  %1031 = vmatpush.bf16.xpose.msrb.mxu1 %v1022_v19  ;;  %v879_v30 = vsel %vm483_vm1, %v868_v20, -inf }
 0x398   :  { %761 = vrot.lane.b32.xlu0 %v5536_v17, %s5195_s26 }
 0x39a   :  { %v5594_v21 = vpop.f32.mrf.mxu1  ;;  %4019 = vmatmul.msk.bf16.vlgmr.msrb.gmra.mxu1 %vm483_vm1, %v996_v53 }
 0x39b   :  { %v882_v22 = vsel %vm483_vm1, %v5594_v21, -inf }
 0x39c   :  { %883 = vmax.xlane.f32.xlu1 %v882_v22 }
 0x3a1   :  { %4014 = vmatmul.msk.bf16.vlgmr.msra.gmra.mxu3 %vm483_vm1, %v5556_v29 }
 0x3b1   :  { %4018 = vmatmul.msk.bf16.vlgmr.msrb.gmra.mxu3 %vm483_vm1, %v996_v53 }
 0x3bc   :  { %v561_v23 = vpop.xlane.xlu1 %560 }
 0x3bd   :  { %v567_v25 = vsub.f32 %v5566_v39, %v561_v23 }
 0x3bf   :  { %v573_v26 = vmul.f32 1.442695, %v567_v25 }
 0x3c1   :  { %4316 = vpow2.f32 %v573_v26 }
 0x3c4   :  { %v588_v3 = vpop.xlane.xlu1 %587 }
 0x3c7   :  { %v5603_v27 = vpop.eup %4316 }
 0x3c8   :  { %v583_v28 = vsel %vm483_vm1, %v5603_v27, 0.0 }
 0x3c9   :  { %584 = vadd.xlane.f32.xlu2 %v583_v28 }
 0x3d1   :  { %880 = vmax.xlane.f32.xlu2 %v879_v30 }
 0x3f7   :  { %v716_v31 = vpop.xlane.xlu0 %715 }
 0x3f8   :  { %v722_v35 = vsub.f32 %v703_v10, %v716_v31 }
 0x3fa   :  { %v728_v36 = vmul.f32 1.442695, %v722_v35 }
 0x3fc   :  { %4318 = vpow2.f32 %v728_v36 }
 0x3ff   :  { %v719_v40 = vpop.xlane.xlu2 %718 }
 0x400   :  { %v723_v44 = vsub.f32 %v705_v14, %v719_v40 }
 0x402   :  { %v5619_v42 = vpop.eup %4318  ;;  %v730_v48 = vmul.f32 1.442695, %v723_v44 }
 0x403   :  { %v738_v47 = vsel %vm483_vm1, %v5619_v42, 0.0 }
 0x404   :  { %v5608_v32 = vpop.f32.mrf.mxu3  ;;  %4320 = vpow2.f32 %v730_v48 }
 0x40a   :  { %v762_v29 = vpop.permute.xlu0 %761  ;;  %v5634_v52 = vpop.eup %4320 }
 0x40b   :  { %v767_v33 = vsel %vm487_vm0, %v762_v29, 0  ;;  %v741_v53 = vsel %vm483_vm1, %v5634_v52, 0.0 }
 0x40c   :  { %v5611_v34 = vpop.f32.mrf.mxu3  ;;  %776 = vmatpush.bf16.msrb.mxu2 %v767_v33 }
 0x40f   :  { %v884_v12 = vpop.xlane.xlu1 %883 }
 0x414   :  { %v5613_v37 = vpop.f32.mrf.mxu3 }
 0x415   :  { %v708_v50 = vsel %vm483_vm1, %v5613_v37, -inf }
 0x417   :  { %v5615_v38 = vpop.f32.mrf.mxu1 }
 0x418   :  { %v1044_v39 = vsel %vm483_vm1, %v5615_v38, -inf }
 0x419   :  { %1045 = vmax.xlane.f32.xlu1 %v1044_v39 }
 0x41c   :  { %v686_v41 = vpop.f32.mrf.mxu3 }
 0x41d   :  { %v711_v43 = vsel %vm483_vm1, %v686_v41, -inf }
 0x41e   :  { %712 = vmax.xlane.f32.xlu2 %v711_v43  ;;  %v888_v43 = vsub.f32 %v5594_v21, %v884_v12 }
 0x41f   :  { %v5622_v45 = vpop.f32.mrf.mxu1 }
 0x420   :  { %v1047_v46 = vsel %vm483_vm1, %v5622_v45, -inf }
 0x421   :  { %1048 = vmax.xlane.f32.xlu0 %v1047_v46  ;;  %739 = vadd.xlane.f32.xlu1 %v738_v47 }
 0x424   :  { %v5628_v49 = vpop.f32.mrf.mxu3 }
 0x425   :  { %v873_v62 = vsel %vm483_vm1, %v5628_v49, -inf }
 0x429   :  { %709 = vmax.xlane.f32.xlu0 %v708_v50  ;;  %v895_v50 = vmul.f32 1.442695, %v888_v43 }
 0x42c   :  { %v5632_v51 = vpop.f32.mrf.mxu3 }
 0x42d   :  { %v876_v0 = vsel %vm483_vm1, %v5632_v51, -inf }
 0x431   :  { %742 = vadd.xlane.f32.xlu0 %v741_v53 }
 0x434   :  { %v5638_v54 = vpop.f32.mrf.mxu3 }
 0x435   :  { %v1038_v2 = vsel %vm483_vm1, %v5638_v54, -inf }
 0x436   :  { %639 = vrot.lane.b32.xlu2 %v5546_v24, %s5191_s12 }
 0x43a   :  { %926 = vrot.lane.b32.xlu1 %v5536_v17, %s5196_s5 }
 0x43c   :  { %v5644_v55 = vpop.f32.mrf.mxu3  ;;  %v585_v57 = vpop.xlane.xlu2 %584 }
 0x43d   :  { %v1041_v56 = vsel %vm483_vm1, %v5644_v55, -inf }
 0x43e   :  { %1042 = vmax.xlane.f32.xlu0 %v1041_v56 }
 0x444   :  { %v881_v59 = vpop.xlane.xlu2 %880 }
 0x445   :  { %v887_v60 = vsub.f32 %v868_v20, %v881_v59 }
 0x447   :  { %v893_v61 = vmul.f32 1.442695, %v887_v60 }
 0x449   :  { %4322 = vpow2.f32 %v893_v61 }
 0x44a   :  { %4324 = vrcp.f32 %v585_v57 }
 0x44b   :  { %4326 = vrcp.f32 %v588_v3 }
 0x44f   :  { %v5650_v63 = vpop.eup %4322 }
 0x450   :  { %v903_v1 = vsel %vm483_vm1, %v5650_v63, 0.0  ;;  %v4325_v5 = vpop.eup %4324 }
 0x451   :  { %v4327_v8 = vpop.eup %4326  ;;  %v595_v9 = vmul.f32 %v4325_v5, %v5603_v27 }
 0x452   :  { %v596_v11 = vmul.f32 %v4327_v8, %v5580_v58 }
 0x453   :  { %v599_v14 = vpack.c.bf16 %v595_v9, %v595_v9 }
 0x454   :  { %v600_v18 = vpack.c.bf16 %v596_v11, %v596_v11 }
 0x455   :  { %v633_v19 = vunpack.c.l.b16 %v599_v14 }
 0x456   :  { %v634_v25 = vunpack.c.l.b16 %v600_v18 }
 0x458   :  { %v635_v58 = vpack.c.b16 %v634_v25, %v633_v19 }
 0x45f   :  { %874 = vmax.xlane.f32.xlu2 %v873_v62 }
 0x464   :  { %877 = vmax.xlane.f32.xlu1 %v876_v0 }
 0x467   :  { %904 = vadd.xlane.f32.xlu2 %v903_v1 }
 0x46c   :  { %1039 = vmax.xlane.f32.xlu1 %v1038_v2 }
 0x48c   :  { %v5662_v22 = vpop.xlane.xlu1 %1045 }
 0x48d   :  { %v1052_v9 = vsub.f32 %v5615_v38, %v5662_v22 }
 0x491   :  { %v713_v10 = vpop.xlane.xlu2 %712 }
 0x492   :  { %v721_v13 = vsub.f32 %v686_v41, %v713_v10 }
 0x494   :  { %v726_v15 = vmul.f32 1.442695, %v721_v13  ;;  %v5660_v16 = vpop.xlane.xlu0 %1048  ;;  %v740_v29 = vpop.xlane.xlu1 %739  ;;  %v1058_v13 = vmul.f32 1.442695, %v1052_v9 }
 0x495   :  { %v1053_v12 = vsub.f32 %v5622_v45, %v5660_v16 }
 0x496   :  { %4328 = vpow2.f32 %v726_v15 }
 0x497   :  { %v1060_v14 = vmul.f32 1.442695, %v1053_v12 }
 0x499   :  { %v640_v20 = vpop.permute.xlu2 %639 }
 0x49a   :  { %v645_v23 = vsel %vm487_vm0, %v640_v20, 0 }
 0x49b   :  { %654 = vmatpush.bf16.msrb.mxu0 %v645_v23 }
 0x49c   :  { %v5665_v26 = vpop.eup %4328  ;;  %v710_v27 = vpop.xlane.xlu0 %709 }
 0x49d   :  { %v720_v28 = vsub.f32 %v5613_v37, %v710_v27  ;;  %v735_v30 = vsel %vm483_vm1, %v5665_v26, 0.0 }
 0x49e   :  { %736 = vadd.xlane.f32.xlu2 %v735_v30  ;;  %4009 = vmatmul.msk.bf16.vlgmr.msrb.gmra.mxu0 %vm483_vm1, %v635_v58 }
 0x49f   :  { %v724_v31 = vmul.f32 1.442695, %v720_v28 }
 0x4a1   :  { %4330 = vpow2.f32 %v724_v31 }
 0x4a4   :  { %v743_v37 = vpop.xlane.xlu0 %742 }
 0x4a7   :  { %v5671_v33 = vpop.eup %4330 }
 0x4a8   :  { %v732_v35 = vsel %vm483_vm1, %v5671_v33, 0.0 }
 0x4a9   :  { %733 = vadd.xlane.f32.xlu0 %v732_v35 }
 0x4ac   :  { %v927_v36 = vpop.permute.xlu1 %926 }
 0x4ad   :  { %v932_v39 = vsel %vm487_vm0, %v927_v36, 0 }
 0x4ae   :  { %941 = vmatpush.bf16.msra.mxu2 %v932_v39 }
 0x4b1   :  { %v1043_v46 = vpop.xlane.xlu0 %1042 }
 0x4b2   :  { %v1051_v53 = vsub.f32 %v5644_v55, %v1043_v46 }
 0x4b4   :  { %v1056_v59 = vmul.f32 1.442695, %v1051_v53 }
 0x4bd   :  { %788 = vrot.lane.b32.xlu0 %v5546_v24, %s5195_s26 }
 0x4d2   :  { %v875_v40 = vpop.xlane.xlu2 %874 }
 0x4d3   :  { %v885_v41 = vsub.f32 %v5628_v49, %v875_v40 }
 0x4d5   :  { %v889_v44 = vmul.f32 1.442695, %v885_v41 }
 0x4d7   :  { %4332 = vpow2.f32 %v889_v44  ;;  %v878_v47 = vpop.xlane.xlu1 %877 }
 0x4d8   :  { %v886_v48 = vsub.f32 %v5632_v51, %v878_v47 }
 0x4da   :  { %v891_v56 = vmul.f32 1.442695, %v886_v48  ;;  %v905_v5 = vpop.xlane.xlu2 %904 }
 0x4dc   :  { %4334 = vpow2.f32 %v891_v56 }
 0x4dd   :  { %v5682_v57 = vpop.eup %4332  ;;  %4336 = vpow2.f32 %v895_v50 }
 0x4de   :  { %v897_v49 = vsel %vm483_vm1, %v5682_v57, 0.0  ;;  %4338 = vpow2.f32 %v1056_v59 }
 0x4df   :  { %898 = vadd.xlane.f32.xlu2 %v897_v49  ;;  %v1040_v21 = vpop.xlane.xlu1 %1039 }
 0x4e0   :  { %v1050_v60 = vsub.f32 %v5638_v54, %v1040_v21 }
 0x4e2   :  { %v5687_v61 = vpop.eup %4334  ;;  %v1054_v51 = vmul.f32 1.442695, %v1050_v60 }
 0x4e3   :  { %v5689_v62 = vpop.eup %4336  ;;  %v900_v55 = vsel %vm483_vm1, %v5687_v61, 0.0 }
 0x4e4   :  { %4340 = vpow2.f32 %v1054_v51  ;;  %901 = vadd.xlane.f32.xlu1 %v900_v55  ;;  %v906_v0 = vsel %vm483_vm1, %v5689_v62, 0.0  ;;  %v5695_v1 = vpop.eup %4338 }
 0x4e5   :  { %v1065_v3 = vsel %vm483_vm1, %v5695_v1, 0.0 }
 0x4e7   :  { %907 = vadd.xlane.f32.xlu0 %v906_v0 }
 0x4ea   :  { %v5697_v2 = vpop.eup %4340 }
 0x4eb   :  { %v1062_v54 = vsel %vm483_vm1, %v5697_v2, 0.0 }
 0x4ec   :  { %1063 = vadd.xlane.f32.xlu2 %v1062_v54  ;;  %1066 = vadd.xlane.f32.xlu1 %v1065_v3 }
 0x4fb   :  { %1118 = vrot.lane.b32.xlu0 %v5546_v24, %s5197_s0 }
 0x504   :  { %1091 = vrot.lane.b32.xlu2 %v5536_v17, %s5197_s0 }
 0x505   :  { %953 = vrot.lane.b32.xlu1 %v5546_v24, %s5196_s5 }
 0x511   :  { %v737_v8 = vpop.xlane.xlu2 %736 }
 0x512   :  { %4342 = vrcp.f32 %v737_v8 }
 0x513   :  { %4344 = vrcp.f32 %v743_v37 }
 0x518   :  { %v4343_v11 = vpop.eup %4342 }
 0x519   :  { %v749_v17 = vmul.f32 %v4343_v11, %v5665_v26  ;;  %v4345_v15 = vpop.eup %4344 }
 0x51a   :  { %v751_v38 = vmul.f32 %v4345_v15, %v5634_v52 }
 0x51b   :  { %v753_v18 = vpack.c.bf16 %v749_v17, %v749_v17 }
 0x51c   :  { %v734_v10 = vpop.xlane.xlu0 %733  ;;  %v755_v27 = vpack.c.bf16 %v751_v38, %v751_v38 }
 0x51d   :  { %4346 = vrcp.f32 %v734_v10  ;;  %v759_v16 = vunpack.c.l.b16 %v753_v18 }
 0x51e   :  { %4348 = vrcp.f32 %v740_v29  ;;  %v786_v31 = vunpack.c.l.b16 %v755_v27 }
 0x51f   :  { %4350 = vpow2.f32 %v1058_v13 }
 0x520   :  { %4352 = vpow2.f32 %v1060_v14 }
 0x523   :  { %v4347_v24 = vpop.eup %4346 }
 0x524   :  { %v748_v19 = vmul.f32 %v4347_v24, %v5671_v33  ;;  %v4349_v20 = vpop.eup %4348 }
 0x525   :  { %v750_v23 = vmul.f32 %v4349_v20, %v5619_v42  ;;  %v5717_v25 = vpop.eup %4350 }
 0x526   :  { %v752_v22 = vpack.c.bf16 %v748_v19, %v748_v19  ;;  %v5719_v58 = vpop.eup %4352  ;;  %v1068_v30 = vsel %vm483_vm1, %v5717_v25, 0.0 }
 0x527   :  { %v754_v28 = vpack.c.bf16 %v750_v23, %v750_v23  ;;  %v1071_v52 = vsel %vm483_vm1, %v5719_v58, 0.0 }
 0x528   :  { %v758_v45 = vunpack.c.l.b16 %v752_v22 }
 0x529   :  { %v785_v29 = vunpack.c.l.b16 %v754_v28 }
 0x52a   :  { %v760_v26 = vpack.c.b16 %v759_v16, %v758_v45  ;;  %v5742_v16 = vpop.f32.mrf.mxu0 }
 0x52b   :  { %v787_v35 = vpack.c.b16 %v786_v31, %v785_v29 }
 0x52c   :  { %4012 = vmatmul.msk.bf16.vlgmr.msrb.gmra.mxu2 %vm483_vm1, %v760_v26 }
 0x52d   :  { %1069 = vadd.xlane.f32.xlu2 %v1068_v30 }
 0x52f   :  { %1072 = vadd.xlane.f32.xlu1 %v1071_v52  ;;  %v789_v42 = vpop.permute.xlu0 %788 }
 0x530   :  { %v794_v33 = vsel %vm487_vm0, %v789_v42, 0 }
 0x531   :  { %803 = vmatpush.bf16.msra.mxu0 %v794_v33 }
 0x532   :  { %v658_v31 = vpop.f32.mrf.mxu0 }
 0x534   :  { %4013 = vmatmul.msk.bf16.vlgmr.msra.gmra.mxu0 %vm483_vm1, %v787_v35 }
 0x552   :  { %v899_v36 = vpop.xlane.xlu2 %898 }
 0x553   :  { %4354 = vrcp.f32 %v899_v36 }
 0x557   :  { %v902_v39 = vpop.xlane.xlu1 %901 }
 0x558   :  { %4356 = vrcp.f32 %v902_v39 }
 0x559   :  { %v4355_v37 = vpop.eup %4354 }
 0x55a   :  { %v913_v40 = vmul.f32 %v4355_v37, %v5682_v57  ;;  %v908_v50 = vpop.xlane.xlu0 %907 }
 0x55c   :  { %v917_v43 = vpack.c.bf16 %v913_v40, %v913_v40 }
 0x55e   :  { %v4357_v41 = vpop.eup %4356  ;;  %v923_v53 = vunpack.c.l.b16 %v917_v43  ;;  %v4199_v43 = vld [vmem:[#allocation10] sm:$0xff] }
 0x55f   :  { %v914_v44 = vmul.f32 %v4357_v41, %v5687_v61  ;;  %v1064_v46 = vpop.xlane.xlu2 %1063  ;;  %v1067_v47 = vpop.xlane.xlu1 %1066  ;;  %v4200_v41 = vld [vmem:[#allocation10 + $0x8] sm:$0xff] }
 0x560   :  { %4358 = vrcp.f32 %v1064_v46  ;;  %1209 = vmatpush.bf16.msra.mxu3 %v4200_v41 }
 0x561   :  { %v918_v48 = vpack.c.bf16 %v914_v44, %v914_v44  ;;  %4360 = vrcp.f32 %v1067_v47 }
 0x562   :  { %4362 = vrcp.f32 %v908_v50 }
 0x563   :  { %v924_v56 = vunpack.c.l.b16 %v918_v48  ;;  %4364 = vrcp.f32 %v905_v5 }
 0x564   :  { %1210 = vmatpush.bf16.msra.mxu3 %v4199_v43 }
 0x565   :  { %v925_v59 = vpack.c.b16 %v924_v56, %v923_v53 }
 0x566   :  { %v4359_v49 = vpop.eup %4358 }
 0x567   :  { %v4361_v21 = vpop.eup %4360  ;;  %v1092_v60 = vpop.permute.xlu2 %1091  ;;  %4016 = vmatmul.msk.bf16.vlgmr.msra.gmra.mxu2 %vm483_vm1, %v925_v59  ;;  %v1078_v61 = vmul.f32 %v4359_v49, %v5697_v2 }
 0x568   :  { %v1097_v57 = vsel %vm487_vm0, %v1092_v60, 0  ;;  %v1079_v51 = vmul.f32 %v4361_v21, %v5695_v1  ;;  %v4363_v55 = vpop.eup %4362  ;;  %v661_v21 = vadd.f32 %v5608_v32, %v5527_v6  ;;  %v662_v60 = vadd.f32 %v5611_v34, %v5529_v7 }
 0x569   :  { %1106 = vmatpush.bf16.msrb.mxu2 %v1097_v57  ;;  %v4365_v0 = vpop.eup %4364  ;;  %v1082_v54 = vpack.c.bf16 %v1078_v61, %v1078_v61  ;;  %v916_v8 = vmul.f32 %v4363_v55, %v5689_v62 }
 0x56a   :  { %v1083_v3 = vpack.c.bf16 %v1079_v51, %v1079_v51  ;;  %v915_v9 = vmul.f32 %v4365_v0, %v5650_v63 }
 0x56b   :  { %v1088_v10 = vunpack.c.l.b16 %v1082_v54  ;;  %v920_v11 = vpack.c.bf16 %v916_v8, %v916_v8 }
 0x56c   :  { %v1089_v5 = vunpack.c.l.b16 %v1083_v3  ;;  %v919_v12 = vpack.c.bf16 %v915_v9, %v915_v9 }
 0x56d   :  { %v951_v17 = vunpack.c.l.b16 %v920_v11  ;;  %v1119_v14 = vpop.permute.xlu0 %1118 }
 0x56e   :  { %v1090_v13 = vpack.c.b16 %v1089_v5, %v1088_v10  ;;  %v950_v1 = vunpack.c.l.b16 %v919_v12  ;;  %v1124_v24 = vsel %vm487_vm0, %v1119_v14, 0 }
 0x570   :  { %v952_v18 = vpack.c.b16 %v951_v17, %v950_v1  ;;  %v663_v1 = vadd.f32 %v5742_v16, %v5527_v6  ;;  %v1277_v16 = vld [vmem:[#allocation13] sm:$0xf] }
 0x577   :  { %v954_v15 = vpop.permute.xlu1 %953  ;;  %4020 = vmatmul.msk.bf16.vlgmr.msrb.gmra.mxu2 %vm483_vm1, %v1090_v13  ;;  %v664_v13 = vadd.f32 %v658_v31, %v5529_v7 }
 0x578   :  { %v959_v2 = vsel %vm487_vm0, %v954_v15, 0 }
 0x579   :  { %968 = vmatpush.bf16.msrb.mxu0 %v959_v2 }
 0x57c   :  { %4017 = vmatmul.msk.bf16.vlgmr.msrb.gmra.mxu0 %vm483_vm1, %v952_v18 }
 0x57d   :  { %1133 = vmatpush.bf16.msra.mxu0 %v1124_v24 }
 0x5a0   :  { %v1070_v63 = vpop.xlane.xlu2 %1069 }
 0x5a1   :  { %4366 = vrcp.f32 %v1070_v63 }
 0x5a2   :  { %v1073_v62 = vpop.xlane.xlu1 %1072 }
 0x5a3   :  { %4368 = vrcp.f32 %v1073_v62 }
 0x5a7   :  { %v4367_v19 = vpop.eup %4366 }
 0x5a8   :  { %v1080_v20 = vmul.f32 %v4367_v19, %v5717_v25 }
 0x5a9   :  { %v4369_v38 = vpop.eup %4368 }
 0x5aa   :  { %v1084_v22 = vpack.c.bf16 %v1080_v20, %v1080_v20  ;;  %v1081_v23 = vmul.f32 %v4369_v38, %v5719_v58 }
 0x5ac   :  { %v1085_v45 = vpack.c.bf16 %v1081_v23, %v1081_v23  ;;  %v1115_v27 = vunpack.c.l.b16 %v1084_v22 }
 0x5ae   :  { %v1116_v26 = vunpack.c.l.b16 %v1085_v45 }
 0x5af   :  { %v778_v28 = vpop.f32.mrf.mxu2 }
 0x5b0   :  { %v1117_v30 = vpack.c.b16 %v1116_v26, %v1115_v27  ;;  %814 = vrot.lane.b32.xlu0 %v778_v28, %s5166_s16  ;;  %v4202_v27 = vld [vmem:[#allocation16 + $0x8] sm:$0xff]  ;;  %v4293_v28 = vld [vmem:[#allocation11] ss:$0 sm:$0xff] }
 0x5b1   :  { %v805_v25 = vpop.f32.mrf.mxu0  ;;  %1264 = vmatpush.bf16.msra.mxu1 %v4202_v27 }
 0x5b2   :  { %4021 = vmatmul.msk.bf16.vlgmr.msra.gmra.mxu0 %vm483_vm1, %v1117_v30 }
 0x5b7   :  { %v780_v52 = vpop.f32.mrf.mxu2 }
 0x5b8   :  { %816 = vrot.lane.b32.xlu2 %v780_v52, %s5166_s16 }
 0x5b9   :  { %v807_v58 = vpop.f32.mrf.mxu0 }
 0x5c0   :  { %818 = vrot.lane.b32.xlu2 %v805_v25, %s5166_s16 }
 0x5ea   :  { %v943_v42 = vpop.f32.mrf.mxu2 }
 0x5eb   :  { %979 = vrot.lane.b32.xlu0 %v943_v42, %s5198_s30 }
 0x5f2   :  { %v945_v29 = vpop.f32.mrf.mxu2 }
 0x5f3   :  { %981 = vrot.lane.b32.xlu1 %v945_v29, %s5198_s30 }
 0x5f9   :  { %v970_v33 = vpop.f32.mrf.mxu0 }
 0x5fa   :  { %v1108_v35 = vpop.f32.mrf.mxu2 }
 0x5fb   :  { %1144 = vrot.lane.b32.xlu0 %v1108_v35, %s5199_s23  ;;  %983 = vrot.lane.b32.xlu1 %v970_v33, %s5198_s30 }
 0x601   :  { %v972_v36 = vpop.f32.mrf.mxu0 }
 0x602   :  { %v1110_v39 = vpop.f32.mrf.mxu2  ;;  %985 = vrot.lane.b32.xlu2 %v972_v36, %s5198_s30 }
 0x603   :  { %1146 = vrot.lane.b32.xlu0 %v1110_v39, %s5199_s23 }
 0x60b   :  { %820 = vrot.lane.b32.xlu0 %v807_v58, %s5166_s16 }
 0x612   :  { %v817_v48 = vpop.permute.xlu2 %816 }
 0x613   :  { %v827_v53 = vadd.f32 %v817_v48, %v5529_v7 }
 0x615   :  { %v1161_v51 = vsel %vm483_vm1, %v662_v60, %v827_v53 }
 0x61a   :  { %v819_v10 = vpop.permute.xlu2 %818 }
 0x61b   :  { %v828_v17 = vadd.f32 %v819_v10, %v5527_v6 }
 0x61d   :  { %v1162_v62 = vsel %vm483_vm1, %v663_v1, %v828_v17 }
 0x622   :  { %v815_v44 = vpop.permute.xlu0 %814 }
 0x623   :  { %v826_v56 = vadd.f32 %v815_v44, %v5527_v6 }
 0x625   :  { %v1160_v55 = vsel %vm483_vm1, %v661_v21, %v826_v56 }
 0x62f   :  { %v1135_v37 = vpop.f32.mrf.mxu0 }
 0x630   :  { %1148 = vrot.lane.b32.xlu0 %v1135_v37, %s5199_s23 }
 0x637   :  { %v1137_v40 = vpop.f32.mrf.mxu0 }
 0x638   :  { %1150 = vrot.lane.b32.xlu1 %v1137_v40, %s5199_s23 }
 0x65c   :  { %v986_v14 = vpop.permute.xlu2 %985 }
 0x65d   :  { %v980_v46 = vpop.permute.xlu0 %979  ;;  %v994_v18 = vadd.f32 %v986_v14, %v5529_v7 }
 0x65e   :  { %v991_v59 = vadd.f32 %v980_v46, %v5527_v6 }
 0x660   :  { %v1165_v54 = vsel %vm1164_vm2, %v1160_v55, %v991_v59 }
 0x665   :  { %v982_v50 = vpop.permute.xlu1 %981 }
 0x666   :  { %v992_v49 = vadd.f32 %v982_v50, %v5529_v7 }
 0x668   :  { %v1166_v3 = vsel %vm1164_vm2, %v1161_v51, %v992_v49  ;;  %v4294_v51 = vld [vmem:[#allocation17] ss:$0 sm:$0xff] }
 0x66d   :  { %v1145_v47 = vpop.permute.xlu0 %1144  ;;  %v984_v5 = vpop.permute.xlu1 %983 }
 0x66e   :  { %v1156_v57 = vadd.f32 %v1145_v47, %v5527_v6  ;;  %v993_v15 = vadd.f32 %v984_v5, %v5527_v6  ;;  %v4295_v47 = vld [vmem:[#allocation14] ss:$0 sm:$0xff] }
 0x670   :  { %v1170_v32 = vsel %vm1169_vm3, %v1165_v54, %v1156_v57  ;;  %v1167_v20 = vsel %vm1164_vm2, %v1162_v62, %v993_v15 }
 0x675   :  { %v1147_v61 = vpop.permute.xlu0 %1146 }
 0x676   :  { %v1157_v0 = vadd.f32 %v1147_v61, %v5529_v7 }
 0x678   :  { %v1171_v8 = vsel %vm1169_vm3, %v1166_v3, %v1157_v0 }
 0x679   :  { %v1174_v34 = vpack.c.bf16 %v1171_v8, %v1170_v32 }
 0x67b   :  { %4030 = vmatmul.msk.bf16.vlgmr.msra.gmra.mxu3 %vm1196_vm4, %v1174_v34 }
 0x67d   :  { %v821_v9 = vpop.permute.xlu0 %820 }
 0x67e   :  { %v829_v11 = vadd.f32 %v821_v9, %v5529_v7 }
 0x680   :  { %v1163_v2 = vsel %vm483_vm1, %v664_v13, %v829_v11 }
 0x681   :  { %v1168_v38 = vsel %vm1164_vm2, %v1163_v2, %v994_v18 }
 0x6a2   :  { %v1149_v12 = vpop.permute.xlu0 %1148 }
 0x6a3   :  { %v1158_v24 = vadd.f32 %v1149_v12, %v5527_v6  ;;  %v1283_v6 = vsel %vm487_vm0, %v1277_v16, 0 }
 0x6a4   :  { %1292 = vmatpush.bf16.msra.mxu2 %v1283_v6 }
 0x6a5   :  { %v1172_v22 = vsel %vm1169_vm3, %v1167_v20, %v1158_v24 }
 0x6a7   :  { %4042 = vmatmul.msk.bf16.vlgmr.msra.gmra.mxu2 %vm483_vm1, %v5523_v4 }
 0x6aa   :  { %v1151_v63 = vpop.permute.xlu1 %1150 }
 0x6ab   :  { %v1159_v19 = vadd.f32 %v1151_v63, %v5529_v7  ;;  %v4201_v7 = vld [vmem:[#allocation16] sm:$0xff] }
 0x6ac   :  { %1265 = vmatpush.bf16.msra.mxu1 %v4201_v7 }
 0x6ad   :  { %v1173_v23 = vsel %vm1169_vm3, %v1168_v38, %v1159_v19 }
 0x6ae   :  { %v1175_v45 = vpack.c.bf16 %v1173_v23, %v1172_v22 }
 0x6b0   :  { %4031 = vmatmul.msk.bf16.gmra.mxu3 %vm1196_vm4, %v1175_v45 }
 0x6fe   :  { %v1212_v26 = vpop.f32.mrf.mxu3 }
 0x6ff   :  { %v1213_v30 = vadd.f32 %v4293_v28, %v1212_v26 }
 0x701   :  { %v1222_v52 = vmax.f32 %v1213_v30, 0.0 }
 0x703   :  { %v1226_v58 = vadd.f32 %v1222_v52, %v1170_v32 }
 0x706   :  { %v1214_v31 = vpop.f32.mrf.mxu3 }
 0x707   :  { %v1215_v25 = vadd.f32 %v4293_v28, %v1214_v31 }
 0x709   :  { %v1223_v42 = vmax.f32 %v1215_v25, 0.0 }
 0x70b   :  { %v1227_v29 = vadd.f32 %v1223_v42, %v1171_v8 }
 0x70d   :  { %v1230_v33 = vpack.c.bf16 %v1227_v29, %v1226_v58 }
 0x70f   :  { %4040 = vmatmul.msk.bf16.vlgmr.msra.gmra.mxu1 %vm1196_vm4, %v1230_v33 }
 0x72a   :  { %v1294_v46 = vpop.f32.mrf.mxu2 }
 0x72b   :  { %v5799_v56 = vadd.f32 %v4295_v47, %v1294_v46 }
 0x72d   :  { %v1299_v21 = vpack.c.bf16 %v5799_v56, %v5799_v56 }
 0x72f   :  { %v1418_v60 = vunpack.c.l.b16 %v1299_v21 }
 0x731   :  { %v1419_v57 = vpack.c.b16 %v1418_v60, %v1418_v60 }
 0x732   :  { %v1296_v48 = vpop.f32.mrf.mxu2 }
 0x733   :  { %v1217_v35 = vpop.f32.mrf.mxu3  ;;  %v5795_v50 = vadd.f32 %v4295_v47, %v1296_v48 }
 0x734   :  { %v1218_v36 = vadd.f32 %v4293_v28, %v1217_v35 }
 0x735   :  { %v1300_v53 = vpack.c.bf16 %v5795_v50, %v5795_v50 }
 0x736   :  { %v1224_v37 = vmax.f32 %v1218_v36, 0.0 }
 0x737   :  { %v1444_v59 = vunpack.c.l.b16 %v1300_v53 }
 0x738   :  { %v1228_v41 = vadd.f32 %v1224_v37, %v1172_v22 }
 0x739   :  { %v1445_v49 = vpack.c.b16 %v1444_v59, %v1444_v59 }
 0x73b   :  { %v1219_v39 = vpop.f32.mrf.mxu3  ;;  %1446 = vrot.lane.b32.xlu0 %v1445_v49, %s5192_s25 }
 0x73c   :  { %v1220_v40 = vadd.f32 %v4293_v28, %v1219_v39 }
 0x73e   :  { %v1225_v4 = vmax.f32 %v1220_v40, 0.0 }
 0x740   :  { %v1229_v43 = vadd.f32 %v1225_v4, %v1173_v23 }
 0x742   :  { %v1231_v44 = vpack.c.bf16 %v1229_v43, %v1228_v41 }
 0x743   :  { %1420 = vrot.lane.b32.xlu0 %v1419_v57, %s5192_s25 }
 0x744   :  { %4041 = vmatmul.msk.bf16.gmra.mxu1 %vm1196_vm4, %v1231_v44 }
 0x78c   :  { %v1267_v61 = vpop.f32.mrf.mxu1 }
 0x78d   :  { %v1268_v55 = vadd.f32 %v4294_v51, %v1267_v61 }
 0x78f   :  { %v1301_v54 = vpack.c.bf16 %v1268_v55, %v1268_v55 }
 0x791   :  { %v1307_v8 = vunpack.c.l.b16 %v1301_v54 }
 0x794   :  { %v1269_v0 = vpop.f32.mrf.mxu1 }
 0x795   :  { %v1270_v3 = vadd.f32 %v4294_v51, %v1269_v0 }
 0x797   :  { %v1302_v32 = vpack.c.bf16 %v1270_v3, %v1270_v3 }
 0x799   :  { %v1308_v34 = vunpack.c.l.b16 %v1302_v32 }
 0x79b   :  { %v5805_v9 = vpack.c.b16 %v1308_v34, %v1307_v8 }
 0x79d   :  { %1422 = vrot.lane.b32.xlu1 %v5805_v9, %s5192_s25  ;;  %v1314_v10 = vsel %vm483_vm1, %v5805_v9, 0 }
 0x79e   :  { %1323 = vmatpush.bf16.xpose.msrb.mxu0 %v1314_v10 }
 0x7a5   :  { %1564 = vrot.lane.b32.xlu1 %v1445_v49, %s5193_s1  ;;  %4043 = vmatmul.msk.bf16.vlgmr.msrb.gmra.mxu0 %vm483_vm1, %v1299_v21 }
 0x7ad   :  { %1541 = vrot.lane.b32.xlu1 %v1419_v57, %s5193_s1  ;;  %v1447_v18 = vpop.permute.xlu0 %1446 }
 0x7b5   :  { %1659 = vrot.lane.b32.xlu1 %v1419_v57, %s5194_s15  ;;  %v1421_v19 = vpop.permute.xlu0 %1420 }
 0x7c1   :  { %v1272_v5 = vpop.f32.mrf.mxu1 }
 0x7c2   :  { %v1273_v11 = vadd.f32 %v4294_v51, %v1272_v5 }
 0x7c4   :  { %v1303_v13 = vpack.c.bf16 %v1273_v11, %v1273_v11 }
 0x7c6   :  { %v1331_v15 = vunpack.c.l.b16 %v1303_v13 }
 0x7c9   :  { %v1274_v12 = vpop.f32.mrf.mxu1 }
 0x7ca   :  { %v1275_v17 = vadd.f32 %v4294_v51, %v1274_v12 }
 0x7cc   :  { %v1304_v14 = vpack.c.bf16 %v1275_v17, %v1275_v17 }
 0x7ce   :  { %v1332_v1 = vunpack.c.l.b16 %v1304_v14 }
 0x7d0   :  { %v5815_v2 = vpack.c.b16 %v1332_v1, %v1331_v15 }
 0x7d2   :  { %1684 = vrot.lane.b32.xlu0 %v5815_v2, %s5194_s15  ;;  %1448 = vrot.lane.b32.xlu2 %v5815_v2, %s5192_s25  ;;  %v1338_v24 = vsel %vm483_vm1, %v5815_v2, 0 }
 0x7d3   :  { %1347 = vmatpush.bf16.xpose.msrb.mxu2 %v1338_v24 }
 0x7da   :  { %1661 = vrot.lane.b32.xlu0 %v5805_v9, %s5194_s15  ;;  %1566 = vrot.lane.b32.xlu2 %v5815_v2, %s5193_s1 }
 0x7db   :  { %4044 = vmatmul.msk.bf16.vlgmr.msrb.gmra.mxu2 %vm483_vm1, %v1300_v53 }
 0x7e2   :  { %1396 = vrot.lane.b32.xlu0 %v5815_v2, %s5191_s12  ;;  %1543 = vrot.lane.b32.xlu2 %v5805_v9, %s5193_s1 }
 0x7ea   :  { %1682 = vrot.lane.b32.xlu2 %v1445_v49, %s5194_s15 }
 0x80f   :  { %v1423_v63 = vpop.permute.xlu1 %1422 }
 0x810   :  { %v1428_v62 = vsel %vm483_vm1, %v1423_v63, 0 }
 0x811   :  { %1437 = vmatpush.bf16.xpose.msrb.mxu1 %v1428_v62 }
 0x817   :  { %v1565_v27 = vpop.permute.xlu1 %1564 }
 0x818   :  { %4047 = vmatmul.msk.bf16.vlgmr.msrb.gmra.mxu1 %vm483_vm1, %v1421_v19 }
 0x81f   :  { %v1542_v28 = vpop.permute.xlu1 %1541 }
 0x822   :  { %v1325_v20 = vpop.f32.mrf.mxu0 }
 0x823   :  { %v1353_v38 = vsel %vm1164_vm2, %v1325_v20, -inf }
 0x824   :  { %1354 = vmax.xlane.f32.xlu0 %v1353_v38 }
 0x827   :  { %v1660_v42 = vpop.permute.xlu1 %1659 }
 0x82a   :  { %v1327_v22 = vpop.f32.mrf.mxu0 }
 0x82c   :  { %v1449_v23 = vpop.permute.xlu2 %1448 }
 0x82d   :  { %v1454_v45 = vsel %vm483_vm1, %v1449_v23, 0 }
 0x82e   :  { %1463 = vmatpush.bf16.xpose.msra.mxu2 %v1454_v45 }
 0x834   :  { %v1567_v16 = vpop.permute.xlu2 %1566 }
 0x835   :  { %v1572_v6 = vsel %vm483_vm1, %v1567_v16, 0  ;;  %4048 = vmatmul.msk.bf16.vlgmr.msra.gmra.mxu2 %vm483_vm1, %v1447_v18 }
 0x836   :  { %1581 = vmatpush.bf16.xpose.msrb.mxu2 %v1572_v6 }
 0x83c   :  { %v1544_v7 = vpop.permute.xlu2 %1543 }
 0x83d   :  { %v1549_v26 = vsel %vm483_vm1, %v1544_v7, 0 }
 0x83e   :  { %1558 = vmatpush.bf16.xpose.msra.mxu1 %v1549_v26 }
 0x844   :  { %v1685_v30 = vpop.permute.xlu0 %1684  ;;  %v1683_v29 = vpop.permute.xlu2 %1682 }
 0x845   :  { %v1690_v31 = vsel %vm483_vm1, %v1685_v30, 0  ;;  %4051 = vmatmul.msk.bf16.vlgmr.msra.gmra.mxu1 %vm483_vm1, %v1542_v28  ;;  %4052 = vmatmul.msk.bf16.vlgmr.msrb.gmra.mxu2 %vm483_vm1, %v1565_v27 }
 0x846   :  { %1699 = vmatpush.bf16.xpose.msra.mxu2 %v1690_v31 }
 0x84c   :  { %v1662_v52 = vpop.permute.xlu0 %1661 }
 0x84d   :  { %v1667_v25 = vsel %vm483_vm1, %v1662_v52, 0 }
 0x84e   :  { %1676 = vmatpush.bf16.xpose.msrb.mxu1 %v1667_v25 }
 0x854   :  { %v1397_v58 = vpop.permute.xlu0 %1396 }
 0x855   :  { %1409 = vmatpush.bf16.msrb.mxu3 %v1397_v58  ;;  %4055 = vmatmul.msk.bf16.vlgmr.msrb.gmra.mxu1 %vm483_vm1, %v1660_v42 }
 0x856   :  { %4056 = vmatmul.msk.bf16.vlgmr.msra.gmra.mxu2 %vm483_vm1, %v1683_v29 }
 0x85e   :  { %v1349_v33 = vpop.f32.mrf.mxu2 }
 0x85f   :  { %v1356_v35 = vsel %vm1164_vm2, %v1349_v33, -inf }
 0x860   :  { %1357 = vmax.xlane.f32.xlu2 %v1356_v35 }
 0x866   :  { %v1351_v36 = vpop.f32.mrf.mxu2 }
 0x895   :  { %v1439_v39 = vpop.f32.mrf.mxu1 }
 0x896   :  { %v1469_v37 = vsel %vm1164_vm2, %v1439_v39, -inf }
 0x897   :  { %1470 = vmax.xlane.f32.xlu2 %v1469_v37  ;;  %v1355_v40 = vpop.xlane.xlu0 %1354 }
 0x898   :  { %v1359_v4 = vsub.f32 %v1325_v20, %v1355_v40 }
 0x89a   :  { %v1361_v41 = vmul.f32 1.442695, %v1359_v4 }
 0x89c   :  { %4370 = vpow2.f32 %v1361_v41 }
 0x89d   :  { %v1441_v43 = vpop.f32.mrf.mxu1 }
 0x8a2   :  { %v5848_v44 = vpop.eup %4370 }
 0x8a3   :  { %v1365_v46 = vsel %vm1164_vm2, %v5848_v44, 0.0 }
 0x8a4   :  { %1366 = vadd.xlane.f32.xlu2 %v1365_v46 }
 0x8b8   :  { %v1465_v47 = vpop.f32.mrf.mxu2 }
 0x8b9   :  { %v1472_v60 = vsel %vm1164_vm2, %v1465_v47, -inf }
 0x8bc   :  { %1493 = vrot.lane.b32.xlu2 %v5805_v9, %s5195_s26 }
 0x8c0   :  { %v1467_v48 = vpop.f32.mrf.mxu2 }
 0x8c2   :  { %v1560_v53 = vpop.f32.mrf.mxu1 }
 0x8c3   :  { %v1587_v59 = vsel %vm1164_vm2, %v1560_v53, -inf }
 0x8c4   :  { %1588 = vmax.xlane.f32.xlu1 %v1587_v59  ;;  %1630 = vrot.lane.b32.xlu2 %v5815_v2, %s5196_s5 }
 0x8c8   :  { %v1583_v49 = vpop.f32.mrf.mxu2 }
 0x8c9   :  { %v1590_v5 = vsel %vm1164_vm2, %v1583_v49, -inf }
 0x8ca   :  { %v1562_v21 = vpop.f32.mrf.mxu1 }
 0x8cc   :  { %1473 = vmax.xlane.f32.xlu1 %v1472_v60 }
 0x8d0   :  { %v1585_v57 = vpop.f32.mrf.mxu2 }
 0x8d2   :  { %v1678_v61 = vpop.f32.mrf.mxu1 }
 0x8d3   :  { %v1358_v51 = vpop.xlane.xlu2 %1357  ;;  %v1705_v55 = vsel %vm1164_vm2, %v1678_v61, -inf }
 0x8d4   :  { %v1360_v0 = vsub.f32 %v1349_v33, %v1358_v51  ;;  %1706 = vmax.xlane.f32.xlu1 %v1705_v55 }
 0x8d6   :  { %v1363_v54 = vmul.f32 1.442695, %v1360_v0 }
 0x8d8   :  { %4372 = vpow2.f32 %v1363_v54 }
 0x8d9   :  { %v5859_v3 = vpop.f32.mrf.mxu2 }
 0x8da   :  { %v1680_v32 = vpop.f32.mrf.mxu1  ;;  %v1708_v11 = vsel %vm1164_vm2, %v5859_v3, -inf }
 0x8de   :  { %v4373_v8 = vpop.eup %4372 }
 0x8df   :  { %v1368_v34 = vsel %vm1164_vm2, %v4373_v8, 0.0 }
 0x8e0   :  { %1369 = vadd.xlane.f32.xlu0 %v1368_v34 }
 0x8e1   :  { %v1703_v10 = vpop.f32.mrf.mxu2 }
 0x8e8   :  { %1591 = vmax.xlane.f32.xlu0 %v1590_v5 }
 0x8ed   :  { %1377 = vrot.lane.b32.xlu1 %v5805_v9, %s5191_s12  ;;  %1709 = vmax.xlane.f32.xlu2 %v1708_v11 }
 0x8fc   :  { %1512 = vrot.lane.b32.xlu0 %v5815_v2, %s5195_s26 }
 0x90a   :  { %v1471_v12 = vpop.xlane.xlu2 %1470 }
 0x90b   :  { %v1475_v13 = vsub.f32 %v1439_v39, %v1471_v12 }
 0x90d   :  { %v1477_v17 = vmul.f32 1.442695, %v1475_v13 }
 0x90f   :  { %4374 = vpow2.f32 %v1477_v17 }
 0x915   :  { %v5869_v14 = vpop.eup %4374 }
 0x916   :  { %v1481_v15 = vsel %vm1164_vm2, %v5869_v14, 0.0 }
 0x917   :  { %1482 = vadd.xlane.f32.xlu2 %v1481_v15  ;;  %v1367_v45 = vpop.xlane.xlu2 %1366 }
 0x91f   :  { %v1494_v29 = vpop.permute.xlu2 %1493 }
 0x927   :  { %v1631_v40 = vpop.permute.xlu2 %1630 }
 0x937   :  { %v1589_v1 = vpop.xlane.xlu1 %1588 }
 0x938   :  { %v1593_v24 = vsub.f32 %v1560_v53, %v1589_v1 }
 0x93a   :  { %v1595_v18 = vmul.f32 1.442695, %v1593_v24 }
 0x93c   :  { %4376 = vpow2.f32 %v1595_v18 }
 0x93f   :  { %v1474_v63 = vpop.xlane.xlu1 %1473 }
 0x940   :  { %v1476_v62 = vsub.f32 %v1465_v47, %v1474_v63 }
 0x942   :  { %v5873_v19 = vpop.eup %4376  ;;  %v1479_v20 = vmul.f32 1.442695, %v1476_v62 }
 0x943   :  { %v1599_v38 = vsel %vm1164_vm2, %v5873_v19, 0.0 }
 0x944   :  { %4378 = vpow2.f32 %v1479_v20  ;;  %1600 = vadd.xlane.f32.xlu1 %v1599_v38 }
 0x945   :  { %4380 = vrcp.f32 %v1367_v45 }
 0x947   :  { %v1707_v6 = vpop.xlane.xlu1 %1706 }
 0x948   :  { %v1711_v25 = vsub.f32 %v1678_v61, %v1707_v6 }
 0x94a   :  { %v4379_v22 = vpop.eup %4378  ;;  %v1713_v35 = vmul.f32 1.442695, %v1711_v25 }
 0x94b   :  { %v1484_v23 = vsel %vm1164_vm2, %v4379_v22, 0.0  ;;  %v4381_v27 = vpop.eup %4380 }
 0x94c   :  { %1485 = vadd.xlane.f32.xlu2 %v1484_v23  ;;  %v1373_v31 = vmul.f32 %v4381_v27, %v5848_v44 }
 0x94e   :  { %v1375_v33 = vpack.c.bf16 %v1373_v31, %v1373_v31  ;;  %v4204_v31 = vld [vmem:[#allocation19 + $0x8] sm:$0xff] }
 0x94f   :  { %1813 = vmatpush.bf16.msra.mxu1 %v4204_v31 }
 0x953   :  { %v1370_v16 = vpop.xlane.xlu0 %1369 }
 0x954   :  { %4382 = vrcp.f32 %v1370_v16 }
 0x95a   :  { %v4383_v7 = vpop.eup %4382 }
 0x95b   :  { %v1374_v26 = vmul.f32 %v4383_v7, %v4373_v8  ;;  %v1592_v28 = vpop.xlane.xlu0 %1591 }
 0x95c   :  { %v1594_v30 = vsub.f32 %v1583_v49, %v1592_v28 }
 0x95d   :  { %v1376_v52 = vpack.c.bf16 %v1374_v26, %v1374_v26  ;;  %1748 = vrot.lane.b32.xlu1 %v5815_v2, %s5197_s0 }
 0x95e   :  { %v1597_v42 = vmul.f32 1.442695, %v1594_v30 }
 0x95f   :  { %4046 = vmatmul.msk.bf16.vlgmr.msrb.gmra.mxu3 %vm1164_vm2, %v1376_v52  ;;  %v1378_v58 = vpop.permute.xlu1 %1377  ;;  %v4203_v52 = vld [vmem:[#allocation19] sm:$0xff] }
 0x960   :  { %4384 = vpow2.f32 %v1597_v42  ;;  %1390 = vmatpush.bf16.msra.mxu0 %v1378_v58  ;;  %v1710_v41 = vpop.xlane.xlu2 %1709  ;;  %1814 = vmatpush.bf16.msra.mxu1 %v4203_v52 }
 0x961   :  { %4386 = vpow2.f32 %v1713_v35  ;;  %v1712_v43 = vsub.f32 %v5859_v3, %v1710_v41 }
 0x963   :  { %4045 = vmatmul.msk.bf16.vlgmr.msra.gmra.mxu0 %vm1164_vm2, %v1375_v33  ;;  %v1715_v44 = vmul.f32 1.442695, %v1712_v43 }
 0x964   :  { %1506 = vmatpush.bf16.msrb.mxu0 %v1494_v29  ;;  %1611 = vrot.lane.b32.xlu2 %v5805_v9, %s5196_s5 }
 0x965   :  { %4388 = vpow2.f32 %v1715_v44 }
 0x966   :  { %v4385_v36 = vpop.eup %4384 }
 0x967   :  { %v1602_v2 = vsel %vm1164_vm2, %v4385_v36, 0.0  ;;  %v4387_v39 = vpop.eup %4386 }
 0x968   :  { %1603 = vadd.xlane.f32.xlu0 %v1602_v2  ;;  %v1717_v4 = vsel %vm1164_vm2, %v4387_v39, 0.0 }
 0x96b   :  { %v4389_v46 = vpop.eup %4388 }
 0x96c   :  { %v1720_v48 = vsel %vm1164_vm2, %v4389_v46, 0.0 }
 0x96e   :  { %v1513_v37 = vpop.permute.xlu0 %1512 }
 0x96f   :  { %1525 = vmatpush.bf16.msra.mxu3 %v1513_v37 }
 0x970   :  { %1718 = vadd.xlane.f32.xlu0 %v1717_v4 }
 0x973   :  { %1643 = vmatpush.bf16.msrb.mxu3 %v1631_v40 }
 0x984   :  { %1729 = vrot.lane.b32.xlu0 %v5805_v9, %s5197_s0 }
 0x98a   :  { %v1483_v47 = vpop.xlane.xlu2 %1482 }
 0x98b   :  { %4390 = vrcp.f32 %v1483_v47 }
 0x98d   :  { %1721 = vadd.xlane.f32.xlu2 %v1720_v48 }
 0x991   :  { %v4391_v53 = vpop.eup %4390 }
 0x992   :  { %v1489_v59 = vmul.f32 %v4391_v53, %v5869_v14 }
 0x994   :  { %v1491_v49 = vpack.c.bf16 %v1489_v59, %v1489_v59 }
 0x996   :  { %4049 = vmatmul.msk.bf16.vlgmr.msrb.gmra.mxu0 %vm1164_vm2, %v1491_v49 }
 0x9b7   :  { %v1601_v21 = vpop.xlane.xlu1 %1600 }
 0x9b8   :  { %4392 = vrcp.f32 %v1601_v21  ;;  %v4206_v21 = vld [vmem:[#allocation23 + $0x8] sm:$0xff] }
 0x9b9   :  { %1855 = vmatpush.bf16.msrb.mxu2 %v4206_v21 }
 0x9be   :  { %v4393_v57 = vpop.eup %4392 }
 0x9bf   :  { %v1486_v60 = vpop.xlane.xlu2 %1485  ;;  %v1607_v61 = vmul.f32 %v4393_v57, %v5873_v19  ;;  %v4296_v57 = vld [vmem:[#allocation20] ss:$0 sm:$0xff] }
 0x9c0   :  { %4394 = vrcp.f32 %v1486_v60 }
 0x9c1   :  { %v1609_v0 = vpack.c.bf16 %v1607_v61, %v1607_v61 }
 0x9c6   :  { %v4395_v9 = vpop.eup %4394 }
 0x9c7   :  { %v1490_v51 = vmul.f32 %v4395_v9, %v4379_v22  ;;  %v1612_v55 = vpop.permute.xlu2 %1611 }
 0x9c8   :  { %1624 = vmatpush.bf16.msra.mxu0 %v1612_v55 }
 0x9c9   :  { %v1492_v54 = vpack.c.bf16 %v1490_v51, %v1490_v51 }
 0x9cb   :  { %4050 = vmatmul.msk.bf16.vlgmr.msra.gmra.mxu3 %vm1164_vm2, %v1492_v54  ;;  %4053 = vmatmul.msk.bf16.vlgmr.msra.gmra.mxu0 %vm1164_vm2, %v1609_v0 }
 0x9cf   :  { %v1749_v3 = vpop.permute.xlu1 %1748 }
 0x9d0   :  { %1761 = vmatpush.bf16.msra.mxu3 %v1749_v3 }
 0x9db   :  { %v1604_v32 = vpop.xlane.xlu0 %1603 }
 0x9dc   :  { %4396 = vrcp.f32 %v1604_v32  ;;  %v4297_v32 = vld [vmem:[#allocation25] ss:$0 sm:$0xff] }
 0x9e0   :  { %v1392_v8 = vpop.f32.mrf.mxu0 }
 0x9e1   :  { %v1415_v37 = vadd.f32 %v1392_v8, %v5799_v56  ;;  %v5924_v8 = vld [vmem:[#allocation22] sm:$0xff] }
 0x9e2   :  { %v4397_v34 = vpop.eup %4396  ;;  %v1411_v10 = vpop.f32.mrf.mxu3 }
 0x9e3   :  { %v1608_v5 = vmul.f32 %v4397_v34, %v4385_v36  ;;  %v1719_v12 = vpop.xlane.xlu0 %1718  ;;  %v1416_v40 = vadd.f32 %v1411_v10, %v5795_v50  ;;  %v5926_v34 = vld [vmem:[#allocation22 + $0x8] sm:$0xff] }
 0x9e4   :  { %4398 = vrcp.f32 %v1719_v12  ;;  %v1866_v12 = vpack.c.bf16 %v5926_v34, %v5926_v34 }
 0x9e5   :  { %v1610_v11 = vpack.c.bf16 %v1608_v5, %v1608_v5 }
 0x9e7   :  { %4054 = vmatmul.msk.bf16.vlgmr.msrb.gmra.mxu3 %vm1164_vm2, %v1610_v11  ;;  %v1865_v11 = vpack.c.bf16 %v5924_v8, %v5924_v8 }
 0x9e8   :  { %v1394_v13 = vpop.f32.mrf.mxu0 }
 0x9ea   :  { %v1413_v17 = vpop.f32.mrf.mxu3  ;;  %v4399_v14 = vpop.eup %4398 }
 0x9eb   :  { %v1725_v15 = vmul.f32 %v4399_v14, %v4387_v39 }
 0x9ed   :  { %v1727_v24 = vpack.c.bf16 %v1725_v15, %v1725_v15  ;;  %v1871_v15 = vunpack.c.l.b16 %v1865_v11 }
 0x9f6   :  { %v1730_v1 = vpop.permute.xlu0 %1729 }
 0x9f7   :  { %1742 = vmatpush.bf16.msrb.mxu0 %v1730_v1  ;;  %v1872_v1 = vunpack.c.l.b16 %v1866_v12 }
 0x9fa   :  { %4057 = vmatmul.msk.bf16.vlgmr.msrb.gmra.mxu0 %vm1164_vm2, %v1727_v24 }
 0xa00   :  { %v1722_v18 = vpop.xlane.xlu2 %1721 }
 0xa01   :  { %4400 = vrcp.f32 %v1722_v18 }
 0xa07   :  { %v4401_v63 = vpop.eup %4400 }
 0xa08   :  { %v1726_v62 = vmul.f32 %v4401_v63, %v4389_v46 }
 0xa0a   :  { %v1728_v19 = vpack.c.bf16 %v1726_v62, %v1726_v62  ;;  %v1873_v62 = vpack.c.b16 %v1872_v1, %v1871_v15 }
 0xa0c   :  { %4058 = vmatmul.msk.bf16.vlgmr.msra.gmra.mxu3 %vm1164_vm2, %v1728_v19 }
 0xa13   :  { %v1508_v20 = vpop.f32.mrf.mxu0 }
 0xa14   :  { %1533 = vrot.lane.b32.xlu1 %v1508_v20, %s5166_s16 }
 0xa1b   :  { %v1510_v38 = vpop.f32.mrf.mxu0 }
 0xa48   :  { %v1626_v22 = vpop.f32.mrf.mxu0 }
 0xa49   :  { %1651 = vrot.lane.b32.xlu2 %v1626_v22, %s5198_s30 }
 0xa4e   :  { %v1527_v23 = vpop.f32.mrf.mxu3 }
 0xa4f   :  { %1535 = vrot.lane.b32.xlu0 %v1527_v23, %s5166_s16 }
 0xa50   :  { %v1628_v45 = vpop.f32.mrf.mxu0 }
 0xa56   :  { %v1529_v16 = vpop.f32.mrf.mxu3 }
 0xa6a   :  { %v1645_v6 = vpop.f32.mrf.mxu3 }
 0xa6b   :  { %1653 = vrot.lane.b32.xlu1 %v1645_v6, %s5198_s30 }
 0xa72   :  { %v1647_v27 = vpop.f32.mrf.mxu3 }
 0xa77   :  { %v1744_v7 = vpop.f32.mrf.mxu0 }
 0xa78   :  { %1769 = vrot.lane.b32.xlu0 %v1744_v7, %s5199_s23 }
 0xa7f   :  { %v1746_v26 = vpop.f32.mrf.mxu0 }
 0xa86   :  { %v1534_v25 = vpop.permute.xlu1 %1533 }
 0xa87   :  { %v1539_v35 = vadd.f32 %v1534_v25, %v5799_v56 }
 0xa89   :  { %v1777_v43 = vsel %vm483_vm1, %v1415_v37, %v1539_v35 }
 0xa8f   :  { %v1763_v28 = vpop.f32.mrf.mxu3 }
 0xa90   :  { %1771 = vrot.lane.b32.xlu1 %v1763_v28, %s5199_s23 }
 0xa97   :  { %v1765_v30 = vpop.f32.mrf.mxu3 }
 0xaa3   :  { %v1652_v29 = vpop.permute.xlu2 %1651 }
 0xaa4   :  { %v1657_v2 = vadd.f32 %v1652_v29, %v5799_v56 }
 0xaa6   :  { %v1779_v47 = vsel %vm1164_vm2, %v1777_v43, %v1657_v2 }
 0xac1   :  { %v1536_v42 = vpop.permute.xlu0 %1535 }
 0xac2   :  { %v1540_v36 = vadd.f32 %v1536_v42, %v5795_v50 }
 0xac4   :  { %v1778_v44 = vsel %vm483_vm1, %v1416_v40, %v1540_v36 }
 0xadd   :  { %v1654_v58 = vpop.permute.xlu1 %1653 }
 0xade   :  { %v1658_v39 = vadd.f32 %v1654_v58, %v5795_v50 }
 0xae0   :  { %v1780_v48 = vsel %vm1164_vm2, %v1778_v44, %v1658_v39 }
 0xaea   :  { %v1770_v33 = vpop.permute.xlu0 %1769 }
 0xaeb   :  { %v1775_v4 = vadd.f32 %v1770_v33, %v5799_v56  ;;  %v4205_v56 = vld [vmem:[#allocation23] sm:$0xff] }
 0xaec   :  { %1856 = vmatpush.bf16.msrb.mxu2 %v4205_v56 }
 0xaed   :  { %v1781_v53 = vsel %vm1169_vm3, %v1779_v47, %v1775_v4 }
 0xb02   :  { %v1772_v41 = vpop.permute.xlu1 %1771 }
 0xb03   :  { %v1776_v46 = vadd.f32 %v1772_v41, %v5795_v50 }
 0xb05   :  { %v1782_v59 = vsel %vm1169_vm3, %v1780_v48, %v1776_v46 }
 0xb06   :  { %v1783_v49 = vpack.c.bf16 %v1782_v59, %v1781_v53 }
 0xb08   :  { %4067 = vmatmul.msk.bf16.vlgmr.msra.gmra.mxu1 %vm1196_vm4, %v1783_v49 }
 0xb85   :  { %v1816_v60 = vpop.f32.mrf.mxu1 }
 0xb86   :  { %v1817_v61 = vadd.f32 %v4296_v57, %v1816_v60 }
 0xb88   :  { %v1821_v50 = vmax.f32 %v1817_v61, 0.0 }
 0xb8a   :  { %v1823_v0 = vadd.f32 %v1821_v50, %v1781_v53 }
 0xb8d   :  { %v1818_v9 = vpop.f32.mrf.mxu1 }
 0xb8e   :  { %v1819_v51 = vadd.f32 %v4296_v57, %v1818_v9 }
 0xb90   :  { %v1822_v55 = vmax.f32 %v1819_v51, 0.0 }
 0xb92   :  { %v1824_v54 = vadd.f32 %v1822_v55, %v1782_v59 }
 0xb94   :  { %v5920_v3 = vpack.c.bf16 %v1824_v54, %v1823_v0 }
 0xb96   :  { %4076 = vmatmul.msk.bf16.vlgmr.msrb.gmra.mxu2 %vm1196_vm4, %v5920_v3 }
 0xc19   :  { %v1858_v10 = vpop.f32.mrf.mxu2 }
 0xc1a   :  { %v1859_v5 = vadd.f32 %v4297_v32, %v1858_v10 }
 0xc1c   :  { %v1867_v13 = vpack.c.bf16 %v1859_v5, %v1859_v5 }
 0xc1e   :  { %v1878_v17 = vsel %vm483_vm1, %v1867_v13, 0  ;;  %v1965_v14 = vunpack.c.l.b16 %v1867_v13 }
 0xc1f   :  { %1887 = vmatpush.bf16.xpose.msra.mxu0 %v1878_v17 }
 0xc20   :  { %v5933_v24 = vpack.c.b16 %v1965_v14, %v1965_v14 }
 0xc21   :  { %v1860_v18 = vpop.f32.mrf.mxu2 }
 0xc22   :  { %v1861_v63 = vadd.f32 %v4297_v32, %v1860_v18  ;;  %2190 = vrot.lane.b32.xlu2 %v5933_v24, %s5193_s1  ;;  %2025 = vrot.lane.b32.xlu0 %v5933_v24, %s5192_s25 }
 0xc24   :  { %v1868_v19 = vpack.c.bf16 %v1861_v63, %v1861_v63 }
 0xc26   :  { %v1995_v20 = vunpack.c.l.b16 %v1868_v19  ;;  %4077 = vmatmul.msk.bf16.vlgmr.msra.gmra.mxu0 %vm483_vm1, %v1873_v62  ;;  %v1895_v38 = vsel %vm483_vm1, %v1868_v19, 0 }
 0xc27   :  { %1904 = vmatpush.bf16.xpose.msrb.mxu3 %v1895_v38 }
 0xc28   :  { %v5941_v22 = vpack.c.b16 %v1995_v20, %v1995_v20 }
 0xc2a   :  { %2047 = vrot.lane.b32.xlu1 %v5941_v22, %s5192_s25  ;;  %2355 = vrot.lane.b32.xlu2 %v5933_v24, %s5194_s15 }
 0xc2b   :  { %2023 = vrot.lane.b32.xlu0 %v1873_v62, %s5192_s25 }
 0xc2e   :  { %4078 = vmatmul.msk.bf16.vlgmr.msrb.gmra.mxu3 %vm483_vm1, %v1873_v62 }
 0xc32   :  { %2212 = vrot.lane.b32.xlu1 %v5941_v22, %s5193_s1  ;;  %1997 = vrot.lane.b32.xlu2 %v5941_v22, %s5191_s12 }
 0xc33   :  { %2188 = vrot.lane.b32.xlu0 %v1873_v62, %s5193_s1 }
 0xc3a   :  { %2377 = vrot.lane.b32.xlu1 %v5941_v22, %s5194_s15 }
 0xc3b   :  { %2353 = vrot.lane.b32.xlu0 %v1873_v62, %s5194_s15 }
 0xc42   :  { %2119 = vrot.lane.b32.xlu1 %v5933_v24, %s5195_s26 }
 0xc43   :  { %1967 = vrot.lane.b32.xlu0 %v5933_v24, %s5191_s12 }
 0xc7c   :  { %v2191_v23 = vpop.permute.xlu2 %2190 }
 0xc7d   :  { %v2196_v26 = vsel %vm483_vm1, %v2191_v23, 0 }
 0xc84   :  { %v2356_v45 = vpop.permute.xlu2 %2355 }
 0xc85   :  { %v2361_v52 = vsel %vm483_vm1, %v2356_v45, 0 }
 0xc8c   :  { %v1998_v16 = vpop.permute.xlu2 %1997 }
 0xc8d   :  { %v2003_v6 = vsel %vm487_vm0, %v1998_v16, 0 }
 0xc8e   :  { %2012 = vmatpush.bf16.msra.mxu2 %v2003_v6 }
 0xc94   :  { %v2026_v27 = vpop.permute.xlu0 %2025 }
 0xc95   :  { %v2031_v7 = vsel %vm483_vm1, %v2026_v27, 0 }
 0xc96   :  { %2040 = vmatpush.bf16.xpose.msrb.mxu0 %v2031_v7 }
 0xc9c   :  { %v2048_v28 = vpop.permute.xlu1 %2047 }
 0xc9d   :  { %v2050_v30 = vsel %vm483_vm1, %v2048_v28, 0  ;;  %v2024_v31 = vpop.permute.xlu0 %2023 }
 0xc9e   :  { %2205 = vmatpush.bf16.xpose.msra.mxu0 %v2196_v26  ;;  %2059 = vmatpush.bf16.xpose.msra.mxu3 %v2050_v30 }
 0xc9f   :  { %4081 = vmatmul.msk.bf16.vlgmr.msrb.gmra.mxu0 %vm483_vm1, %v2024_v31 }
 0xca3   :  { %v1889_v25 = vpop.f32.mrf.mxu0 }
 0xca4   :  { %v2213_v42 = vpop.permute.xlu1 %2212  ;;  %v1911_v58 = vsel %vm483_vm1, %v1889_v25, -inf }
 0xca5   :  { %v2215_v29 = vsel %vm483_vm1, %v2213_v42, 0  ;;  %v2189_v33 = vpop.permute.xlu0 %2188  ;;  %4082 = vmatmul.msk.bf16.vlgmr.msra.gmra.mxu3 %vm483_vm1, %v2024_v31  ;;  %1912 = vmax.xlane.f32.xlu2 %v1911_v58 }
 0xca6   :  { %2370 = vmatpush.bf16.xpose.msrb.mxu0 %v2361_v52  ;;  %2224 = vmatpush.bf16.xpose.msrb.mxu3 %v2215_v29 }
 0xcab   :  { %v1891_v35 = vpop.f32.mrf.mxu0 }
 0xcac   :  { %v2378_v36 = vpop.permute.xlu1 %2377  ;;  %v1914_v2 = vsel %vm483_vm1, %v1891_v35, -inf }
 0xcad   :  { %v2380_v39 = vsel %vm483_vm1, %v2378_v36, 0  ;;  %v2354_v37 = vpop.permute.xlu0 %2353  ;;  %1915 = vmax.xlane.f32.xlu1 %v1914_v2 }
 0xcae   :  { %2389 = vmatpush.bf16.xpose.msra.mxu3 %v2380_v39 }
 0xcaf   :  { %4085 = vmatmul.msk.bf16.vlgmr.msra.gmra.mxu0 %vm483_vm1, %v2189_v33 }
 0xcb1   :  { %v1906_v40 = vpop.f32.mrf.mxu3 }
 0xcb2   :  { %v1917_v4 = vsel %vm483_vm1, %v1906_v40, -inf }
 0xcb3   :  { %1918 = vmax.xlane.f32.xlu0 %v1917_v4 }
 0xcb4   :  { %v2120_v41 = vpop.permute.xlu1 %2119 }
 0xcb5   :  { %v2125_v43 = vsel %vm487_vm0, %v2120_v41, 0  ;;  %v1968_v44 = vpop.permute.xlu0 %1967  ;;  %4086 = vmatmul.msk.bf16.vlgmr.msrb.gmra.mxu3 %vm483_vm1, %v2189_v33 }
 0xcb6   :  { %v1973_v46 = vsel %vm487_vm0, %v1968_v44, 0 }
 0xcb7   :  { %1982 = vmatpush.bf16.msrb.mxu1 %v1973_v46 }
 0xcb9   :  { %v1908_v47 = vpop.f32.mrf.mxu3 }
 0xcba   :  { %v1920_v48 = vsel %vm483_vm1, %v1908_v47, -inf }
 0xcbb   :  { %2134 = vmatpush.bf16.msra.mxu1 %v2125_v43  ;;  %1921 = vmax.xlane.f32.xlu2 %v1920_v48 }
 0xcbf   :  { %4089 = vmatmul.msk.bf16.vlgmr.msrb.gmra.mxu0 %vm483_vm1, %v2354_v37 }
 0xcc5   :  { %4090 = vmatmul.msk.bf16.vlgmr.msra.gmra.mxu3 %vm483_vm1, %v2354_v37 }
 0xd18   :  { %v1913_v53 = vpop.xlane.xlu2 %1912 }
 0xd19   :  { %v1923_v59 = vsub.f32 %v1889_v25, %v1913_v53 }
 0xd1b   :  { %v1927_v56 = vmul.f32 1.442695, %v1923_v59 }
 0xd1c   :  { %v5980_v49 = vpop.f32.mrf.mxu0 }
 0xd1d   :  { %v2066_v21 = vsel %vm483_vm1, %v5980_v49, -inf  ;;  %4402 = vpow2.f32 %v1927_v56 }
 0xd1e   :  { %2067 = vmax.xlane.f32.xlu1 %v2066_v21 }
 0xd20   :  { %v1916_v60 = vpop.xlane.xlu1 %1915 }
 0xd21   :  { %v1924_v57 = vsub.f32 %v1891_v35, %v1916_v60 }
 0xd23   :  { %v1929_v9 = vmul.f32 1.442695, %v1924_v57  ;;  %v5988_v54 = vpop.eup %4402 }
 0xd24   :  { %v5984_v61 = vpop.f32.mrf.mxu0  ;;  %v1935_v11 = vsel %vm483_vm1, %v5988_v54, 0.0 }
 0xd25   :  { %v2069_v50 = vsel %vm483_vm1, %v5984_v61, -inf  ;;  %4404 = vpow2.f32 %v1929_v9 }
 0xd26   :  { %2070 = vmax.xlane.f32.xlu0 %v2069_v50  ;;  %v1919_v51 = vpop.xlane.xlu0 %1918 }
 0xd27   :  { %v1925_v55 = vsub.f32 %v1906_v40, %v1919_v51 }
 0xd28   :  { %v2061_v0 = vpop.f32.mrf.mxu3 }
 0xd29   :  { %v2072_v32 = vsel %vm483_vm1, %v2061_v0, -inf  ;;  %v1931_v5 = vmul.f32 1.442695, %v1925_v55 }
 0xd2a   :  { %2073 = vmax.xlane.f32.xlu2 %v2072_v32 }
 0xd2b   :  { %v5995_v12 = vpop.eup %4404  ;;  %4406 = vpow2.f32 %v1931_v5 }
 0xd2c   :  { %v5991_v10 = vpop.f32.mrf.mxu0  ;;  %v1938_v1 = vsel %vm483_vm1, %v5995_v12, 0.0 }
 0xd2d   :  { %v2231_v18 = vsel %vm483_vm1, %v5991_v10, -inf }
 0xd2e   :  { %1936 = vadd.xlane.f32.xlu0 %v1935_v11  ;;  %v1922_v13 = vpop.xlane.xlu2 %1921 }
 0xd2f   :  { %v1926_v17 = vsub.f32 %v1908_v47, %v1922_v13 }
 0xd30   :  { %v2063_v14 = vpop.f32.mrf.mxu3 }
 0xd31   :  { %v2075_v15 = vsel %vm483_vm1, %v2063_v14, -inf  ;;  %v1933_v62 = vmul.f32 1.442695, %v1926_v17  ;;  %v6004_v19 = vpop.eup %4406 }
 0xd32   :  { %2076 = vmax.xlane.f32.xlu1 %v2075_v15  ;;  %1939 = vadd.xlane.f32.xlu2 %v1938_v1  ;;  %v1941_v23 = vsel %vm483_vm1, %v6004_v19, 0.0 }
 0xd33   :  { %4408 = vpow2.f32 %v1933_v62 }
 0xd34   :  { %v6002_v63 = vpop.f32.mrf.mxu0 }
 0xd35   :  { %v2234_v26 = vsel %vm483_vm1, %v6002_v63, -inf }
 0xd36   :  { %2232 = vmax.xlane.f32.xlu0 %v2231_v18 }
 0xd38   :  { %v6006_v20 = vpop.f32.mrf.mxu3 }
 0xd39   :  { %v2237_v38 = vsel %vm483_vm1, %v6006_v20, -inf  ;;  %v6014_v16 = vpop.eup %4408 }
 0xd3a   :  { %2238 = vmax.xlane.f32.xlu1 %v2237_v38  ;;  %1942 = vadd.xlane.f32.xlu2 %v1941_v23  ;;  %v1944_v7 = vsel %vm483_vm1, %v6014_v16, 0.0 }
 0xd3c   :  { %v6012_v45 = vpop.f32.mrf.mxu0 }
 0xd3d   :  { %v2396_v31 = vsel %vm483_vm1, %v6012_v45, -inf }
 0xd40   :  { %v6016_v6 = vpop.f32.mrf.mxu3 }
 0xd41   :  { %v2240_v27 = vsel %vm483_vm1, %v6016_v6, -inf }
 0xd42   :  { %2241 = vmax.xlane.f32.xlu0 %v2240_v27  ;;  %1945 = vadd.xlane.f32.xlu1 %v1944_v7 }
 0xd43   :  { %2235 = vmax.xlane.f32.xlu2 %v2234_v26 }
 0xd44   :  { %v6024_v28 = vpop.f32.mrf.mxu0 }
 0xd45   :  { %v2399_v30 = vsel %vm483_vm1, %v6024_v28, -inf }
 0xd48   :  { %v6030_v52 = vpop.f32.mrf.mxu3 }
 0xd49   :  { %v2402_v25 = vsel %vm483_vm1, %v6030_v52, -inf }
 0xd4a   :  { %2400 = vmax.xlane.f32.xlu1 %v2399_v30 }
 0xd4b   :  { %2397 = vmax.xlane.f32.xlu2 %v2396_v31 }
 0xd50   :  { %v6036_v42 = vpop.f32.mrf.mxu3 }
 0xd51   :  { %v2405_v58 = vsel %vm483_vm1, %v6036_v42, -inf }
 0xd52   :  { %2403 = vmax.xlane.f32.xlu1 %v2402_v25 }
 0xd56   :  { %2146 = vrot.lane.b32.xlu0 %v5941_v22, %s5195_s26 }
 0xd80   :  { %2406 = vmax.xlane.f32.xlu0 %v2405_v58 }
 0xd91   :  { %v2068_v29 = vpop.xlane.xlu1 %2067 }
 0xd92   :  { %v2078_v33 = vsub.f32 %v5980_v49, %v2068_v29 }
 0xd94   :  { %v2082_v35 = vmul.f32 1.442695, %v2078_v33 }
 0xd96   :  { %4410 = vpow2.f32 %v2082_v35 }
 0xd99   :  { %v2071_v36 = vpop.xlane.xlu0 %2070 }
 0xd9a   :  { %v2079_v2 = vsub.f32 %v5984_v61, %v2071_v36 }
 0xd9c   :  { %v6042_v39 = vpop.eup %4410  ;;  %v2084_v37 = vmul.f32 1.442695, %v2079_v2 }
 0xd9d   :  { %v2090_v40 = vsel %vm483_vm1, %v6042_v39, 0.0  ;;  %v2074_v4 = vpop.xlane.xlu2 %2073 }
 0xd9e   :  { %4412 = vpow2.f32 %v2084_v37  ;;  %2091 = vadd.xlane.f32.xlu2 %v2090_v40  ;;  %v2080_v41 = vsub.f32 %v2061_v0, %v2074_v4 }
 0xda0   :  { %v2086_v43 = vmul.f32 1.442695, %v2080_v41 }
 0xda1   :  { %v1937_v44 = vpop.xlane.xlu0 %1936 }
 0xda2   :  { %4414 = vrcp.f32 %v1937_v44 }
 0xda3   :  { %4416 = vpow2.f32 %v2086_v43 }
 0xda4   :  { %v6046_v46 = vpop.eup %4412 }
 0xda5   :  { %v2093_v47 = vsel %vm483_vm1, %v6046_v46, 0.0  ;;  %v1940_v48 = vpop.xlane.xlu2 %1939  ;;  %v2077_v53 = vpop.xlane.xlu1 %2076 }
 0xda6   :  { %2094 = vadd.xlane.f32.xlu1 %v2093_v47  ;;  %4418 = vrcp.f32 %v1940_v48  ;;  %v2081_v59 = vsub.f32 %v2063_v14, %v2077_v53 }
 0xda8   :  { %v4415_v49 = vpop.eup %4414  ;;  %v2088_v21 = vmul.f32 1.442695, %v2081_v59 }
 0xda9   :  { %v2233_v56 = vpop.xlane.xlu0 %2232  ;;  %v6050_v60 = vpop.eup %4416  ;;  %v1951_v57 = vmul.f32 %v4415_v49, %v5988_v54 }
 0xdaa   :  { %v2243_v61 = vsub.f32 %v5991_v10, %v2233_v56  ;;  %4420 = vpow2.f32 %v2088_v21  ;;  %v2096_v51 = vsel %vm483_vm1, %v6050_v60, 0.0 }
 0xdab   :  { %v1955_v55 = vpack.c.bf16 %v1951_v57, %v1951_v57 }
 0xdac   :  { %v2247_v9 = vmul.f32 1.442695, %v2243_v61  ;;  %v4419_v50 = vpop.eup %4418 }
 0xdad   :  { %v1952_v0 = vmul.f32 %v4419_v50, %v5995_v12  ;;  %v1943_v32 = vpop.xlane.xlu2 %1942  ;;  %v2239_v5 = vpop.xlane.xlu1 %2238  ;;  %v1961_v10 = vunpack.c.l.b16 %v1955_v55 }
 0xdae   :  { %4422 = vpow2.f32 %v2247_v9  ;;  %2097 = vadd.xlane.f32.xlu1 %v2096_v51  ;;  %v2245_v11 = vsub.f32 %v6006_v20, %v2239_v5 }
 0xdaf   :  { %v1956_v13 = vpack.c.bf16 %v1952_v0, %v1952_v0  ;;  %4424 = vrcp.f32 %v1943_v32 }
 0xdb0   :  { %v6058_v17 = vpop.eup %4420  ;;  %v2251_v54 = vmul.f32 1.442695, %v2245_v11 }
 0xdb1   :  { %v1962_v14 = vunpack.c.l.b16 %v1956_v13  ;;  %v2099_v15 = vsel %vm483_vm1, %v6058_v17, 0.0 }
 0xdb2   :  { %2100 = vadd.xlane.f32.xlu0 %v2099_v15  ;;  %4426 = vpow2.f32 %v2251_v54 }
 0xdb3   :  { %v1963_v12 = vpack.c.b16 %v1962_v14, %v1961_v10 }
 0xdb4   :  { %v6062_v1 = vpop.eup %4422 }
 0xdb5   :  { %v2255_v18 = vsel %vm483_vm1, %v6062_v1, 0.0  ;;  %v2242_v62 = vpop.xlane.xlu0 %2241  ;;  %4079 = vmatmul.msk.bf16.vlgmr.msrb.gmra.mxu1 %vm483_vm1, %v1963_v12  ;;  %v1946_v20 = vpop.xlane.xlu1 %1945 }
 0xdb6   :  { %2256 = vadd.xlane.f32.xlu2 %v2255_v18  ;;  %v4425_v38 = vpop.eup %4424  ;;  %v2246_v23 = vsub.f32 %v6016_v6, %v2242_v62  ;;  %v2236_v27 = vpop.xlane.xlu2 %2235  ;;  %4428 = vrcp.f32 %v1946_v20 }
 0xdb7   :  { %v2244_v7 = vsub.f32 %v6002_v63, %v2236_v27  ;;  %v1953_v31 = vmul.f32 %v4425_v38, %v6004_v19 }
 0xdb8   :  { %v2253_v26 = vmul.f32 1.442695, %v2246_v23  ;;  %v6069_v30 = vpop.eup %4426 }
 0xdb9   :  { %v2249_v25 = vmul.f32 1.442695, %v2244_v7  ;;  %v2261_v29 = vsel %vm483_vm1, %v6069_v30, 0.0  ;;  %v1957_v33 = vpack.c.bf16 %v1953_v31, %v1953_v31 }
 0xdba   :  { %4430 = vpow2.f32 %v2253_v26 }
 0xdbb   :  { %4432 = vpow2.f32 %v2249_v25  ;;  %v1991_v2 = vunpack.c.l.b16 %v1957_v33 }
 0xdbc   :  { %v4429_v58 = vpop.eup %4428 }
 0xdbd   :  { %v1954_v35 = vmul.f32 %v4429_v58, %v6014_v16  ;;  %v2401_v43 = vpop.xlane.xlu1 %2400 }
 0xdbe   :  { %2262 = vadd.xlane.f32.xlu2 %v2261_v29  ;;  %v2398_v53 = vpop.xlane.xlu2 %2397  ;;  %v2409_v9 = vsub.f32 %v6024_v28, %v2401_v43 }
 0xdbf   :  { %v1958_v6 = vpack.c.bf16 %v1954_v35, %v1954_v35  ;;  %v2408_v49 = vsub.f32 %v6012_v45, %v2398_v53 }
 0xdc0   :  { %v6075_v36 = vpop.eup %4430  ;;  %v2414_v51 = vmul.f32 1.442695, %v2409_v9 }
 0xdc1   :  { %v6077_v63 = vpop.eup %4432  ;;  %v1992_v37 = vunpack.c.l.b16 %v1958_v6  ;;  %v2264_v19 = vsel %vm483_vm1, %v6075_v36, 0.0  ;;  %v2412_v57 = vmul.f32 1.442695, %v2408_v49 }
 0xdc2   :  { %v2258_v40 = vsel %vm483_vm1, %v6077_v63, 0.0  ;;  %2265 = vadd.xlane.f32.xlu0 %v2264_v19 }
 0xdc3   :  { %v1993_v4 = vpack.c.b16 %v1992_v37, %v1991_v2  ;;  %2259 = vadd.xlane.f32.xlu1 %v2258_v40 }
 0xdc5   :  { %4080 = vmatmul.msk.bf16.vlgmr.msra.gmra.mxu2 %vm483_vm1, %v1993_v4  ;;  %v2404_v44 = vpop.xlane.xlu1 %2403 }
 0xdc6   :  { %v2410_v47 = vsub.f32 %v6030_v52, %v2404_v44 }
 0xdc8   :  { %v2147_v16 = vpop.permute.xlu0 %2146  ;;  %v2416_v48 = vmul.f32 1.442695, %v2410_v47 }
 0xdc9   :  { %v2152_v41 = vsel %vm487_vm0, %v2147_v16, 0 }
 0xdca   :  { %2161 = vmatpush.bf16.msrb.mxu2 %v2152_v41  ;;  %4434 = vpow2.f32 %v2416_v48 }
 0xdd0   :  { %v6092_v61 = vpop.eup %4434 }
 0xdd1   :  { %v2426_v50 = vsel %vm483_vm1, %v6092_v61, 0.0 }
 0xdd6   :  { %2284 = vrot.lane.b32.xlu2 %v5933_v24, %s5196_s5 }
 0xddc   :  { %2311 = vrot.lane.b32.xlu1 %v5941_v22, %s5196_s5 }
 0xdf3   :  { %v2407_v59 = vpop.xlane.xlu0 %2406 }
 0xdf4   :  { %v2411_v21 = vsub.f32 %v6036_v42, %v2407_v59 }
 0xdf6   :  { %v2418_v56 = vmul.f32 1.442695, %v2411_v21 }
 0xdf8   :  { %4436 = vpow2.f32 %v2418_v56 }
 0xdf9   :  { %4438 = vpow2.f32 %v2412_v57 }
 0xdfa   :  { %4440 = vpow2.f32 %v2414_v51 }
 0xdfe   :  { %v6097_v52 = vpop.eup %4436 }
 0xdff   :  { %2427 = vadd.xlane.f32.xlu2 %v2426_v50  ;;  %v2429_v45 = vsel %vm483_vm1, %v6097_v52, 0.0  ;;  %v6101_v42 = vpop.eup %4438 }
 0xe00   :  { %2430 = vadd.xlane.f32.xlu0 %v2429_v45  ;;  %v2420_v55 = vsel %vm483_vm1, %v6101_v42, 0.0  ;;  %v6105_v0 = vpop.eup %4440 }
 0xe01   :  { %v2423_v28 = vsel %vm483_vm1, %v6105_v0, 0.0 }
 0xe06   :  { %2421 = vadd.xlane.f32.xlu1 %v2420_v55 }
 0xe0e   :  { %2424 = vadd.xlane.f32.xlu1 %v2423_v28 }
 0xe11   :  { %v2092_v32 = vpop.xlane.xlu2 %2091 }
 0xe12   :  { %4442 = vrcp.f32 %v2092_v32 }
 0xe14   :  { %2476 = vrot.lane.b32.xlu0 %v5941_v22, %s5197_s0 }
 0xe18   :  { %v4443_v11 = vpop.eup %4442 }
 0xe19   :  { %v2095_v5 = vpop.xlane.xlu1 %2094  ;;  %v2106_v13 = vmul.f32 %v4443_v11, %v6042_v39 }
 0xe1a   :  { %4444 = vrcp.f32 %v2095_v5 }
 0xe1b   :  { %v2110_v10 = vpack.c.bf16 %v2106_v13, %v2106_v13 }
 0xe1d   :  { %v2116_v18 = vunpack.c.l.b16 %v2110_v10 }
 0xe20   :  { %v4445_v54 = vpop.eup %4444 }
 0xe21   :  { %v2107_v14 = vmul.f32 %v4445_v54, %v6046_v46  ;;  %v2098_v15 = vpop.xlane.xlu1 %2097 }
 0xe22   :  { %4446 = vrcp.f32 %v2098_v15 }
 0xe23   :  { %v2111_v12 = vpack.c.bf16 %v2107_v14, %v2107_v14 }
 0xe25   :  { %v2117_v62 = vunpack.c.l.b16 %v2111_v12  ;;  %v2101_v20 = vpop.xlane.xlu0 %2100 }
 0xe26   :  { %4448 = vrcp.f32 %v2101_v20 }
 0xe27   :  { %v2118_v38 = vpack.c.b16 %v2117_v62, %v2116_v18  ;;  %2449 = vrot.lane.b32.xlu1 %v5933_v24, %s5197_s0 }
 0xe28   :  { %v4447_v23 = vpop.eup %4446 }
 0xe29   :  { %v2257_v22 = vpop.xlane.xlu2 %2256  ;;  %4083 = vmatmul.msk.bf16.vlgmr.msra.gmra.mxu1 %vm483_vm1, %v2118_v38  ;;  %v2108_v39 = vmul.f32 %v4447_v23, %v6050_v60  ;;  %v4212_v38 = vld [vmem:[%s6534_s24 + $0x8] sm:$0xff] }
 0xe2a   :  { %4450 = vrcp.f32 %v2257_v22 }
 0xe2b   :  { %v2112_v7 = vpack.c.bf16 %v2108_v39, %v2108_v39 }
 0xe2c   :  { %v4449_v27 = vpop.eup %4448 }
 0xe2d   :  { %v2109_v46 = vmul.f32 %v4449_v27, %v6058_v17  ;;  %v2143_v25 = vunpack.c.l.b16 %v2112_v7  ;;  %v4211_v7 = vld [vmem:[%s6534_s24] sm:$0xff] }
 0xe2f   :  { %v2113_v26 = vpack.c.bf16 %v2109_v46, %v2109_v46 }
 0xe30   :  { %v4451_v35 = vpop.eup %4450 }
 0xe31   :  { %v2263_v31 = vpop.xlane.xlu2 %2262  ;;  %v2144_v58 = vunpack.c.l.b16 %v2113_v26  ;;  %v2271_v60 = vmul.f32 %v4451_v35, %v6062_v1 }
 0xe32   :  { %v6133_v12 = vpop.f32.mrf.mxu1 }
 0xe33   :  { %v2145_v29 = vpack.c.b16 %v2144_v58, %v2143_v25  ;;  %v2275_v37 = vpack.c.bf16 %v2271_v60, %v2271_v60  ;;  %v4298_v60 = vld [vmem:[%s6535_s7] ss:$0 sm:$0xff] }
 0xe35   :  { %4084 = vmatmul.msk.bf16.vlgmr.msrb.gmra.mxu2 %vm483_vm1, %v2145_v29  ;;  %v2266_v6 = vpop.xlane.xlu0 %2265  ;;  %v2281_v16 = vunpack.c.l.b16 %v2275_v37 }
 0xe36   :  { %v2260_v33 = vpop.xlane.xlu1 %2259 }
 0xe37   :  { %4452 = vrcp.f32 %v2260_v33 }
 0xe38   :  { %4454 = vrcp.f32 %v2266_v6 }
 0xe39   :  { %v2285_v24 = vpop.permute.xlu2 %2284  ;;  %4456 = vrcp.f32 %v2263_v31 }
 0xe3a   :  { %v2290_v2 = vsel %vm487_vm0, %v2285_v24, 0  ;;  %v1986_v46 = vpop.f32.mrf.mxu1 }
 0xe3b   :  { %2299 = vmatpush.bf16.msrb.mxu1 %v2290_v2 }
 0xe3d   :  { %v4453_v17 = vpop.eup %4452 }
 0xe3e   :  { %v2272_v19 = vmul.f32 %v4453_v17, %v6077_v63  ;;  %v4455_v4 = vpop.eup %4454 }
 0xe3f   :  { %v4457_v43 = vpop.eup %4456  ;;  %v2274_v47 = vmul.f32 %v4455_v4, %v6075_v36 }
 0xe40   :  { %v2276_v40 = vpack.c.bf16 %v2272_v19, %v2272_v19  ;;  %v2273_v48 = vmul.f32 %v4457_v43, %v6069_v30 }
 0xe41   :  { %v2278_v1 = vpack.c.bf16 %v2274_v47, %v2274_v47 }
 0xe42   :  { %v2282_v41 = vunpack.c.l.b16 %v2276_v40  ;;  %v2277_v53 = vpack.c.bf16 %v2273_v48, %v2273_v48 }
 0xe43   :  { %v2309_v59 = vunpack.c.l.b16 %v2278_v1  ;;  %v4208_v1 = vld [vmem:[#allocation26 + $0x8] sm:$0xff] }
 0xe44   :  { %v2283_v44 = vpack.c.b16 %v2282_v41, %v2281_v16  ;;  %v2308_v21 = vunpack.c.l.b16 %v2277_v53  ;;  %2564 = vmatpush.bf16.msra.mxu0 %v4208_v1 }
 0xe46   :  { %4087 = vmatmul.msk.bf16.vlgmr.msrb.gmra.mxu1 %vm483_vm1, %v2283_v44  ;;  %v2310_v63 = vpack.c.b16 %v2309_v59, %v2308_v21  ;;  %v4207_v59 = vld [vmem:[#allocation26] sm:$0xff] }
 0xe48   :  { %2565 = vmatpush.bf16.msra.mxu0 %v4207_v59 }
 0xe4e   :  { %v2312_v49 = vpop.permute.xlu1 %2311 }
 0xe4f   :  { %v2317_v56 = vsel %vm487_vm0, %v2312_v49, 0 }
 0xe50   :  { %2326 = vmatpush.bf16.msra.mxu2 %v2317_v56 }
 0xe53   :  { %4088 = vmatmul.msk.bf16.vlgmr.msra.gmra.mxu2 %vm483_vm1, %v2310_v63 }
 0xe72   :  { %v2428_v57 = vpop.xlane.xlu2 %2427 }
 0xe73   :  { %v2431_v9 = vpop.xlane.xlu0 %2430 }
 0xe74   :  { %4458 = vrcp.f32 %v2431_v9 }
 0xe75   :  { %4460 = vrcp.f32 %v2428_v57 }
 0xe79   :  { %v2422_v50 = vpop.xlane.xlu1 %2421 }
 0xe7a   :  { %v4459_v36 = vpop.eup %4458 }
 0xe7b   :  { %v4461_v45 = vpop.eup %4460  ;;  %v2439_v30 = vmul.f32 %v4459_v36, %v6097_v52 }
 0xe7c   :  { %v2438_v51 = vmul.f32 %v4461_v45, %v6092_v61 }
 0xe7d   :  { %v2443_v55 = vpack.c.bf16 %v2439_v30, %v2439_v30  ;;  %v2019_v30 = vadd.f32 %v6133_v12, %v5924_v8 }
 0xe7e   :  { %v2442_v28 = vpack.c.bf16 %v2438_v51, %v2438_v51  ;;  %v2020_v51 = vadd.f32 %v1986_v46, %v5926_v34 }
 0xe7f   :  { %v2474_v5 = vunpack.c.l.b16 %v2443_v55 }
 0xe80   :  { %v2473_v13 = vunpack.c.l.b16 %v2442_v28 }
 0xe81   :  { %v2425_v32 = vpop.xlane.xlu1 %2424 }
 0xe82   :  { %4462 = vrcp.f32 %v2425_v32  ;;  %v2475_v10 = vpack.c.b16 %v2474_v5, %v2473_v13 }
 0xe83   :  { %4464 = vrcp.f32 %v2422_v50 }
 0xe86   :  { %v2477_v11 = vpop.permute.xlu0 %2476 }
 0xe87   :  { %v2482_v54 = vsel %vm487_vm0, %v2477_v11, 0 }
 0xe88   :  { %2491 = vmatpush.bf16.msrb.mxu2 %v2482_v54  ;;  %v4463_v14 = vpop.eup %4462 }
 0xe89   :  { %v4465_v52 = vpop.eup %4464  ;;  %v2437_v61 = vmul.f32 %v4463_v14, %v6105_v0 }
 0xe8a   :  { %v2436_v15 = vmul.f32 %v4465_v52, %v6101_v42  ;;  %v6139_v42 = vpop.f32.mrf.mxu2 }
 0xe8b   :  { %4092 = vmatmul.msk.bf16.vlgmr.msrb.gmra.mxu2 %vm483_vm1, %v2475_v10  ;;  %v2441_v18 = vpack.c.bf16 %v2437_v61, %v2437_v61 }
 0xe8c   :  { %v2440_v62 = vpack.c.bf16 %v2436_v15, %v2436_v15 }
 0xe8d   :  { %v2447_v20 = vunpack.c.l.b16 %v2441_v18 }
 0xe8e   :  { %v2446_v22 = vunpack.c.l.b16 %v2440_v62 }
 0xe90   :  { %v2448_v27 = vpack.c.b16 %v2447_v20, %v2446_v22 }
 0xe92   :  { %v6145_v31 = vpop.f32.mrf.mxu2 }
 0xe93   :  { %v2022_v18 = vadd.f32 %v6145_v31, %v5926_v34 }
 0xe99   :  { %v2450_v23 = vpop.permute.xlu1 %2449 }
 0xe9a   :  { %v2455_v39 = vsel %vm487_vm0, %v2450_v23, 0 }
 0xe9b   :  { %2464 = vmatpush.bf16.msra.mxu1 %v2455_v39 }
 0xe9e   :  { %4091 = vmatmul.msk.bf16.vlgmr.msra.gmra.mxu1 %vm483_vm1, %v2448_v27  ;;  %v2021_v27 = vadd.f32 %v6139_v42, %v5924_v8  ;;  %v4209_v42 = vld [vmem:[#allocation29] sm:$0xff] }
 0xe9f   :  { %2658 = vmatpush.bf16.msrb.mxu1 %v4212_v38 }
 0xea3   :  { %2659 = vmatpush.bf16.msrb.mxu1 %v4211_v7 }
 0xea6   :  { %v2136_v0 = vpop.f32.mrf.mxu1 }
 0xea7   :  { %2172 = vrot.lane.b32.xlu1 %v2136_v0, %s5166_s16 }
 0xeae   :  { %v2138_v26 = vpop.f32.mrf.mxu1  ;;  %4121 = vmatmul.msk.bf16.vlgmr.msrb.gmra.mxu1 %vm1196_vm4, %v5920_v3 }
 0xeaf   :  { %2174 = vrot.lane.b32.xlu1 %v2138_v26, %s5166_s16 }
 0xeb8   :  { %v2163_v25 = vpop.f32.mrf.mxu2 }
 0xeb9   :  { %2176 = vrot.lane.b32.xlu1 %v2163_v25, %s5166_s16 }
 0xec0   :  { %v2165_v33 = vpop.f32.mrf.mxu2 }
 0xec3   :  { %v2301_v58 = vpop.f32.mrf.mxu1 }
 0xec4   :  { %2337 = vrot.lane.b32.xlu2 %v2301_v58, %s5198_s30 }
 0xecb   :  { %v2303_v29 = vpop.f32.mrf.mxu1 }
 0xecc   :  { %2339 = vrot.lane.b32.xlu0 %v2303_v29, %s5198_s30 }
 0xed6   :  { %v2328_v35 = vpop.f32.mrf.mxu2 }
 0xede   :  { %v2330_v24 = vpop.f32.mrf.mxu2 }
 0xedf   :  { %2343 = vrot.lane.b32.xlu2 %v2330_v24, %s5198_s30 }
 0xf0e   :  { %v2493_v3 = vpop.f32.mrf.mxu2 }
 0xf16   :  { %v2495_v17 = vpop.f32.mrf.mxu2 }
 0xf19   :  { %v2173_v53 = vpop.permute.xlu1 %2172 }
 0xf1a   :  { %v2184_v9 = vadd.f32 %v2173_v53, %v5924_v8 }
 0xf1b   :  { %v2466_v6 = vpop.f32.mrf.mxu1 }
 0xf1c   :  { %2502 = vrot.lane.b32.xlu1 %v2466_v6, %s5199_s23  ;;  %v2518_v32 = vsel %vm483_vm1, %v2019_v30, %v2184_v9  ;;  %v4299_v6 = vld [vmem:[#allocation28] ss:$0 sm:$0xff]  ;;  %v4300_v9 = vld [vmem:[%s6536_s10] ss:$0 sm:$0xff] }
 0xf1e   :  { %v2338_v57 = vpop.permute.xlu2 %2337 }
 0xf1f   :  { %v2349_v50 = vadd.f32 %v2338_v57, %v5924_v8 }
 0xf21   :  { %v2175_v49 = vpop.permute.xlu1 %2174  ;;  %v2522_v13 = vsel %vm1164_vm2, %v2518_v32, %v2349_v50 }
 0xf22   :  { %v2185_v36 = vadd.f32 %v2175_v49, %v5926_v34 }
 0xf23   :  { %v2468_v2 = vpop.f32.mrf.mxu1 }
 0xf24   :  { %2341 = vrot.lane.b32.xlu1 %v2328_v35, %s5198_s30  ;;  %2504 = vrot.lane.b32.xlu0 %v2468_v2, %s5199_s23  ;;  %v2519_v5 = vsel %vm483_vm1, %v2020_v51, %v2185_v36  ;;  %v4210_v35 = vld [vmem:[#allocation29 + $0x8] sm:$0xff] }
 0xf25   :  { %2619 = vmatpush.bf16.msrb.mxu3 %v4210_v35 }
 0xf29   :  { %2620 = vmatpush.bf16.msrb.mxu3 %v4209_v42 }
 0xf2b   :  { %v2661_v37 = vpop.f32.mrf.mxu1  ;;  %v2177_v21 = vpop.permute.xlu1 %2176 }
 0xf2c   :  { %2508 = vrot.lane.b32.xlu1 %v2495_v17, %s5199_s23  ;;  %2178 = vrot.lane.b32.xlu0 %v2165_v33, %s5166_s16  ;;  %v6157_v19 = vadd.f32 %v4298_v60, %v2661_v37  ;;  %v2186_v20 = vadd.f32 %v2177_v21, %v5924_v8 }
 0xf2e   :  { %v6161_v40 = vpack.c.bf16 %v6157_v19, %v6157_v19  ;;  %v2520_v0 = vsel %vm483_vm1, %v2021_v27, %v2186_v20 }
 0xf30   :  { %v2785_v41 = vunpack.c.l.b16 %v6161_v40 }
 0xf32   :  { %v6167_v43 = vpack.c.b16 %v2785_v41, %v2785_v41 }
 0xf33   :  { %v2663_v4 = vpop.f32.mrf.mxu1 }
 0xf34   :  { %2506 = vrot.lane.b32.xlu0 %v2493_v3, %s5199_s23  ;;  %v6164_v16 = vadd.f32 %v4298_v60, %v2663_v4 }
 0xf36   :  { %v6171_v44 = vpack.c.bf16 %v6164_v16, %v6164_v16 }
 0xf38   :  { %v2811_v47 = vunpack.c.l.b16 %v6171_v44 }
 0xf39   :  { %v2344_v62 = vpop.permute.xlu2 %2343 }
 0xf3a   :  { %v6176_v48 = vpack.c.b16 %v2811_v47, %v2811_v47  ;;  %v2352_v23 = vadd.f32 %v2344_v62, %v5926_v34 }
 0xf3c   :  { %2787 = vrot.lane.b32.xlu0 %v6167_v43, %s5192_s25 }
 0xf3e   :  { %v2340_v56 = vpop.permute.xlu0 %2339 }
 0xf3f   :  { %v2350_v45 = vadd.f32 %v2340_v56, %v5926_v34 }
 0xf41   :  { %v2523_v54 = vsel %vm1164_vm2, %v2519_v5, %v2350_v45 }
 0xf44   :  { %2813 = vrot.lane.b32.xlu0 %v6176_v48, %s5192_s25 }
 0xf8e   :  { %v2503_v63 = vpop.permute.xlu1 %2502 }
 0xf8f   :  { %v2514_v55 = vadd.f32 %v2503_v63, %v5924_v8 }
 0xf91   :  { %v2526_v10 = vsel %vm1169_vm3, %v2522_v13, %v2514_v55 }
 0xf96   :  { %v2505_v28 = vpop.permute.xlu0 %2504  ;;  %v2342_v61 = vpop.permute.xlu1 %2341 }
 0xf97   :  { %v2515_v11 = vadd.f32 %v2505_v28, %v5926_v34  ;;  %v2351_v22 = vadd.f32 %v2342_v61, %v5924_v8 }
 0xf99   :  { %v2527_v14 = vsel %vm1169_vm3, %v2523_v54, %v2515_v11  ;;  %v2524_v25 = vsel %vm1164_vm2, %v2520_v0, %v2351_v22 }
 0xf9a   :  { %v2530_v52 = vpack.c.bf16 %v2527_v14, %v2526_v10 }
 0xf9c   :  { %4101 = vmatmul.msk.bf16.vlgmr.msra.gmra.mxu0 %vm1196_vm4, %v2530_v52 }
 0xf9e   :  { %v2179_v15 = vpop.permute.xlu0 %2178  ;;  %v2509_v39 = vpop.permute.xlu1 %2508 }
 0xf9f   :  { %v2187_v12 = vadd.f32 %v2179_v15, %v5926_v34  ;;  %v2517_v26 = vadd.f32 %v2509_v39, %v5926_v34 }
 0xfa1   :  { %v2521_v38 = vsel %vm483_vm1, %v2022_v18, %v2187_v12 }
 0xfa2   :  { %v2525_v7 = vsel %vm1164_vm2, %v2521_v38, %v2352_v23 }
 0xfa3   :  { %v2529_v58 = vsel %vm1169_vm3, %v2525_v7, %v2517_v26 }
 0xfa6   :  { %v2507_v46 = vpop.permute.xlu0 %2506 }
 0xfa7   :  { %v2516_v31 = vadd.f32 %v2507_v46, %v5924_v8 }
 0xfa9   :  { %v2528_v29 = vsel %vm1169_vm3, %v2524_v25, %v2516_v31 }
 0xfaa   :  { %v2531_v33 = vpack.c.bf16 %v2529_v58, %v2528_v29 }
 0xfac   :  { %4102 = vmatmul.msk.bf16.gmra.mxu0 %vm1196_vm4, %v2531_v33 }
 0xfae   :  { %v2788_v20 = vpop.permute.xlu0 %2787 }
0x1019   :  { %v2567_v24 = vpop.f32.mrf.mxu0 }
0x101a   :  { %v2568_v3 = vadd.f32 %v4299_v6, %v2567_v24 }
0x101c   :  { %v2577_v34 = vmax.f32 %v2568_v3, 0.0 }
0x101e   :  { %v2581_v17 = vadd.f32 %v2577_v34, %v2526_v10 }
0x1021   :  { %v2569_v2 = vpop.f32.mrf.mxu0 }
0x1022   :  { %v2570_v60 = vadd.f32 %v4299_v6, %v2569_v2 }
0x1024   :  { %v2578_v8 = vmax.f32 %v2570_v60, 0.0 }
0x1026   :  { %v2582_v37 = vadd.f32 %v2578_v8, %v2527_v14 }
0x1028   :  { %v2585_v4 = vpack.c.bf16 %v2582_v37, %v2581_v17 }
0x1029   :  { %v2572_v41 = vpop.f32.mrf.mxu0 }
0x102a   :  { %4111 = vmatmul.msk.bf16.vlgmr.msrb.gmra.mxu3 %vm1196_vm4, %v2585_v4  ;;  %v2573_v47 = vadd.f32 %v4299_v6, %v2572_v41 }
0x102c   :  { %v2579_v53 = vmax.f32 %v2573_v47, 0.0 }
0x102e   :  { %v2583_v21 = vadd.f32 %v2579_v53, %v2528_v29 }
0x1031   :  { %v2574_v1 = vpop.f32.mrf.mxu0 }
0x1032   :  { %v2575_v59 = vadd.f32 %v4299_v6, %v2574_v1 }
0x1034   :  { %v2580_v49 = vmax.f32 %v2575_v59, 0.0 }
0x1036   :  { %v2584_v56 = vadd.f32 %v2580_v49, %v2529_v58 }
0x1038   :  { %v2586_v63 = vpack.c.bf16 %v2584_v56, %v2583_v21 }
0x103a   :  { %4112 = vmatmul.msk.bf16.gmra.mxu3 %vm1196_vm4, %v2586_v63 }
0x10ad   :  { %v2622_v57 = vpop.f32.mrf.mxu3 }
0x10ae   :  { %v2623_v36 = vadd.f32 %v4300_v9, %v2622_v57 }
0x10b0   :  { %v2668_v45 = vpack.c.bf16 %v2623_v36, %v2623_v36 }
0x10b2   :  { %v2674_v55 = vunpack.c.l.b16 %v2668_v45 }
0x10b5   :  { %v2624_v50 = vpop.f32.mrf.mxu3 }
0x10b6   :  { %v2625_v30 = vadd.f32 %v4300_v9, %v2624_v50 }
0x10b8   :  { %v2669_v51 = vpack.c.bf16 %v2625_v30, %v2625_v30 }
0x10ba   :  { %v2675_v28 = vunpack.c.l.b16 %v2669_v51 }
0x10bc   :  { %v6216_v32 = vpack.c.b16 %v2675_v28, %v2674_v55 }
0x10bd   :  { %v2627_v5 = vpop.f32.mrf.mxu3 }
0x10be   :  { %3028 = vrot.lane.b32.xlu0 %v6216_v32, %s5194_s15  ;;  %2789 = vrot.lane.b32.xlu2 %v6216_v32, %s5192_s25  ;;  %v2681_v11 = vsel %vm483_vm1, %v6216_v32, 0  ;;  %v2628_v13 = vadd.f32 %v4300_v9, %v2627_v5 }
0x10bf   :  { %2690 = vmatpush.bf16.xpose.msra.mxu2 %v2681_v11 }
0x10c0   :  { %v2670_v10 = vpack.c.bf16 %v2628_v13, %v2628_v13 }
0x10c2   :  { %v2698_v61 = vunpack.c.l.b16 %v2670_v10 }
0x10c5   :  { %v2629_v54 = vpop.f32.mrf.mxu3 }
0x10c6   :  { %v2630_v14 = vadd.f32 %v4300_v9, %v2629_v54  ;;  %2910 = vrot.lane.b32.xlu2 %v6216_v32, %s5193_s1  ;;  %4122 = vmatmul.msk.bf16.vlgmr.msra.gmra.mxu2 %vm483_vm1, %v6161_v40 }
0x10c8   :  { %v2671_v52 = vpack.c.bf16 %v2630_v14, %v2630_v14 }
0x10ca   :  { %v2699_v15 = vunpack.c.l.b16 %v2671_v52 }
0x10cc   :  { %v6228_v12 = vpack.c.b16 %v2699_v15, %v2698_v61 }
0x10ce   :  { %3051 = vrot.lane.b32.xlu0 %v6228_v12, %s5194_s15  ;;  %2933 = vrot.lane.b32.xlu2 %v6228_v12, %s5193_s1  ;;  %v2705_v18 = vsel %vm483_vm1, %v6228_v12, 0 }
0x10cf   :  { %2815 = vrot.lane.b32.xlu1 %v6228_v12, %s5192_s25  ;;  %2714 = vmatpush.bf16.xpose.msra.mxu1 %v2705_v18 }
0x10d6   :  { %2744 = vrot.lane.b32.xlu0 %v6216_v32, %s5191_s12  ;;  %3026 = vrot.lane.b32.xlu2 %v6167_v43, %s5194_s15 }
0x10d7   :  { %2908 = vrot.lane.b32.xlu1 %v6167_v43, %s5193_s1  ;;  %4123 = vmatmul.msk.bf16.vlgmr.msra.gmra.mxu1 %vm483_vm1, %v6171_v44  ;;  %v2814_v43 = vpop.permute.xlu0 %2813 }
0x10df   :  { %2931 = vrot.lane.b32.xlu1 %v6176_v48, %s5193_s1 }
0x10e7   :  { %3049 = vrot.lane.b32.xlu1 %v6176_v48, %s5194_s15 }
0x1118   :  { %v2790_v40 = vpop.permute.xlu2 %2789 }
0x1119   :  { %v2795_v62 = vsel %vm483_vm1, %v2790_v40, 0 }
0x111a   :  { %2804 = vmatpush.bf16.xpose.msra.mxu3 %v2795_v62 }
0x1120   :  { %v2911_v38 = vpop.permute.xlu2 %2910 }
0x1121   :  { %v2916_v23 = vsel %vm483_vm1, %v2911_v38, 0  ;;  %4126 = vmatmul.msk.bf16.vlgmr.msra.gmra.mxu3 %vm483_vm1, %v2788_v20 }
0x1122   :  { %2925 = vmatpush.bf16.xpose.msrb.mxu3 %v2916_v23 }
0x1128   :  { %v2934_v39 = vpop.permute.xlu2 %2933 }
0x1129   :  { %v2939_v46 = vsel %vm483_vm1, %v2934_v39, 0 }
0x1130   :  { %v3029_v22 = vpop.permute.xlu0 %3028  ;;  %v3027_v42 = vpop.permute.xlu2 %3026 }
0x1131   :  { %v3034_v44 = vsel %vm483_vm1, %v3029_v22, 0 }
0x1132   :  { %3043 = vmatpush.bf16.xpose.msra.mxu3 %v3034_v44 }
0x1140   :  { %v3052_v27 = vpop.permute.xlu0 %3051 }
0x1141   :  { %v2816_v7 = vpop.permute.xlu1 %2815  ;;  %v3057_v25 = vsel %vm483_vm1, %v3052_v27, 0 }
0x1142   :  { %v2821_v48 = vsel %vm483_vm1, %v2816_v7, 0 }
0x1143   :  { %2830 = vmatpush.bf16.xpose.msrb.mxu1 %v2821_v48 }
0x1148   :  { %v2745_v0 = vpop.permute.xlu0 %2744 }
0x1149   :  { %v2909_v26 = vpop.permute.xlu1 %2908  ;;  %v2692_v31 = vpop.f32.mrf.mxu2  ;;  %2757 = vmatpush.bf16.msrb.mxu2 %v2745_v0 }
0x114a   :  { %4127 = vmatmul.msk.bf16.vlgmr.msrb.gmra.mxu1 %vm483_vm1, %v2814_v43  ;;  %4130 = vmatmul.msk.bf16.vlgmr.msrb.gmra.mxu3 %vm483_vm1, %v2909_v26  ;;  %v2720_v58 = vsel %vm1164_vm2, %v2692_v31, -inf }
0x114b   :  { %2948 = vmatpush.bf16.xpose.msra.mxu1 %v2939_v46  ;;  %2721 = vmax.xlane.f32.xlu2 %v2720_v58 }
0x1151   :  { %v2694_v29 = vpop.f32.mrf.mxu2  ;;  %v2932_v24 = vpop.permute.xlu1 %2931 }
0x1153   :  { %3066 = vmatpush.bf16.xpose.msrb.mxu1 %v3057_v25 }
0x1154   :  { %v2716_v33 = vpop.f32.mrf.mxu1 }
0x1155   :  { %v2723_v35 = vsel %vm1164_vm2, %v2716_v33, -inf }
0x1156   :  { %2724 = vmax.xlane.f32.xlu0 %v2723_v35 }
0x1159   :  { %v3050_v3 = vpop.permute.xlu1 %3049 }
0x115a   :  { %4131 = vmatmul.msk.bf16.vlgmr.msra.gmra.mxu1 %vm483_vm1, %v2932_v24  ;;  %4134 = vmatmul.msk.bf16.vlgmr.msra.gmra.mxu3 %vm483_vm1, %v3027_v42 }
0x115c   :  { %v2718_v6 = vpop.f32.mrf.mxu1 }
0x116a   :  { %4135 = vmatmul.msk.bf16.vlgmr.msrb.gmra.mxu1 %vm483_vm1, %v3050_v3 }
0x11a4   :  { %v2806_v2 = vpop.f32.mrf.mxu3 }
0x11a5   :  { %v2836_v34 = vsel %vm1164_vm2, %v2806_v2, -inf }
0x11a6   :  { %2837 = vmax.xlane.f32.xlu1 %v2836_v34 }
0x11ac   :  { %v2808_v60 = vpop.f32.mrf.mxu3 }
0x11be   :  { %v2722_v8 = vpop.xlane.xlu2 %2721 }
0x11bf   :  { %v2726_v17 = vsub.f32 %v2692_v31, %v2722_v8 }
0x11c1   :  { %v2728_v37 = vmul.f32 1.442695, %v2726_v17 }
0x11c3   :  { %4466 = vpow2.f32 %v2728_v37 }
0x11c7   :  { %v2832_v4 = vpop.f32.mrf.mxu1 }
0x11c8   :  { %v2839_v41 = vsel %vm1164_vm2, %v2832_v4, -inf }
0x11c9   :  { %v4467_v47 = vpop.eup %4466  ;;  %v2725_v1 = vpop.xlane.xlu0 %2724  ;;  %2840 = vmax.xlane.f32.xlu2 %v2839_v41 }
0x11ca   :  { %v2727_v53 = vsub.f32 %v2716_v33, %v2725_v1  ;;  %v2732_v59 = vsel %vm1164_vm2, %v4467_v47, 0.0 }
0x11cb   :  { %2733 = vadd.xlane.f32.xlu0 %v2732_v59 }
0x11cc   :  { %v2730_v49 = vmul.f32 1.442695, %v2727_v53 }
0x11cd   :  { %v2927_v21 = vpop.f32.mrf.mxu3 }
0x11ce   :  { %4468 = vpow2.f32 %v2730_v49  ;;  %v2954_v63 = vsel %vm1164_vm2, %v2927_v21, -inf }
0x11cf   :  { %v2834_v56 = vpop.f32.mrf.mxu1 }
0x11d3   :  { %2955 = vmax.xlane.f32.xlu0 %v2954_v63 }
0x11d4   :  { %v6268_v57 = vpop.eup %4468 }
0x11d5   :  { %v2929_v9 = vpop.f32.mrf.mxu3  ;;  %v2735_v36 = vsel %vm1164_vm2, %v6268_v57, 0.0 }
0x11d6   :  { %2736 = vadd.xlane.f32.xlu2 %v2735_v36 }
0x11d7   :  { %v2950_v50 = vpop.f32.mrf.mxu1 }
0x11d8   :  { %v2957_v45 = vsel %vm1164_vm2, %v2950_v50, -inf }
0x11d9   :  { %2958 = vmax.xlane.f32.xlu1 %v2957_v45 }
0x11dd   :  { %v6273_v30 = vpop.f32.mrf.mxu3 }
0x11de   :  { %v3072_v51 = vsel %vm1164_vm2, %v6273_v30, -inf }
0x11df   :  { %3073 = vmax.xlane.f32.xlu2 %v3072_v51  ;;  %v2952_v55 = vpop.f32.mrf.mxu1 }
0x11e5   :  { %v3047_v28 = vpop.f32.mrf.mxu3 }
0x11e7   :  { %v3068_v5 = vpop.f32.mrf.mxu1  ;;  %2879 = vrot.lane.b32.xlu0 %v6228_v12, %s5195_s26 }
0x11e8   :  { %v3075_v11 = vsel %vm1164_vm2, %v3068_v5, -inf }
0x11e9   :  { %3076 = vmax.xlane.f32.xlu1 %v3075_v11 }
0x11ef   :  { %v3070_v13 = vpop.f32.mrf.mxu1 }
0x11f7   :  { %2860 = vrot.lane.b32.xlu2 %v6216_v32, %s5195_s26 }
0x11ff   :  { %2978 = vrot.lane.b32.xlu2 %v6216_v32, %s5196_s5 }
0x1202   :  { %2763 = vrot.lane.b32.xlu1 %v6228_v12, %s5191_s12 }
0x1219   :  { %v2838_v54 = vpop.xlane.xlu1 %2837 }
0x121a   :  { %v2842_v10 = vsub.f32 %v2806_v2, %v2838_v54 }
0x121c   :  { %v2844_v14 = vmul.f32 1.442695, %v2842_v10 }
0x121e   :  { %4470 = vpow2.f32 %v2844_v14 }
0x1224   :  { %v6286_v52 = vpop.eup %4470 }
0x1225   :  { %v2848_v61 = vsel %vm1164_vm2, %v6286_v52, 0.0 }
0x1228   :  { %2849 = vadd.xlane.f32.xlu2 %v2848_v61 }
0x123c   :  { %v2841_v15 = vpop.xlane.xlu2 %2840 }
0x123d   :  { %v2843_v18 = vsub.f32 %v2832_v4, %v2841_v15 }
0x123e   :  { %v2734_v40 = vpop.xlane.xlu0 %2733 }
0x123f   :  { %v2846_v62 = vmul.f32 1.442695, %v2843_v18  ;;  %4472 = vrcp.f32 %v2734_v40 }
0x1241   :  { %4474 = vpow2.f32 %v2846_v62 }
0x1245   :  { %v4473_v20 = vpop.eup %4472 }
0x1246   :  { %v2740_v38 = vmul.f32 %v4473_v20, %v4467_v47  ;;  %v2956_v23 = vpop.xlane.xlu0 %2955 }
0x1247   :  { %v4475_v43 = vpop.eup %4474  ;;  %v2960_v22 = vsub.f32 %v2927_v21, %v2956_v23 }
0x1248   :  { %v2742_v44 = vpack.c.bf16 %v2740_v38, %v2740_v38  ;;  %v2851_v39 = vsel %vm1164_vm2, %v4475_v43, 0.0 }
0x1249   :  { %v2962_v27 = vmul.f32 1.442695, %v2960_v22  ;;  %2852 = vadd.xlane.f32.xlu2 %v2851_v39  ;;  %v2737_v7 = vpop.xlane.xlu2 %2736 }
0x124a   :  { %4124 = vmatmul.msk.bf16.vlgmr.msrb.gmra.mxu2 %vm1164_vm2, %v2742_v44 }
0x124b   :  { %4476 = vpow2.f32 %v2962_v27 }
0x124c   :  { %v2959_v48 = vpop.xlane.xlu1 %2958 }
0x124d   :  { %v2961_v46 = vsub.f32 %v2950_v50, %v2959_v48 }
0x124f   :  { %v2964_v0 = vmul.f32 1.442695, %v2961_v46 }
0x1251   :  { %v4477_v26 = vpop.eup %4476  ;;  %4478 = vpow2.f32 %v2964_v0 }
0x1252   :  { %v3074_v31 = vpop.xlane.xlu2 %3073  ;;  %v2966_v25 = vsel %vm1164_vm2, %v4477_v26, 0.0 }
0x1253   :  { %2967 = vadd.xlane.f32.xlu1 %v2966_v25  ;;  %v3078_v4 = vsub.f32 %v6273_v30, %v3074_v31  ;;  %v4214_v25 = vld [vmem:[#allocation31 + $0x8] sm:$0xff] }
0x1254   :  { %3180 = vmatpush.bf16.msrb.mxu3 %v4214_v25 }
0x1255   :  { %v3080_v41 = vmul.f32 1.442695, %v3078_v4 }
0x1257   :  { %v4479_v58 = vpop.eup %4478 }
0x1258   :  { %v2969_v29 = vsel %vm1164_vm2, %v4479_v58, 0.0 }
0x1259   :  { %2970 = vadd.xlane.f32.xlu0 %v2969_v29  ;;  %v2880_v17 = vpop.permute.xlu0 %2879 }
0x125a   :  { %v2861_v33 = vpop.permute.xlu2 %2860 }
0x125b   :  { %2873 = vmatpush.bf16.msra.mxu2 %v2861_v33 }
0x125c   :  { %v3077_v35 = vpop.xlane.xlu1 %3076 }
0x125d   :  { %v3079_v42 = vsub.f32 %v3068_v5, %v3077_v35 }
0x125f   :  { %v3082_v24 = vmul.f32 1.442695, %v3079_v42 }
0x1261   :  { %4480 = vpow2.f32 %v3082_v24  ;;  %2997 = vrot.lane.b32.xlu2 %v6228_v12, %s5196_s5 }
0x1262   :  { %v2979_v6 = vpop.permute.xlu2 %2978  ;;  %4482 = vrcp.f32 %v2737_v7 }
0x1263   :  { %2991 = vmatpush.bf16.msrb.mxu2 %v2979_v6  ;;  %4484 = vpow2.f32 %v3080_v41 }
0x1267   :  { %v4481_v3 = vpop.eup %4480 }
0x1268   :  { %v3087_v2 = vsel %vm1164_vm2, %v4481_v3, 0.0  ;;  %v4483_v34 = vpop.eup %4482 }
0x1269   :  { %3088 = vadd.xlane.f32.xlu1 %v3087_v2  ;;  %v2741_v60 = vmul.f32 %v4483_v34, %v6268_v57  ;;  %v4485_v47 = vpop.eup %4484 }
0x126b   :  { %v2743_v37 = vpack.c.bf16 %v2741_v60, %v2741_v60 }
0x126d   :  { %3096 = vrot.lane.b32.xlu0 %v6216_v32, %s5197_s0  ;;  %v3084_v32 = vsel %vm1164_vm2, %v4485_v47, 0.0 }
0x1274   :  { %v2764_v8 = vpop.permute.xlu1 %2763 }
0x1275   :  { %2776 = vmatpush.bf16.msrb.mxu0 %v2764_v8 }
0x1278   :  { %4125 = vmatmul.msk.bf16.vlgmr.msrb.gmra.mxu0 %vm1164_vm2, %v2743_v37 }
0x1279   :  { %2892 = vmatpush.bf16.msra.mxu0 %v2880_v17 }
0x1282   :  { %3115 = vrot.lane.b32.xlu1 %v6228_v12, %s5197_s0 }
0x128a   :  { %3085 = vadd.xlane.f32.xlu2 %v3084_v32 }
0x129b   :  { %v2850_v1 = vpop.xlane.xlu2 %2849 }
0x129c   :  { %4486 = vrcp.f32 %v2850_v1 }
0x12a2   :  { %v4487_v53 = vpop.eup %4486 }
0x12a3   :  { %v2856_v59 = vmul.f32 %v4487_v53, %v6286_v52 }
0x12a5   :  { %v2858_v49 = vpack.c.bf16 %v2856_v59, %v2856_v59 }
0x12a7   :  { %4128 = vmatmul.msk.bf16.vlgmr.msra.gmra.mxu2 %vm1164_vm2, %v2858_v49 }
0x12bc   :  { %v2853_v21 = vpop.xlane.xlu2 %2852 }
0x12bd   :  { %4488 = vrcp.f32 %v2853_v21  ;;  %v4215_v21 = vld [vmem:[#allocation32] sm:$0xff] }
0x12c3   :  { %v4489_v56 = vpop.eup %4488 }
0x12c4   :  { %v2857_v63 = vmul.f32 %v4489_v56, %v4475_v43  ;;  %v2998_v57 = vpop.permute.xlu2 %2997 }
0x12c5   :  { %3010 = vmatpush.bf16.msrb.mxu0 %v2998_v57 }
0x12c6   :  { %v2859_v9 = vpack.c.bf16 %v2857_v63, %v2857_v63  ;;  %v2968_v12 = vpop.xlane.xlu1 %2967  ;;  %v4301_v63 = vld [vmem:[%s6537_s11] ss:$0 sm:$0xff] }
0x12c7   :  { %4490 = vrcp.f32 %v2968_v12 }
0x12c8   :  { %4129 = vmatmul.msk.bf16.vlgmr.msra.gmra.mxu0 %vm1164_vm2, %v2859_v9 }
0x12cc   :  { %v2971_v36 = vpop.xlane.xlu0 %2970 }
0x12cd   :  { %v4491_v50 = vpop.eup %4490  ;;  %4492 = vrcp.f32 %v2971_v36  ;;  %v2759_v45 = vpop.f32.mrf.mxu2 }
0x12ce   :  { %v2974_v30 = vmul.f32 %v4491_v50, %v4477_v26  ;;  %v2782_v60 = vadd.f32 %v2759_v45, %v6157_v19 }
0x12d0   :  { %v2976_v51 = vpack.c.bf16 %v2974_v30, %v2974_v30 }
0x12d2   :  { %4132 = vmatmul.msk.bf16.vlgmr.msrb.gmra.mxu2 %vm1164_vm2, %v2976_v51  ;;  %v6336_v51 = vld [vmem:[%s6538_s27] sm:$0x1] }
0x12d3   :  { %v4493_v55 = vpop.eup %4492 }
0x12d4   :  { %v2975_v28 = vmul.f32 %v4493_v55, %v4479_v58  ;;  %v4213_v58 = vld [vmem:[#allocation31] sm:$0xff]  ;;  %v3231_v55 = vpack.c.bf16 %v6336_v51, %v6336_v51 }
0x12d5   :  { %v2761_v5 = vpop.f32.mrf.mxu2  ;;  %3181 = vmatpush.bf16.msrb.mxu3 %v4213_v58 }
0x12d6   :  { %v2977_v11 = vpack.c.bf16 %v2975_v28, %v2975_v28  ;;  %v3371_v28 = vunpack.c.l.b16 %v3231_v55 }
0x12d8   :  { %4133 = vmatmul.msk.bf16.vlgmr.msrb.gmra.mxu0 %vm1164_vm2, %v2977_v11  ;;  %v3372_v5 = vpack.c.b16 %v3371_v28, %v3371_v28  ;;  %v4302_v11 = vld [vmem:[%s6539_s13] ss:$0 sm:$0xff] }
0x12dc   :  { %v3089_v54 = vpop.xlane.xlu1 %3088 }
0x12dd   :  { %4494 = vrcp.f32 %v3089_v54 }
0x12df   :  { %v3097_v13 = vpop.permute.xlu0 %3096 }
0x12e0   :  { %3109 = vmatpush.bf16.msra.mxu2 %v3097_v13 }
0x12e3   :  { %v4495_v10 = vpop.eup %4494 }
0x12e4   :  { %v3093_v14 = vmul.f32 %v4495_v10, %v4481_v3 }
0x12e6   :  { %v3095_v15 = vpack.c.bf16 %v3093_v14, %v3093_v14 }
0x12f4   :  { %v3116_v52 = vpop.permute.xlu1 %3115 }
0x12f5   :  { %v2778_v61 = vpop.f32.mrf.mxu0  ;;  %3128 = vmatpush.bf16.msra.mxu0 %v3116_v52 }
0x12f6   :  { %v2783_v8 = vadd.f32 %v2778_v61, %v6164_v16 }
0x12f8   :  { %4137 = vmatmul.msk.bf16.vlgmr.msra.gmra.mxu0 %vm1164_vm2, %v3095_v15 }
0x12fd   :  { %v3086_v18 = vpop.xlane.xlu2 %3085  ;;  %v2780_v40 = vpop.f32.mrf.mxu0 }
0x12fe   :  { %4496 = vrcp.f32 %v3086_v18 }
0x1304   :  { %v4497_v62 = vpop.eup %4496 }
0x1305   :  { %v3092_v20 = vmul.f32 %v4497_v62, %v4485_v47 }
0x1307   :  { %v3094_v38 = vpack.c.bf16 %v3092_v20, %v3092_v20 }
0x1309   :  { %4136 = vmatmul.msk.bf16.vlgmr.msra.gmra.mxu2 %vm1164_vm2, %v3094_v38 }
0x132a   :  { %v2875_v23 = vpop.f32.mrf.mxu2 }
0x132b   :  { %2900 = vrot.lane.b32.xlu0 %v2875_v23, %s5166_s16 }
0x1332   :  { %v2877_v43 = vpop.f32.mrf.mxu2 }
0x1345   :  { %v2894_v22 = vpop.f32.mrf.mxu0 }
0x1346   :  { %2902 = vrot.lane.b32.xlu0 %v2894_v22, %s5166_s16 }
0x134d   :  { %v2896_v44 = vpop.f32.mrf.mxu0 }
0x1355   :  { %v3012_v39 = vpop.f32.mrf.mxu0  ;;  %v2993_v27 = vpop.f32.mrf.mxu2 }
0x1356   :  { %3020 = vrot.lane.b32.xlu1 %v3012_v39, %s5198_s30  ;;  %3018 = vrot.lane.b32.xlu2 %v2993_v27, %s5198_s30 }
0x135d   :  { %v3014_v7 = vpop.f32.mrf.mxu0  ;;  %v2995_v48 = vpop.f32.mrf.mxu2 }
0x1375   :  { %v3130_v46 = vpop.f32.mrf.mxu0 }
0x1376   :  { %3138 = vrot.lane.b32.xlu1 %v3130_v46, %s5199_s23 }
0x137d   :  { %v3132_v0 = vpop.f32.mrf.mxu0 }
0x137e   :  { %3373 = vrot.lane.b32.xlu1 %v3372_v5, %s5192_s25 }
0x1386   :  { %3516 = vrot.lane.b32.xlu1 %v3372_v5, %s5193_s1 }
0x138c   :  { %v3111_v26 = vpop.f32.mrf.mxu2 }
0x138d   :  { %3136 = vrot.lane.b32.xlu0 %v3111_v26, %s5199_s23 }
0x138e   :  { %3659 = vrot.lane.b32.xlu1 %v3372_v5, %s5194_s15 }
0x1394   :  { %v3113_v31 = vpop.f32.mrf.mxu2 }
0x139d   :  { %v2901_v29 = vpop.permute.xlu0 %2900 }
0x139e   :  { %v2906_v6 = vadd.f32 %v2901_v29, %v6157_v19 }
0x13a0   :  { %v3144_v4 = vsel %vm483_vm1, %v2782_v60, %v2906_v6 }
0x13b0   :  { %v3019_v42 = vpop.permute.xlu2 %3018 }
0x13b1   :  { %v3024_v2 = vadd.f32 %v3019_v42, %v6157_v19 }
0x13b3   :  { %v3146_v32 = vsel %vm1164_vm2, %v3144_v4, %v3024_v2 }
0x13b8   :  { %v2903_v35 = vpop.permute.xlu0 %2902 }
0x13b9   :  { %v2907_v3 = vadd.f32 %v2903_v35, %v6164_v16 }
0x13bb   :  { %v3145_v41 = vsel %vm483_vm1, %v2783_v8, %v2907_v3 }
0x13c8   :  { %v3021_v33 = vpop.permute.xlu1 %3020 }
0x13c9   :  { %v3025_v34 = vadd.f32 %v3021_v33, %v6164_v16 }
0x13cb   :  { %v3147_v1 = vsel %vm1164_vm2, %v3145_v41, %v3025_v34 }
0x13e8   :  { %v3139_v24 = vpop.permute.xlu1 %3138 }
0x13e9   :  { %v3143_v17 = vadd.f32 %v3139_v24, %v6164_v16  ;;  %v4216_v16 = vld [vmem:[#allocation32 + $0x8] sm:$0xff] }
0x13ea   :  { %3222 = vmatpush.bf16.msra.mxu1 %v4216_v16 }
0x13eb   :  { %v3149_v53 = vsel %vm1169_vm3, %v3147_v1, %v3143_v17 }
0x13ee   :  { %3223 = vmatpush.bf16.msra.mxu1 %v4215_v21 }
0x13f0   :  { %v3374_v27 = vpop.permute.xlu1 %3373 }
0x13f8   :  { %v3517_v58 = vpop.permute.xlu1 %3516 }
0x13ff   :  { %v3137_v37 = vpop.permute.xlu0 %3136 }
0x1400   :  { %v3142_v47 = vadd.f32 %v3137_v37, %v6157_v19  ;;  %v3660_v3 = vpop.permute.xlu1 %3659 }
0x1402   :  { %v3148_v59 = vsel %vm1169_vm3, %v3146_v32, %v3142_v47 }
0x1403   :  { %v3150_v49 = vpack.c.bf16 %v3149_v53, %v3148_v59 }
0x1405   :  { %4146 = vmatmul.msk.bf16.vlgmr.msrb.gmra.mxu3 %vm1196_vm4, %v3150_v49 }
0x1488   :  { %v3183_v56 = vpop.f32.mrf.mxu3 }
0x1489   :  { %v3184_v19 = vadd.f32 %v4301_v63, %v3183_v56 }
0x148b   :  { %v3188_v9 = vmax.f32 %v3184_v19, 0.0 }
0x148d   :  { %v3190_v50 = vadd.f32 %v3188_v9, %v3148_v59 }
0x1490   :  { %v3185_v57 = vpop.f32.mrf.mxu3 }
0x1491   :  { %v3186_v12 = vadd.f32 %v4301_v63, %v3185_v57 }
0x1493   :  { %v3189_v36 = vmax.f32 %v3186_v12, 0.0 }
0x1495   :  { %v3191_v45 = vadd.f32 %v3189_v36, %v3149_v53 }
0x1497   :  { %v3192_v30 = vpack.c.bf16 %v3191_v45, %v3190_v50 }
0x1499   :  { %4155 = vmatmul.msk.bf16.vlgmr.msra.gmra.mxu1 %vm1196_vm4, %v3192_v30 }
0x1516   :  { %v3225_v13 = vpop.f32.mrf.mxu1 }
0x1517   :  { %v3226_v54 = vadd.f32 %v4302_v11, %v3225_v13 }
0x1519   :  { %v3232_v10 = vpack.c.bf16 %v3226_v54, %v3226_v54 }
0x151b   :  { %v3238_v14 = vsel %vm483_vm1, %v3232_v10, 0  ;;  %v3321_v52 = vunpack.c.l.b16 %v3232_v10 }
0x151c   :  { %3247 = vmatpush.bf16.xpose.msrb.mxu2 %v3238_v14 }
0x151d   :  { %v6345_v61 = vpack.c.b16 %v3321_v52, %v3321_v52 }
0x151e   :  { %v3227_v15 = vpop.f32.mrf.mxu1 }
0x151f   :  { %v3228_v18 = vadd.f32 %v4302_v11, %v3227_v15  ;;  %3518 = vrot.lane.b32.xlu2 %v6345_v61, %s5193_s1  ;;  %3375 = vrot.lane.b32.xlu0 %v6345_v61, %s5192_s25 }
0x1521   :  { %v3233_v40 = vpack.c.bf16 %v3228_v18, %v3228_v18 }
0x1523   :  { %v3254_v62 = vsel %vm483_vm1, %v3233_v40, 0  ;;  %v3345_v20 = vunpack.c.l.b16 %v3233_v40  ;;  %4156 = vmatmul.msk.bf16.vlgmr.msrb.gmra.mxu2 %vm483_vm1, %v3231_v55 }
0x1524   :  { %3263 = vmatpush.bf16.xpose.msrb.mxu0 %v3254_v62 }
0x1525   :  { %v6353_v38 = vpack.c.b16 %v3345_v20, %v3345_v20 }
0x1527   :  { %3661 = vrot.lane.b32.xlu2 %v6345_v61, %s5194_s15  ;;  %3396 = vrot.lane.b32.xlu0 %v6353_v38, %s5192_s25 }
0x152b   :  { %4157 = vmatmul.msk.bf16.vlgmr.msrb.gmra.mxu0 %vm483_vm1, %v3231_v55 }
0x152f   :  { %3539 = vrot.lane.b32.xlu0 %v6353_v38, %s5193_s1 }
0x1537   :  { %3682 = vrot.lane.b32.xlu0 %v6353_v38, %s5194_s15 }
0x1579   :  { %v3519_v23 = vpop.permute.xlu2 %3518 }
0x157a   :  { %v3524_v44 = vsel %vm483_vm1, %v3519_v23, 0 }
0x1581   :  { %v3662_v39 = vpop.permute.xlu2 %3661 }
0x1582   :  { %v3667_v48 = vsel %vm483_vm1, %v3662_v39, 0 }
0x1591   :  { %v3376_v43 = vpop.permute.xlu0 %3375 }
0x1592   :  { %v3381_v22 = vsel %vm483_vm1, %v3376_v43, 0 }
0x1593   :  { %3390 = vmatpush.bf16.xpose.msra.mxu2 %v3381_v22 }
0x1599   :  { %v3397_v7 = vpop.permute.xlu0 %3396 }
0x159a   :  { %v3399_v46 = vsel %vm483_vm1, %v3397_v7, 0  ;;  %4160 = vmatmul.msk.bf16.vlgmr.msra.gmra.mxu2 %vm483_vm1, %v3374_v27 }
0x159b   :  { %3533 = vmatpush.bf16.xpose.msrb.mxu2 %v3524_v44  ;;  %3408 = vmatpush.bf16.xpose.msra.mxu0 %v3399_v46 }
0x15a1   :  { %v3540_v0 = vpop.permute.xlu0 %3539 }
0x15a2   :  { %v3542_v26 = vsel %vm483_vm1, %v3540_v0, 0  ;;  %4161 = vmatmul.msk.bf16.vlgmr.msra.gmra.mxu0 %vm483_vm1, %v3374_v27 }
0x15a3   :  { %3676 = vmatpush.bf16.xpose.msra.mxu2 %v3667_v48  ;;  %3551 = vmatpush.bf16.xpose.msrb.mxu0 %v3542_v26 }
0x15a6   :  { %v3249_v31 = vpop.f32.mrf.mxu2 }
0x15a7   :  { %v3270_v25 = vsel %vm3269_vm5, %v3249_v31, -inf }
0x15a8   :  { %v3265_v29 = vpop.f32.mrf.mxu0  ;;  %3271 = vmax.xlane.f32.xlu2 %v3270_v25 }
0x15a9   :  { %v3683_v33 = vpop.permute.xlu0 %3682  ;;  %v3273_v35 = vsel %vm3269_vm5, %v3265_v29, -inf }
0x15aa   :  { %v3685_v42 = vsel %vm483_vm1, %v3683_v33, 0  ;;  %3274 = vmax.xlane.f32.xlu1 %v3273_v35  ;;  %4164 = vmatmul.msk.bf16.vlgmr.msrb.gmra.mxu2 %vm483_vm1, %v3517_v58 }
0x15ab   :  { %3694 = vmatpush.bf16.xpose.msra.mxu0 %v3685_v42 }
0x15ae   :  { %v3251_v24 = vpop.f32.mrf.mxu2 }
0x15b0   :  { %v3267_v6 = vpop.f32.mrf.mxu0 }
0x15b2   :  { %4165 = vmatmul.msk.bf16.vlgmr.msrb.gmra.mxu0 %vm483_vm1, %v3517_v58 }
0x15ba   :  { %4168 = vmatmul.msk.bf16.vlgmr.msra.gmra.mxu2 %vm483_vm1, %v3660_v3 }
0x15c2   :  { %4169 = vmatmul.msk.bf16.vlgmr.msra.gmra.mxu0 %vm483_vm1, %v3660_v3 }
0x161b   :  { %v3272_v2 = vpop.xlane.xlu2 %3271 }
0x161c   :  { %v3276_v34 = vsub.f32 %v3249_v31, %v3272_v2 }
0x161d   :  { %v3275_v60 = vpop.xlane.xlu1 %3274  ;;  %v3392_v8 = vpop.f32.mrf.mxu2 }
0x161e   :  { %v3278_v17 = vmul.f32 1.442695, %v3276_v34  ;;  %v3277_v37 = vsub.f32 %v3265_v29, %v3275_v60  ;;  %v3414_v4 = vsel %vm3269_vm5, %v3392_v8, -inf }
0x161f   :  { %v3410_v41 = vpop.f32.mrf.mxu0  ;;  %3415 = vmax.xlane.f32.xlu0 %v3414_v4 }
0x1620   :  { %4498 = vpow2.f32 %v3278_v17  ;;  %v3280_v47 = vmul.f32 1.442695, %v3277_v37  ;;  %v3417_v32 = vsel %vm3269_vm5, %v3410_v41, -inf }
0x1621   :  { %3418 = vmax.xlane.f32.xlu2 %v3417_v32 }
0x1622   :  { %4500 = vpow2.f32 %v3280_v47 }
0x1625   :  { %v3394_v1 = vpop.f32.mrf.mxu2 }
0x1626   :  { %v6380_v53 = vpop.eup %4498 }
0x1627   :  { %v3412_v59 = vpop.f32.mrf.mxu0  ;;  %v3282_v49 = vsel %vm3269_vm5, %v6380_v53, 0.0 }
0x1628   :  { %v6384_v16 = vpop.eup %4500  ;;  %3283 = vadd.xlane.f32.xlu1 %v3282_v49 }
0x1629   :  { %v3285_v21 = vsel %vm3269_vm5, %v6384_v16, 0.0 }
0x162a   :  { %3286 = vadd.xlane.f32.xlu2 %v3285_v21 }
0x162d   :  { %v3535_v56 = vpop.f32.mrf.mxu2 }
0x162e   :  { %v3557_v63 = vsel %vm3269_vm5, %v3535_v56, -inf }
0x162f   :  { %v3553_v19 = vpop.f32.mrf.mxu0 }
0x1630   :  { %3558 = vmax.xlane.f32.xlu1 %v3557_v63  ;;  %v3560_v57 = vsel %vm3269_vm5, %v3553_v19, -inf }
0x1631   :  { %3561 = vmax.xlane.f32.xlu0 %v3560_v57 }
0x1635   :  { %v3537_v9 = vpop.f32.mrf.mxu2 }
0x1637   :  { %v3555_v12 = vpop.f32.mrf.mxu0 }
0x163d   :  { %v3678_v36 = vpop.f32.mrf.mxu2 }
0x163e   :  { %v3700_v50 = vsel %vm3269_vm5, %v3678_v36, -inf }
0x163f   :  { %v6391_v45 = vpop.f32.mrf.mxu0  ;;  %3701 = vmax.xlane.f32.xlu2 %v3700_v50 }
0x1640   :  { %v3703_v30 = vsel %vm3269_vm5, %v6391_v45, -inf }
0x1641   :  { %3704 = vmax.xlane.f32.xlu0 %v3703_v30 }
0x1645   :  { %v3680_v55 = vpop.f32.mrf.mxu2 }
0x1647   :  { %v3698_v28 = vpop.f32.mrf.mxu0 }
0x1649   :  { %3347 = vrot.lane.b32.xlu1 %v6353_v38, %s5191_s12 }
0x1651   :  { %3485 = vrot.lane.b32.xlu1 %v6353_v38, %s5195_s26 }
0x1655   :  { %3323 = vrot.lane.b32.xlu0 %v6345_v61, %s5191_s12 }
0x1657   :  { %3464 = vrot.lane.b32.xlu2 %v6345_v61, %s5195_s26 }
0x1692   :  { %v3416_v5 = vpop.xlane.xlu0 %3415 }
0x1693   :  { %v3420_v11 = vsub.f32 %v3392_v8, %v3416_v5 }
0x1694   :  { %v3419_v13 = vpop.xlane.xlu2 %3418 }
0x1695   :  { %v3422_v54 = vmul.f32 1.442695, %v3420_v11  ;;  %v3421_v10 = vsub.f32 %v3410_v41, %v3419_v13 }
0x1697   :  { %4502 = vpow2.f32 %v3422_v54  ;;  %v3424_v14 = vmul.f32 1.442695, %v3421_v10 }
0x1699   :  { %4504 = vpow2.f32 %v3424_v14 }
0x169b   :  { %v6403_v52 = vpop.xlane.xlu1 %3283 }
0x169c   :  { %v3299_v59 = vand.u32 2147483648, %v6403_v52  ;;  %vm3293_vm11 = vweird.f32 %v6403_v52  ;;  %v3297_v49 = vand.u32 2147483647, %v6403_v52 }
0x169d   :  { %v6405_v15 = vpop.eup %4502  ;;  %v3287_v18 = vpop.xlane.xlu2 %3286 }
0x169e   :  { %4506 = vrcp.f32 %v3287_v18  ;;  %v3426_v62 = vsel %vm3269_vm5, %v6405_v15, 0.0  ;;  %v3314_v42 = vand.u32 2147483648, %v3287_v18  ;;  %vm3308_vm7 = vweird.f32 %v3287_v18 }
0x169f   :  { %v6407_v40 = vpop.eup %4504  ;;  %3427 = vadd.xlane.f32.xlu1 %v3426_v62  ;;  %4508 = vrcp.f32 %v6403_v52  ;;  %v3312_v24 = vand.u32 2147483647, %v3287_v18  ;;  %vm3298_vm13 = vcmp.eq.f32.partialorder %v3297_v49, 8.507059e+37 }
0x16a0   :  { %v3429_v20 = vsel %vm3269_vm5, %v6407_v40, 0.0  ;;  %v3315_v60 = vor.u32 1.1754944e-38, %v3314_v42 }
0x16a1   :  { %3430 = vadd.xlane.f32.xlu2 %v3429_v20  ;;  %vm3313_vm9 = vcmp.eq.f32.partialorder %v3312_v24, 8.507059e+37 }
0x16a3   :  { %v3559_v23 = vpop.xlane.xlu1 %3558 }
0x16a4   :  { %v4507_v43 = vpop.eup %4506  ;;  %v3563_v22 = vsub.f32 %v3535_v56, %v3559_v23  ;;  %v3562_v44 = vpop.xlane.xlu0 %3561 }
0x16a5   :  { %v3304_v39 = vmul.f32 %v4507_v43, %v3287_v18  ;;  %v3564_v27 = vsub.f32 %v3553_v19, %v3562_v44  ;;  %v4509_v26 = vpop.eup %4508  ;;  %vm3309_vm6 = vweird.f32 %v4507_v43  ;;  %v3300_v19 = vor.u32 1.1754944e-38, %v3299_v59 }
0x16a6   :  { %v3565_v7 = vmul.f32 1.442695, %v3563_v22  ;;  %v3289_v29 = vmul.f32 %v4509_v26, %v6403_v52  ;;  %vm3310_vm8 = vmor %vm3308_vm7, %vm3309_vm6  ;;  %vm3294_vm10 = vweird.f32 %v4509_v26 }
0x16a7   :  { %v3567_v48 = vmul.f32 1.442695, %v3564_v27  ;;  %v3305_v46 = vsub.f32 1.0, %v3304_v39  ;;  %vm3295_vm12 = vmor %vm3293_vm11, %vm3294_vm10 }
0x16a8   :  { %4510 = vpow2.f32 %v3565_v7  ;;  %v3290_v2 = vsub.f32 1.0, %v3289_v29 }
0x16a9   :  { %4512 = vpow2.f32 %v3567_v48  ;;  %v3306_v0 = vmul.f32 %v4507_v43, %v3305_v46 }
0x16aa   :  { %v3291_v37 = vmul.f32 %v4509_v26, %v3290_v2 }
0x16ab   :  { %v3307_v33 = vadd.f32 %v4507_v43, %v3306_v0 }
0x16ac   :  { %v3292_v47 = vadd.f32 %v4509_v26, %v3291_v37 }
0x16ad   :  { %v3311_v34 = vsel %vm3310_vm8, %v4507_v43, %v3307_v33 }
0x16ae   :  { %v6414_v31 = vpop.eup %4510  ;;  %v3316_v17 = vsel %vm3313_vm9, %v3315_v60, %v3311_v34  ;;  %v3296_v63 = vsel %vm3295_vm12, %v4509_v26, %v3292_v47 }
0x16af   :  { %v6416_v25 = vpop.eup %4512  ;;  %v3569_v58 = vsel %vm3269_vm5, %v6414_v31, 0.0  ;;  %v3317_v4 = vmul.f32 %v6384_v16, %v3316_v17  ;;  %v3301_v57 = vsel %vm3298_vm13, %v3300_v19, %v3296_v63 }
0x16b0   :  { %3570 = vadd.xlane.f32.xlu2 %v3569_v58  ;;  %v3572_v35 = vsel %vm3269_vm5, %v6416_v25, 0.0 }
0x16b1   :  { %3573 = vadd.xlane.f32.xlu0 %v3572_v35  ;;  %v3319_v21 = vpack.c.bf16 %v3317_v4, %v3317_v4 }
0x16b2   :  { %v3702_v6 = vpop.xlane.xlu2 %3701 }
0x16b3   :  { %v3706_v3 = vsub.f32 %v3678_v36, %v3702_v6  ;;  %v3302_v36 = vmul.f32 %v6380_v53, %v3301_v57 }
0x16b4   :  { %v3705_v16 = vpop.xlane.xlu0 %3704 }
0x16b5   :  { %v3708_v8 = vmul.f32 1.442695, %v3706_v3  ;;  %v3318_v5 = vpack.c.bf16 %v3302_v36, %v3302_v36  ;;  %v3707_v53 = vsub.f32 %v6391_v45, %v3705_v16 }
0x16b7   :  { %4514 = vpow2.f32 %v3708_v8  ;;  %v3710_v11 = vmul.f32 1.442695, %v3707_v53 }
0x16b9   :  { %4516 = vpow2.f32 %v3710_v11 }
0x16ba   :  { %v3465_v50 = vpop.permute.xlu2 %3464 }
0x16bb   :  { %v3348_v41 = vpop.permute.xlu1 %3347  ;;  %v3470_v28 = vsel %vm487_vm0, %v3465_v50, 0 }
0x16bc   :  { %v3353_v32 = vsel %vm487_vm0, %v3348_v41, 0 }
0x16bd   :  { %v6425_v1 = vpop.eup %4514  ;;  %3362 = vmatpush.bf16.msrb.mxu1 %v3353_v32 }
0x16be   :  { %v3712_v56 = vsel %vm3269_vm5, %v6425_v1, 0.0 }
0x16bf   :  { %3713 = vadd.xlane.f32.xlu1 %v3712_v56  ;;  %v6447_v13 = vpop.eup %4516 }
0x16c0   :  { %4159 = vmatmul.msk.bf16.vlgmr.msrb.gmra.mxu1 %vm483_vm1, %v3319_v21  ;;  %v3715_v54 = vsel %vm3269_vm5, %v6447_v13, 0.0 }
0x16c3   :  { %v3486_v9 = vpop.permute.xlu1 %3485 }
0x16c4   :  { %v3491_v12 = vsel %vm487_vm0, %v3486_v9, 0 }
0x16c5   :  { %3628 = vrot.lane.b32.xlu0 %v6353_v38, %s5196_s5  ;;  %3500 = vmatpush.bf16.msra.mxu1 %v3491_v12 }
0x16c7   :  { %v3324_v30 = vpop.permute.xlu0 %3323 }
0x16c8   :  { %v3329_v55 = vsel %vm487_vm0, %v3324_v30, 0  ;;  %3607 = vrot.lane.b32.xlu2 %v6345_v61, %s5196_s5 }
0x16c9   :  { %3338 = vmatpush.bf16.msra.mxu3 %v3329_v55 }
0x16cc   :  { %4158 = vmatmul.msk.bf16.vlgmr.msra.gmra.mxu3 %vm483_vm1, %v3318_v5 }
0x16cd   :  { %3479 = vmatpush.bf16.msrb.mxu3 %v3470_v28  ;;  %3771 = vrot.lane.b32.xlu0 %v6353_v38, %s5197_s0 }
0x16d8   :  { %3750 = vrot.lane.b32.xlu1 %v6345_v61, %s5197_s0 }
0x16f1   :  { %3716 = vadd.xlane.f32.xlu2 %v3715_v54 }
0x1712   :  { %v3428_v10 = vpop.xlane.xlu1 %3427 }
0x1713   :  { %4518 = vrcp.f32 %v3428_v10  ;;  %v3443_v61 = vand.u32 2147483648, %v3428_v10  ;;  %v3441_v43 = vand.u32 2147483647, %v3428_v10  ;;  %vm3437_vm5 = vweird.f32 %v3428_v10 }
0x1714   :  { %v3431_v14 = vpop.xlane.xlu2 %3430 }
0x1715   :  { %4520 = vrcp.f32 %v3431_v14  ;;  %v3458_v22 = vand.u32 2147483648, %v3431_v14  ;;  %v3456_v39 = vand.u32 2147483647, %v3431_v14  ;;  %v3444_v7 = vor.u32 1.1754944e-38, %v3443_v61 }
0x1716   :  { %vm3452_vm7 = vweird.f32 %v3431_v14  ;;  %vm3442_vm8 = vcmp.eq.f32.partialorder %v3441_v43, 8.507059e+37 }
0x1717   :  { %v3459_v0 = vor.u32 1.1754944e-38, %v3458_v22  ;;  %vm3457_vm10 = vcmp.eq.f32.partialorder %v3456_v39, 8.507059e+37 }
0x1719   :  { %v4519_v52 = vpop.eup %4518 }
0x171a   :  { %v3433_v38 = vmul.f32 %v4519_v52, %v3428_v10  ;;  %vm3438_vm14 = vweird.f32 %v4519_v52 }
0x171b   :  { %v4521_v18 = vpop.eup %4520  ;;  %vm3439_vm6 = vmor %vm3437_vm5, %vm3438_vm14 }
0x171c   :  { %v3448_v62 = vmul.f32 %v4521_v18, %v3431_v14  ;;  %v3434_v20 = vsub.f32 1.0, %v3433_v38  ;;  %vm3453_vm15 = vweird.f32 %v4521_v18 }
0x171d   :  { %vm3454_vm9 = vmor %vm3452_vm7, %vm3453_vm15 }
0x171e   :  { %v3449_v23 = vsub.f32 1.0, %v3448_v62  ;;  %v3435_v45 = vmul.f32 %v4519_v52, %v3434_v20 }
0x1720   :  { %v3450_v44 = vmul.f32 %v4521_v18, %v3449_v23  ;;  %v3436_v27 = vadd.f32 %v4519_v52, %v3435_v45 }
0x1722   :  { %v3451_v48 = vadd.f32 %v4521_v18, %v3450_v44  ;;  %v3440_v46 = vsel %vm3439_vm6, %v4519_v52, %v3436_v27 }
0x1723   :  { %v3571_v26 = vpop.xlane.xlu2 %3570  ;;  %v3445_v58 = vsel %vm3442_vm8, %v3444_v7, %v3440_v46 }
0x1724   :  { %v3455_v29 = vsel %vm3454_vm9, %v4521_v18, %v3451_v48  ;;  %4522 = vrcp.f32 %v3571_v26  ;;  %v3574_v33 = vpop.xlane.xlu0 %3573  ;;  %v3446_v35 = vmul.f32 %v6405_v15, %v3445_v58  ;;  %v3586_v15 = vand.u32 2147483648, %v3571_v26 }
0x1725   :  { %v3460_v42 = vsel %vm3457_vm10, %v3459_v0, %v3455_v29  ;;  %4524 = vrcp.f32 %v3574_v33  ;;  %vm3580_vm12 = vweird.f32 %v3571_v26  ;;  %v3601_v32 = vand.u32 2147483648, %v3574_v33 }
0x1726   :  { %v3461_v24 = vmul.f32 %v6407_v40, %v3460_v42  ;;  %v3462_v6 = vpack.c.bf16 %v3446_v35, %v3446_v35  ;;  %v3584_v40 = vand.u32 2147483647, %v3571_v26  ;;  %v3599_v21 = vand.u32 2147483647, %v3574_v33 }
0x1727   :  { %v3587_v56 = vor.u32 1.1754944e-38, %v3586_v15  ;;  %vm3595_vm15 = vweird.f32 %v3574_v33  ;;  %v3602_v9 = vor.u32 1.1754944e-38, %v3601_v32  ;;  %v4218_v32 = vld [vmem:[#allocation34 + $0x8] sm:$0xff] }
0x1728   :  { %v3463_v3 = vpack.c.bf16 %v3461_v24, %v3461_v24  ;;  %4162 = vmatmul.msk.bf16.vlgmr.msrb.gmra.mxu3 %vm483_vm1, %v3462_v6  ;;  %vm3585_vm5 = vcmp.eq.f32.partialorder %v3584_v40, 8.507059e+37  ;;  %vm3600_vm7 = vcmp.eq.f32.partialorder %v3599_v21, 8.507059e+37  ;;  %3847 = vmatpush.bf16.msrb.mxu2 %v4218_v32 }
0x172a   :  { %v4523_v2 = vpop.eup %4522  ;;  %4163 = vmatmul.msk.bf16.vlgmr.msra.gmra.mxu1 %vm483_vm1, %v3463_v3 }
0x172b   :  { %v3576_v34 = vmul.f32 %v4523_v2, %v3571_v26  ;;  %v3608_v60 = vpop.permute.xlu2 %3607  ;;  %v4525_v8 = vpop.eup %4524  ;;  %vm3581_vm11 = vweird.f32 %v4523_v2 }
0x172c   :  { %v3613_v17 = vsel %vm487_vm0, %v3608_v60, 0  ;;  %v3591_v4 = vmul.f32 %v4525_v8, %v3574_v33  ;;  %vm3596_vm13 = vweird.f32 %v4525_v8  ;;  %vm3582_vm14 = vmor %vm3580_vm12, %vm3581_vm11 }
0x172d   :  { %v3577_v37 = vsub.f32 1.0, %v3576_v34  ;;  %3622 = vmatpush.bf16.msra.mxu3 %v3613_v17  ;;  %vm3597_vm6 = vmor %vm3595_vm15, %vm3596_vm13  ;;  %vm3823_vm15 = vcmask 1041409  }
0x172e   :  { %v3592_v47 = vsub.f32 1.0, %v3591_v4 }
0x172f   :  { %v3578_v41 = vmul.f32 %v4523_v2, %v3577_v37 }
0x1730   :  { %v3593_v49 = vmul.f32 %v4525_v8, %v3592_v47 }
0x1731   :  { %v3579_v59 = vadd.f32 %v4523_v2, %v3578_v41 }
0x1732   :  { %v3714_v16 = vpop.xlane.xlu1 %3713  ;;  %v3594_v19 = vadd.f32 %v4525_v8, %v3593_v49 }
0x1733   :  { %v3583_v63 = vsel %vm3582_vm14, %v4523_v2, %v3579_v59  ;;  %4526 = vrcp.f32 %v3714_v16  ;;  %v3729_v38 = vand.u32 2147483648, %v3714_v16  ;;  %vm3723_vm9 = vweird.f32 %v3714_v16  ;;  %v4217_v59 = vld [vmem:[#allocation34] sm:$0xff] }
0x1734   :  { %v3588_v57 = vsel %vm3585_vm5, %v3587_v56, %v3583_v63  ;;  %v3598_v36 = vsel %vm3597_vm6, %v4525_v8, %v3594_v19  ;;  %v3727_v62 = vand.u32 2147483647, %v3714_v16  ;;  %3848 = vmatpush.bf16.msrb.mxu2 %v4217_v59 }
0x1735   :  { %v3589_v12 = vmul.f32 %v6414_v31, %v3588_v57  ;;  %v3603_v50 = vsel %vm3600_vm7, %v3602_v9, %v3598_v36  ;;  %v3730_v61 = vor.u32 1.1754944e-38, %v3729_v38 }
0x1736   :  { %v3604_v55 = vmul.f32 %v6416_v25, %v3603_v50  ;;  %vm3728_vm11 = vcmp.eq.f32.partialorder %v3727_v62, 8.507059e+37 }
0x1737   :  { %v3605_v30 = vpack.c.bf16 %v3589_v12, %v3589_v12  ;;  %v3629_v28 = vpop.permute.xlu0 %3628 }
0x1738   :  { %v3634_v5 = vsel %vm487_vm0, %v3629_v28, 0  ;;  %v3606_v11 = vpack.c.bf16 %v3604_v55, %v3604_v55 }
0x1739   :  { %v4527_v53 = vpop.eup %4526  ;;  %4166 = vmatmul.msk.bf16.vlgmr.msra.gmra.mxu3 %vm483_vm1, %v3605_v30  ;;  %3643 = vmatpush.bf16.msrb.mxu1 %v3634_v5 }
0x173a   :  { %v3719_v54 = vmul.f32 %v4527_v53, %v3714_v16  ;;  %vm3724_vm8 = vweird.f32 %v4527_v53 }
0x173b   :  { %vm3725_vm10 = vmor %vm3723_vm9, %vm3724_vm8 }
0x173c   :  { %v3720_v10 = vsub.f32 1.0, %v3719_v54  ;;  %4167 = vmatmul.msk.bf16.vlgmr.msrb.gmra.mxu1 %vm483_vm1, %v3606_v11 }
0x173d   :  { %v6461_v14 = vpop.f32.mrf.mxu1 }
0x173e   :  { %v3721_v31 = vmul.f32 %v4527_v53, %v3720_v10  ;;  %v3369_v16 = vadd.f32 %v6461_v14, %v6336_v51 }
0x173f   :  { %v3772_v52 = vpop.permute.xlu0 %3771 }
0x1740   :  { %v3722_v18 = vadd.f32 %v4527_v53, %v3721_v31  ;;  %v3777_v25 = vsel %vm487_vm0, %v3772_v52, 0 }
0x1741   :  { %3786 = vmatpush.bf16.msra.mxu1 %v3777_v25 }
0x1742   :  { %v3726_v20 = vsel %vm3725_vm10, %v4527_v53, %v3722_v18 }
0x1743   :  { %v3731_v45 = vsel %vm3728_vm11, %v3730_v61, %v3726_v20  ;;  %v4220_v61 = vld [vmem:[#allocation35 + $0x8] sm:$0xff] }
0x1744   :  { %v3732_v43 = vmul.f32 %v6425_v1, %v3731_v45  ;;  %3899 = vmatpush.bf16.msrb.mxu0 %v4220_v61 }
0x1745   :  { %v3366_v23 = vpop.f32.mrf.mxu1 }
0x1746   :  { %v3748_v39 = vpack.c.bf16 %v3732_v43, %v3732_v43  ;;  %v4219_v23 = vld [vmem:[#allocation35] sm:$0xff] }
0x1748   :  { %3900 = vmatpush.bf16.msrb.mxu0 %v4219_v23 }
0x174a   :  { %v3751_v22 = vpop.permute.xlu1 %3750 }
0x174b   :  { %v3756_v44 = vsel %vm487_vm0, %v3751_v22, 0 }
0x174c   :  { %3765 = vmatpush.bf16.msrb.mxu3 %v3756_v44 }
0x174f   :  { %v3340_v27 = vpop.f32.mrf.mxu3  ;;  %4170 = vmatmul.msk.bf16.vlgmr.msrb.gmra.mxu3 %vm483_vm1, %v3748_v39 }
0x1750   :  { %v3368_v53 = vadd.f32 %v3340_v27, %v6336_v51 }
0x1757   :  { %v3342_v7 = vpop.f32.mrf.mxu3 }
0x1764   :  { %v3717_v48 = vpop.xlane.xlu2 %3716 }
0x1765   :  { %4528 = vrcp.f32 %v3717_v48  ;;  %v3744_v58 = vand.u32 2147483648, %v3717_v48  ;;  %v3742_v33 = vand.u32 2147483647, %v3717_v48  ;;  %vm3738_vm13 = vweird.f32 %v3717_v48 }
0x1767   :  { %v3745_v1 = vor.u32 1.1754944e-38, %v3744_v58  ;;  %vm3743_vm0 = vcmp.eq.f32.partialorder %v3742_v33, 8.507059e+37 }
0x176b   :  { %v4529_v46 = vpop.eup %4528 }
0x176c   :  { %v3734_v0 = vmul.f32 %v4529_v46, %v3717_v48  ;;  %vm3739_vm12 = vweird.f32 %v4529_v46 }
0x176d   :  { %vm3740_vm14 = vmor %vm3738_vm13, %vm3739_vm12 }
0x176e   :  { %v3735_v26 = vsub.f32 1.0, %v3734_v0 }
0x1770   :  { %v3736_v29 = vmul.f32 %v4529_v46, %v3735_v26 }
0x1772   :  { %v3737_v35 = vadd.f32 %v4529_v46, %v3736_v29 }
0x1774   :  { %v3741_v42 = vsel %vm3740_vm14, %v4529_v46, %v3737_v35  ;;  %v4222_v35 = vld [vmem:[#allocation37 + $0x8] sm:$0xff] }
0x1775   :  { %v3746_v24 = vsel %vm3743_vm0, %v3745_v1, %v3741_v42  ;;  %3937 = vmatpush.bf16.msra.mxu3 %v4222_v35  ;;  %v4221_v1 = vld [vmem:[#allocation37] sm:$0xff]  ;;  %v4304_v42 = vld [vmem:[%s5354_s4] ss:$0 sm:$0xff]  ;;  %s5096_s4 = scalar_lea.hbm %s5095_s18, 2 }
0x1776   :  { %v3747_v6 = vmul.f32 %v6447_v13, %v3746_v24  ;;  %p5097_p3 = scmp.ne.s32.totalorder %s5095_s18, %s5096_s4  ;;  %p5100_p5 = scmp.lt.s32.totalorder %s5098_s21, %s5096_s4 }
0x1778   :  { %v3749_v3 = vpack.c.bf16 %v3747_v6, %v3747_v6  ;;  %p5101_p6 = por %p5100_p5, %p5099_p4 }
0x1779   :  { %3938 = vmatpush.bf16.msra.mxu3 %v4221_v1 }
0x177a   :  { %4171 = vmatmul.msk.bf16.vlgmr.msra.gmra.mxu1 %vm483_vm1, %v3749_v3  ;;  %p5102_p7 = pnand %p5101_p6, %p5097_p3 }
0x17a7   :  { %v3502_v2 = vpop.f32.mrf.mxu1 }
0x17a8   :  { %3510 = vrot.lane.b32.xlu0 %v3502_v2, %s5166_s16 }
0x17ab   :  { %v3481_v34 = vpop.f32.mrf.mxu3 }
0x17af   :  { %v3504_v60 = vpop.f32.mrf.mxu1 }
0x17b0   :  { %3508 = vrot.lane.b32.xlu0 %v3481_v34, %s5166_s16  ;;  %s6540_s16 = sld [smem:[#allocation66_spill]]  ;;  %v4305_v60 = vld [vmem:[%s5364_s19] ss:$0 sm:$0xff] }
0x17b3   :  { %v3483_v8 = vpop.f32.mrf.mxu3 }
0x17b6   :  { %v4303_v45 = vld [vmem:[%s6540_s16] ss:$0 sm:$0xff] }
0x17b9   :  { %v3645_v17 = vpop.f32.mrf.mxu1 }
0x17ba   :  { %3653 = vrot.lane.b32.xlu2 %v3645_v17, %s5198_s30 }
0x17bc   :  { %v3624_v37 = vpop.f32.mrf.mxu3 }
0x17bd   :  { %3651 = vrot.lane.b32.xlu0 %v3624_v37, %s5198_s30 }
0x17c1   :  { %v3647_v4 = vpop.f32.mrf.mxu1 }
0x17c4   :  { %v3626_v15 = vpop.f32.mrf.mxu3 }
0x17d2   :  { %v3767_v13 = vpop.f32.mrf.mxu3 }
0x17da   :  { %v3769_v41 = vpop.f32.mrf.mxu3 }
0x17f7   :  { %v3788_v40 = vpop.f32.mrf.mxu1 }
0x17f8   :  { %3796 = vrot.lane.b32.xlu1 %v3788_v40, %s5199_s23 }
0x17ff   :  { %v3790_v47 = vpop.f32.mrf.mxu1 }
0x1800   :  { %3794 = vrot.lane.b32.xlu1 %v3767_v13, %s5199_s23 }
0x1814   :  { %v3654_v63 = vpop.permute.xlu2 %3653 }
0x1815   :  { %v3658_v57 = vadd.f32 %v3654_v63, %v6336_v51 }
0x181a   :  { %v3511_v49 = vpop.permute.xlu0 %3510 }
0x181b   :  { %v3515_v21 = vadd.f32 %v3511_v49, %v6336_v51 }
0x181d   :  { %v3803_v19 = vsel %vm483_vm1, %v3369_v16, %v3515_v21 }
0x181e   :  { %v3805_v36 = vsel %vm1164_vm2, %v3803_v19, %v3658_v57 }
0x1822   :  { %v3509_v56 = vpop.permute.xlu0 %3508 }
0x1823   :  { %v3514_v55 = vadd.f32 %v3509_v56, %v6336_v51 }
0x1825   :  { %v3802_v54 = vsel %vm483_vm1, %v3368_v53, %v3514_v55 }
0x182f   :  { %v3652_v50 = vpop.permute.xlu0 %3651 }
0x1830   :  { %v3657_v28 = vadd.f32 %v3652_v50, %v6336_v51 }
0x1832   :  { %v3804_v14 = vsel %vm1164_vm2, %v3802_v54, %v3657_v28 }
0x186a   :  { %v3797_v9 = vpop.permute.xlu1 %3796 }
0x186b   :  { %v3801_v12 = vadd.f32 %v3797_v9, %v6336_v51 }
0x186d   :  { %v3807_v30 = vsel %vm1169_vm3, %v3805_v36, %v3801_v12 }
0x186e   :  { %v3809_v5 = vpack.c.bf16 %v3807_v30, %v3807_v30 }
0x1870   :  { %v3821_v31 = vunpack.c.l.b16 %v3809_v5 }
0x1872   :  { %v3795_v11 = vpop.permute.xlu1 %3794  ;;  %v3822_v38 = vrot.slane %v3821_v31, 7 }
0x1873   :  { %v3800_v10 = vadd.f32 %v3795_v11, %v6336_v51 }
0x1875   :  { %v3806_v52 = vsel %vm1169_vm3, %v3804_v14, %v3800_v10 }
0x1876   :  { %v3808_v18 = vpack.c.bf16 %v3806_v52, %v3806_v52 }
0x1878   :  { %v3820_v25 = vunpack.c.l.b16 %v3808_v18 }
0x187a   :  { %v3824_v62 = vsel %vm3823_vm15, %v3822_v38, %v3820_v25 }
0x187b   :  { %v3825_v20 = vpack.c.b16 %v3824_v62, %v3824_v62 }
0x187d   :  { %4180 = vmatmul.msk.bf16.vlgmr.msrb.gmra.mxu2 %vm1196_vm4, %v3825_v20 }
0x1900   :  { %v3850_v51 = vpop.f32.mrf.mxu2 }
0x1901   :  { %v3851_v43 = vadd.f32 %v4303_v45, %v3850_v51 }
0x1903   :  { %v3854_v22 = vmax.f32 %v3851_v43, 0.0 }
0x1905   :  { %v3856_v44 = vrot.slane %v3854_v22, 1  ;;  %v3859_v39 = vadd.f32 %v3854_v22, %v3806_v52 }
0x1907   :  { %v3860_v27 = vadd.f32 %v3856_v44, %v3807_v30  ;;  %v3861_v48 = vpack.c.bf16 %v3859_v39, %v3859_v39 }
0x1908   :  { %v3852_v7 = vpop.f32.mrf.mxu2 }
0x1909   :  { %v3862_v46 = vpack.c.bf16 %v3860_v27, %v3860_v27  ;;  %v3873_v26 = vunpack.c.l.b16 %v3861_v48 }
0x190b   :  { %v3874_v0 = vunpack.c.l.b16 %v3862_v46 }
0x190d   :  { %v3875_v58 = vrot.slane %v3874_v0, 7 }
0x190f   :  { %v3876_v29 = vsel %vm3823_vm15, %v3875_v58, %v3873_v26 }
0x1910   :  { %v3877_v33 = vpack.c.b16 %v3876_v29, %v3876_v29 }
0x1912   :  { %4189 = vmatmul.msk.bf16.vlgmr.msrb.gmra.mxu0 %vm1196_vm4, %v3877_v33 }
0x198f   :  { %v3902_v24 = vpop.f32.mrf.mxu0 }
0x1990   :  { %v3903_v6 = vadd.f32 %v4304_v42, %v3902_v24 }
0x1992   :  { %v3906_v3 = vmax.f32 %v3903_v6, 0.0 }
0x1994   :  { %v3907_v2 = vpack.c.bf16 %v3906_v3, %v3906_v3 }
0x1996   :  { %4198 = vmatmul.msk.bf16.vlgmr.msra.gmra.mxu3 %vm1196_vm4, %v3907_v2 }
0x1997   :  { %v3904_v34 = vpop.f32.mrf.mxu0 }
0x1a19   :  { %v3940_v8 = vpop.f32.mrf.mxu3 }
0x1a1a   :  { %v3941_v17 = vadd.f32 %v4305_v60, %v3940_v8 }
0x1a1c   :  { %3944 = vst [vmem:[#allocation38] sm:$0x3] %v3941_v17 }
0x1a1d   :  { %5105 = shalt.err (!%p5102_p7)
}
0x1a1e   :  { %3955 = dma.vmem_to_hbm [thread:$0]  %s3951_s3, 32, %s3953_s28, [#allocation4]  }
0x1a21   :  { %v3942_v37 = vpop.f32.mrf.mxu3 }
0x1a22   :  { %5130 = dma.done.wait [#allocation4], 32  }
0x1a23   :  { %5131 = vsyncadd [#allocation4], 4294967264 }
0x1a24   :  { %3960 = vsyncpa [#allocation3], 1 }
0x1a25   :  { %3961 = vsyncpa [#allocation6], 1 }
0x1a26   :  { %3962 = vsyncpa [#allocation9], 1 }
0x1a27   :  { %3963 = vsyncpa [#allocation12], 1 }
0x1a28   :  { %3964 = vsyncpa [#allocation15], 1 }
0x1a29   :  { %3965 = vsyncpa [#allocation18], 1 }
0x1a2a   :  { %3966 = vsyncpa [#allocation21], 1 }
0x1a2b   :  { %3967 = vsyncpa [#allocation24], 1 }
0x1a2c   :  { %3968 = vsyncpa [#allocation27], 1 }
0x1a2d   :  { %3969 = vsyncpa [#allocation30], 1 }
0x1a2e   :  { %3970 = vsyncpa [#allocation33], 1 }
0x1a2f   :  { %3971 = vsyncpa [#allocation36], 1 }
0x1a30   :  { %3972 = vsyncpa [#allocation4], 1 }

</bundles_post_ra>
